<compile_context>
chip_gen: v6e
topology: v6e:2x2x1
jax: 0.10.0
libtpu: 0.0.40
codegen_flags: <defaults>
</compile_context>

<pallas_src>
import jax
import jax.numpy as jnp
from jax import lax
from jax.experimental import pallas as pl
from jax.experimental.pallas import tpu as pltpu

_EPS = 1e-5
_LANE = 128
EXPANSION = 4


def _round_up(x, m):
    return (x + m - 1) // m * m


def _fold_bn(w_oihw, gamma, beta, mean, var):
    """Fold eval-mode BN into the conv weight; return (folded_w, bias)."""
    s = gamma / jnp.sqrt(var + _EPS)
    b = beta - mean * s
    return w_oihw * s[:, None, None, None], b


def _pad2d(w2d, rows, cols):
    r, c = w2d.shape
    return jnp.pad(w2d, ((0, rows - r), (0, cols - c)))


def _const_spec(shape):
    """BlockSpec for grid-invariant operands (weights/biases): single-buffered."""
    idx = lambda n: (0,) * len(shape)
    try:
        return pl.BlockSpec(shape, idx, pipeline_mode=pl.Buffered(1))
    except (TypeError, AttributeError):   # older jax without pipeline_mode support
        return pl.BlockSpec(shape, idx)


# ------------------------------ fused kernel --------------------------------

def _make_kernel(*, s, Wp, H, W, n_planes, C1_p, TILE_M, n1_tiles, n2_tiles,
                 has_sc, psc, offsc, pack_k, cdt):
    # tap t = kh*3 + kw reads parity plane `p` at flat row offset `off`
    taps = [((i % s) * s + (j % s), (i // s) * Wp + (j // s))
            for i in range(3) for j in range(3)]
    inv_wp = 1.0 / float(Wp)

    def kernel(*refs):
        if has_sc:
            (xp_ref, w1_ref, b1_ref, w2_ref, b2_ref, w3_ref, b3_ref,
             wsc_ref, bsc_ref, o_ref, t1_ref) = refs
        else:
            (xp_ref, w1_ref, b1_ref, w2_ref, b2_ref, w3_ref, b3_ref,
             o_ref, t1_ref) = refs

        # ---- stage 1: conv1 (1x1, BN folded) + bias + ReLU, tiled over rows -----
        # Interior mask (kills relu(bias) on the zero-pad ring / pitch padding /
        # tail rows) is generated in-kernel from the flat row index.  The f32 index
        # math is exact because flat indices are < 2**22 (asserted in the wrapper).
        def conv1_tile(t, p, a, b):
            m0 = pl.multiple_of(t * TILE_M, TILE_M)
            xin = xp_ref[0, p, pl.ds(m0, TILE_M), :]
            y1 = jnp.dot(xin, w1_ref[...], preferred_element_type=jnp.float32)
            y1 = jnp.maximum(y1 + b1_ref[...], 0.0)
            f = (m0 + lax.broadcasted_iota(jnp.int32, (TILE_M, 1), 0)
                 ).astype(jnp.float32)
            r = jnp.floor((f + 0.5) * inv_wp)      # plane row index
            c = f - r * Wp                          # plane col index (exact)
            rr = r * s + a                          # row in spatially padded input
            cc = c * s + b                          # col in spatially padded input
            ok = (rr >= 1.0) & (rr <= H) & (cc >= 1.0) & (cc <= W)
            t1_ref[p, pl.ds(m0, TILE_M), :] = (
                jnp.where(ok, y1, 0.0).astype(t1_ref.dtype))

        for p in range(n_planes):
            a, b = p // s, p % s

            def body1(t, carry, p=p, a=a, b=b):
                conv1_tile(t, p, a, b)
                return carry

            lax.fori_loop(0, n1_tiles, body1, 0)

        # ---- stage 2: conv2 (3x3, stride via parity planes) + conv3 + shortcut +
        #      residual add + final ReLU, tiled over output rows --------------------
        def body2(t, carry):
            m0 = pl.multiple_of(t * TILE_M, TILE_M)
            if pack_k:
                # pack the 9 taps along K -> one (TILE_M, 9*C1) @ (9*C1, C1) matmul
                a_pk = jnp.concatenate(
                    [t1_ref[p, pl.ds(off + m0, TILE_M), :] for p, off in taps],
                    axis=-1)
                acc2 = jnp.dot(a_pk, w2_ref[...],
                               preferred_element_type=jnp.float32)
            else:
                acc2 = jnp.zeros((TILE_M, C1_p), jnp.float32)
                for ti, (p, off) in enumerate(taps):
                    acc2 = acc2 + jnp.dot(
                        t1_ref[p, pl.ds(off + m0, TILE_M), :], w2_ref[ti],
                        preferred_element_type=jnp.float32)
            y2 = jnp.maximum(acc2 + b2_ref[...], 0.0).astype(cdt)
            y3 = jnp.dot(y2, w3_ref[...],
                         preferred_element_type=jnp.float32) + b3_ref[...]
            xsc = xp_ref[0, psc, pl.ds(offsc + m0, TILE_M), :]
            if has_sc:
                sc = jnp.dot(xsc, wsc_ref[...],
                             preferred_element_type=jnp.float32) + bsc_ref[...]
            else:
                sc = xsc.astype(jnp.float32)
            o_ref[0, pl.ds(m0, TILE_M), :] = (
                jnp.maximum(y3 + sc, 0.0).astype(o_ref.dtype))
            return carry

        lax.fori_loop(0, n2_tiles, body2, 0)

    return kernel


# ------------------------------ wrapper --------------------------------------

def qbw_bottleneck_forward(x_nchw, params, stride, *, compute_dtype=jnp.bfloat16):
    s = int(stride)
    NB, Cin, H, W = x_nchw.shape
    assert (H + 2) % s == 0 and (W + 2) % s == 0, "spatial+pad must divide stride"

    planes = params["w1"].shape[0]
    cexp = params["w3"].shape[0]
    has_sc = "w_sc" in params
    if not has_sc:
        assert s == 1 and Cin == cexp, "identity shortcut requires stride 1, Cin==exp"

    Cin_p = _round_up(Cin, _LANE)
    C1_p = _round_up(planes, _LANE)
    C3_p = _round_up(cexp, _LANE)

    Hh, Wh = (H + 2) // s, (W + 2) // s          # parity-plane spatial dims
    Ho = (H - 1) // s + 1
    Wo = (W - 1) // s + 1
    Wp = _round_up(Wh, 8)                        # sublane-aligned row pitch
    n_planes = s * s
    n_flat = Hh * Wp                             # flattened plane length
    Mo = Ho * Wp                                 # extended-width output rows

    TILE_M = max(8, min(256, _round_up(Mo, 8)))
    Mo_p = _round_up(Mo, TILE_M)
    max_off = (2 // s) * Wp + (2 // s)
    t1_rows = _round_up(max(n_flat, max_off + Mo_p), TILE_M)
    n1_tiles = t1_rows // TILE_M
    n2_tiles = Mo_p // TILE_M
    psc = (1 % s) * s + (1 % s)                  # shortcut parity plane
    offsc = (1 // s) * Wp + (1 // s)             # shortcut flat offset
    xp_rows = _round_up(max(t1_rows, offsc + Mo_p), 8)
    assert xp_rows < (1 << 22), "flat row index exceeds exact-f32 range"

    # --- input: cast to compute dtype first (layout passes stay narrow), pad
    #     channels + spatial(1), space-to-batch into s*s parity planes, pad the
    #     row pitch to Wp and the flat length so every kernel slice is in bounds.
    x = jnp.transpose(x_nchw, (0, 2, 3, 1)).astype(compute_dtype)   # NCHW -> NHWC
    xp = jnp.pad(x, ((0, 0), (1, 1), (1, 1), (0, Cin_p - Cin)))
    xp = xp.reshape(NB, Hh, s, Wh, s, Cin_p)
    xp = jnp.transpose(xp, (0, 2, 4, 1, 3, 5))
    xp = jnp.pad(xp, ((0, 0), (0, 0), (0, 0), (0, 0), (0, Wp - Wh), (0, 0)))
    xp = xp.reshape(NB, n_planes, n_flat, Cin_p)
    xp = jnp.pad(xp, ((0, 0), (0, 0), (0, xp_rows - n_flat), (0, 0)))

    # --- weights: fold BN scale into the conv weights; biases stay f32
    w1, b1 = _fold_bn(params["w1"], *params["bn1"])
    w2, b2 = _fold_bn(params["w2"], *params["bn2"])
    w3, b3 = _fold_bn(params["w3"], *params["bn3"])

    pack_k = C1_p <= _LANE     # pack 3x3 taps along K when channels underfill MXU
    w1m = _pad2d(w1.reshape(planes, Cin).T, Cin_p, C1_p).astype(compute_dtype)
    w2t = jnp.transpose(w2, (2, 3, 1, 0))                       # (3, 3, I, O)
    w2t = jnp.pad(w2t, ((0, 0), (0, 0), (0, C1_p - planes), (0, C1_p - planes)))
    w2m = (w2t.reshape(9 * C1_p, C1_p) if pack_k
           else w2t.reshape(9, C1_p, C1_p)).astype(compute_dtype)
    w3m = _pad2d(w3.reshape(cexp, planes).T, C1_p, C3_p).astype(compute_dtype)
    b1m = _pad2d(b1.reshape(1, planes), 1, C1_p).astype(jnp.float32)
    b2m = _pad2d(b2.reshape(1, planes), 1, C1_p).astype(jnp.float32)
    b3m = _pad2d(b3.reshape(1, cexp), 1, C3_p).astype(jnp.float32)

    args = [xp, w1m, b1m, w2m, b2m, w3m, b3m]
    in_specs = [
        pl.BlockSpec((1, n_planes, xp_rows, Cin_p), lambda n: (n, 0, 0, 0)),
        _const_spec(w1m.shape), _const_spec(b1m.shape),
        _const_spec(w2m.shape), _const_spec(b2m.shape),
        _const_spec(w3m.shape), _const_spec(b3m.shape),
    ]
    if has_sc:
        wsc, bsc = _fold_bn(params["w_sc"], *params["bn_sc"])
        wscm = _pad2d(wsc.reshape(cexp, Cin).T, Cin_p, C3_p).astype(compute_dtype)
        bscm = _pad2d(bsc.reshape(1, cexp), 1, C3_p).astype(jnp.float32)
        args += [wscm, bscm]
        in_specs += [_const_spec(wscm.shape), _const_spec(bscm.shape)]

    kernel = _make_kernel(s=s, Wp=Wp, H=H, W=W, n_planes=n_planes, C1_p=C1_p,
                          TILE_M=TILE_M, n1_tiles=n1_tiles, n2_tiles=n2_tiles,
                          has_sc=has_sc, psc=psc, offsc=offsc, pack_k=pack_k,
                          cdt=compute_dtype)

    cdb = jnp.dtype(compute_dtype).itemsize
    flops = 2 * NB * (n_planes * t1_rows * Cin_p * C1_p
                      + Mo_p * 9 * C1_p * C1_p
                      + Mo_p * C1_p * C3_p
                      + (Mo_p * Cin_p * C3_p if has_sc else 0))
    bytes_accessed = int(sum(a.size * a.dtype.itemsize for a in args)
                         + NB * Mo_p * C3_p * cdb)

    # VMEM budget: double-buffered activation blocks + single-buffered constants +
    # the conv1 scratch + per-tile temporaries, plus slack.
    vmem_need = (2 * n_planes * xp_rows * Cin_p * cdb
                 + 2 * Mo_p * C3_p * cdb
                 + n_planes * t1_rows * C1_p * cdb
                 + sum(a.size * a.dtype.itemsize for a in args[1:])
                 + TILE_M * (9 * C1_p * cdb + 4 * (2 * C1_p + C3_p + Cin_p))
                 + (2 << 20))
    vmem_limit = int(min(max(vmem_need, 32 << 20), 128 << 20))

    out_flat = pl.pallas_call(
        kernel,
        out_shape=jax.ShapeDtypeStruct((NB, Mo_p, C3_p), compute_dtype),
        grid=(NB,),
        in_specs=in_specs,
        out_specs=pl.BlockSpec((1, Mo_p, C3_p), lambda n: (n, 0, 0)),
        scratch_shapes=[pltpu.VMEM((n_planes, t1_rows, C1_p), compute_dtype)],
        compiler_params=pltpu.CompilerParams(
            dimension_semantics=("parallel",),
            vmem_limit_bytes=vmem_limit),
        cost_estimate=pl.CostEstimate(flops=flops, transcendentals=0,
                                      bytes_accessed=bytes_accessed),
    )(*args)

    out = out_flat[:, :Mo].reshape(NB, Ho, Wp, C3_p)[:, :, :Wo, :cexp]
    return jnp.transpose(out, (0, 3, 1, 2))      # NHWC -> NCHW


# ------------------------- parameters & pure-JAX reference -------------------

def init_params(key, in_planes, planes, stride):
    ks = jax.random.split(key, 16)
    exp = EXPANSION * planes

    def conv_w(k, cout, cin, kh, kw):
        fan_in = cin * kh * kw
        return jax.random.normal(k, (cout, cin, kh, kw), jnp.float32) / jnp.sqrt(fan_in)

    def bn(k, c):
        k1, k2, k3, k4 = jax.random.split(k, 4)
        gamma = 0.5 + jax.random.uniform(k1, (c,), jnp.float32)
        beta = 0.1 * jax.random.normal(k2, (c,), jnp.float32)
        mean = 0.1 * jax.random.normal(k3, (c,), jnp.float32)
        var = 0.5 + jax.random.uniform(k4, (c,), jnp.float32)
        return gamma, beta, mean, var

    p = {
        "w1": conv_w(ks[0], planes, in_planes, 1, 1), "bn1": bn(ks[1], planes),
        "w2": conv_w(ks[2], planes, planes, 3, 3),    "bn2": bn(ks[3], planes),
        "w3": conv_w(ks[4], exp, planes, 1, 1),        "bn3": bn(ks[5], exp),
    }
    if stride != 1 or in_planes != exp:
        p["w_sc"] = conv_w(ks[6], exp, in_planes, 1, 1)
        p["bn_sc"] = bn(ks[7], exp)
    return p


def _ref_convbn(x, w, gamma, beta, mean, var, stride, pad):
    y = lax.conv_general_dilated(
        x, w, (stride, stride), [(pad, pad), (pad, pad)],
        dimension_numbers=("NCHW", "OIHW", "NCHW"))
    s = (gamma / jnp.sqrt(var + _EPS)).reshape(1, -1, 1, 1)
    b = (beta - mean * gamma / jnp.sqrt(var + _EPS)).reshape(1, -1, 1, 1)
    return y * s + b


def qbw_bottleneck_ref(x, params, stride):
    out = jax.nn.relu(_ref_convbn(x, params["w1"], *params["bn1"], 1, 0))
    out = jax.nn.relu(_ref_convbn(out, params["w2"], *params["bn2"], stride, 1))
    out = _ref_convbn(out, params["w3"], *params["bn3"], 1, 0)
    if "w_sc" in params:
        sc = _ref_convbn(x, params["w_sc"], *params["bn_sc"], stride, 0)
    else:
        sc = x
    return jax.nn.relu(out + sc)


# --------------------------------- main --------------------------------------

if __name__ == "__main__":
    key = jax.random.PRNGKey(0)
    kx, kp, kx2, kp2 = jax.random.split(key, 4)

    # Config A: downsampling block (stride 2, projection shortcut).
    batch, in_planes, planes, spatial, stride = 2, 4, 4, 16, 2
    x = jax.random.normal(kx, (batch, in_planes, spatial, spatial), jnp.float32)
    params = init_params(kp, in_planes, planes, stride)
    ref = qbw_bottleneck_ref(x, params, stride)

    out_f32 = jax.block_until_ready(
        qbw_bottleneck_forward(x, params, stride, compute_dtype=jnp.float32))
    assert out_f32.shape == (batch, EXPANSION * planes,
                             spatial // stride, spatial // stride)
    assert jnp.allclose(out_f32, ref, atol=1e-4, rtol=1e-4), "f32 mismatch (stride 2)"

    out_bf16 = jax.block_until_ready(
        qbw_bottleneck_forward(x, params, stride, compute_dtype=jnp.bfloat16))
    assert jnp.allclose(out_bf16, ref, atol=1e-1, rtol=5e-2), "bf16 mismatch (stride 2)"

    # Config B: identity-shortcut block (stride 1, in_planes == expansion*planes).
    batch2, in_planes2, planes2, spatial2, stride2 = 2, 16, 4, 16, 1
    x2 = jax.random.normal(kx2, (batch2, in_planes2, spatial2, spatial2), jnp.float32)
    params2 = init_params(kp2, in_planes2, planes2, stride2)
    out2 = jax.block_until_ready(
        qbw_bottleneck_forward(x2, params2, stride2, compute_dtype=jnp.float32))
    ref2 = qbw_bottleneck_ref(x2, params2, stride2)
    assert jnp.allclose(out2, ref2, atol=1e-4, rtol=1e-4), "f32 mismatch (identity)"

    print("KERNEL_OK")
</pallas_src>

<mosaic_0001>
module attributes {stable_mosaic.version = 11 : i64} {
  func.func @kernel(%arg0: i32, %arg1: memref<1x4x256x128xf32, #tpu.memory_space<vmem>>, %arg2: memref<128x128xf32, #tpu.memory_space<vmem>>, %arg3: memref<1x128xf32, #tpu.memory_space<vmem>>, %arg4: memref<1152x128xf32, #tpu.memory_space<vmem>>, %arg5: memref<1x128xf32, #tpu.memory_space<vmem>>, %arg6: memref<128x128xf32, #tpu.memory_space<vmem>>, %arg7: memref<1x128xf32, #tpu.memory_space<vmem>>, %arg8: memref<128x128xf32, #tpu.memory_space<vmem>>, %arg9: memref<1x128xf32, #tpu.memory_space<vmem>>, %arg10: memref<1x128x128xf32, #tpu.memory_space<vmem>>, %arg11: memref<4x256x128xf32, #tpu.memory_space<vmem>>) attributes {dimension_semantics = [#tpu.dimension_semantics<parallel>], iteration_bounds = array<i64: 2>, scalar_prefetch = 0 : i64, scratch_operands = 1 : i64, tpu.core_type = #tpu.core_type<tc>, window_params = [{transform_indices = @transform_0, window_bounds = array<i64: 1, 4, 256, 128>}, {pipeline_mode = #tpu.pipeline_mode<synchronous>, transform_indices = @transform_1, window_bounds = array<i64: 128, 128>}, {pipeline_mode = #tpu.pipeline_mode<synchronous>, transform_indices = @transform_2, window_bounds = array<i64: 1, 128>}, {pipeline_mode = #tpu.pipeline_mode<synchronous>, transform_indices = @transform_3, window_bounds = array<i64: 1152, 128>}, {pipeline_mode = #tpu.pipeline_mode<synchronous>, transform_indices = @transform_4, window_bounds = array<i64: 1, 128>}, {pipeline_mode = #tpu.pipeline_mode<synchronous>, transform_indices = @transform_5, window_bounds = array<i64: 128, 128>}, {pipeline_mode = #tpu.pipeline_mode<synchronous>, transform_indices = @transform_6, window_bounds = array<i64: 1, 128>}, {pipeline_mode = #tpu.pipeline_mode<synchronous>, transform_indices = @transform_7, window_bounds = array<i64: 128, 128>}, {pipeline_mode = #tpu.pipeline_mode<synchronous>, transform_indices = @transform_8, window_bounds = array<i64: 1, 128>}, {transform_indices = @transform_9, window_bounds = array<i64: 1, 128, 128>}]} {
    %c0_i32 = arith.constant 0 : i32
    %c2_i32 = arith.constant 2 : i32
    %0 = arith.addi %c0_i32, %c2_i32 : i32
    %c1_i32 = arith.constant 1 : i32
    scf.for %arg12 = %c0_i32 to %0 step %c1_i32  : i32 {
      %c128_i32_58 = arith.constant 128 : i32
      %71 = arith.muli %arg12, %c128_i32_58 : i32
      %72 = tpu.assume_multiple %71, 128 : i32
      %c0_59 = arith.constant 0 : index
      %c0_60 = arith.constant 0 : index
      %73 = arith.index_cast %72 : i32 to index
      %c0_61 = arith.constant 0 : index
      %74 = vector.load %arg1[%c0_59, %c0_60, %73, %c0_61] : memref<1x4x256x128xf32, #tpu.memory_space<vmem>>, vector<1x1x128x128xf32>
      %75 = vector.shape_cast %74 : vector<1x1x128x128xf32> to vector<128x128xf32>
      %c0_62 = arith.constant 0 : index
      %c0_63 = arith.constant 0 : index
      %76 = vector.load %arg2[%c0_62, %c0_63] : memref<128x128xf32, #tpu.memory_space<vmem>>, vector<128x128xf32>
      %cst_64 = arith.constant dense<0.000000e+00> : vector<128x128xf32>
      %77 = tpu.matmul %75, %76, %cst_64 {dimension_numbers = #tpu.dot_dimension_numbers<[1], [0], [0], [1], [0, 0, 1, 1], [], []>} : vector<128x128xf32>, vector<128x128xf32>, vector<128x128xf32> -> vector<128x128xf32>
      %c0_65 = arith.constant 0 : index
      %c0_66 = arith.constant 0 : index
      %78 = vector.load %arg3[%c0_65, %c0_66] : memref<1x128xf32, #tpu.memory_space<vmem>>, vector<1x128xf32>
      %79 = vector.broadcast %78 : vector<1x128xf32> to vector<128x128xf32>
      %80 = arith.addf %77, %79 : vector<128x128xf32>
      %cst_67 = arith.constant 0.000000e+00 : f32
      %81 = vector.broadcast %cst_67 : f32 to vector<128x128xf32>
      %82 = arith.maximumf %80, %81 : vector<128x128xf32>
      %83 = tpu.iota {dimensions = array<i32: 0>} : vector<128x1xi32>
      %84 = vector.broadcast %72 : i32 to vector<128x1xi32>
      %85 = arith.addi %84, %83 : vector<128x1xi32>
      %86 = arith.sitofp %85 : vector<128x1xi32> to vector<128x1xf32>
      %cst_68 = arith.constant 5.000000e-01 : f32
      %87 = vector.broadcast %cst_68 : f32 to vector<128x1xf32>
      %88 = arith.addf %86, %87 : vector<128x1xf32>
      %cst_69 = arith.constant 6.250000e-02 : f32
      %89 = vector.broadcast %cst_69 : f32 to vector<128x1xf32>
      %90 = arith.mulf %88, %89 : vector<128x1xf32>
      %91 = math.floor %90 : vector<128x1xf32>
      %cst_70 = arith.constant 1.600000e+01 : f32
      %92 = vector.broadcast %cst_70 : f32 to vector<128x1xf32>
      %93 = arith.mulf %91, %92 : vector<128x1xf32>
      %94 = arith.subf %86, %93 : vector<128x1xf32>
      %cst_71 = arith.constant 2.000000e+00 : f32
      %95 = vector.broadcast %cst_71 : f32 to vector<128x1xf32>
      %96 = arith.mulf %91, %95 : vector<128x1xf32>
      %cst_72 = arith.constant 0.000000e+00 : f32
      %97 = vector.broadcast %cst_72 : f32 to vector<128x1xf32>
      %98 = arith.addf %96, %97 : vector<128x1xf32>
      %cst_73 = arith.constant 2.000000e+00 : f32
      %99 = vector.broadcast %cst_73 : f32 to vector<128x1xf32>
      %100 = arith.mulf %94, %99 : vector<128x1xf32>
      %cst_74 = arith.constant 0.000000e+00 : f32
      %101 = vector.broadcast %cst_74 : f32 to vector<128x1xf32>
      %102 = arith.addf %100, %101 : vector<128x1xf32>
      %cst_75 = arith.constant 1.000000e+00 : f32
      %103 = vector.broadcast %cst_75 : f32 to vector<128x1xf32>
      %104 = arith.cmpf oge, %98, %103 : vector<128x1xf32>
      %cst_76 = arith.constant 1.600000e+01 : f32
      %105 = vector.broadcast %cst_76 : f32 to vector<128x1xf32>
      %106 = arith.cmpf ole, %98, %105 : vector<128x1xf32>
      %107 = arith.andi %104, %106 : vector<128x1xi1>
      %cst_77 = arith.constant 1.000000e+00 : f32
      %108 = vector.broadcast %cst_77 : f32 to vector<128x1xf32>
      %109 = arith.cmpf oge, %102, %108 : vector<128x1xf32>
      %110 = arith.andi %107, %109 : vector<128x1xi1>
      %cst_78 = arith.constant 1.600000e+01 : f32
      %111 = vector.broadcast %cst_78 : f32 to vector<128x1xf32>
      %112 = arith.cmpf ole, %102, %111 : vector<128x1xf32>
      %113 = arith.andi %110, %112 : vector<128x1xi1>
      %cst_79 = arith.constant 0.000000e+00 : f32
      %114 = vector.shape_cast %113 : vector<128x1xi1> to vector<128x1xi1>
      %115 = vector.broadcast %114 : vector<128x1xi1> to vector<128x128xi1>
      %116 = vector.broadcast %cst_79 : f32 to vector<128x128xf32>
      %117 = arith.select %115, %82, %116 : vector<128x128xi1>, vector<128x128xf32>
      %c0_80 = arith.constant 0 : index
      %118 = arith.index_cast %72 : i32 to index
      %c0_81 = arith.constant 0 : index
      %119 = vector.load %arg11[%c0_80, %118, %c0_81] : memref<4x256x128xf32, #tpu.memory_space<vmem>>, vector<1x128x128xf32>
      %120 = vector.shape_cast %119 : vector<1x128x128xf32> to vector<128x128xf32>
      %121 = vector.shape_cast %117 : vector<128x128xf32> to vector<1x128x128xf32>
      tpu.vector_store %arg11[%c0_80, %118, %c0_81], %121 {strides = array<i32>} : memref<4x256x128xf32, #tpu.memory_space<vmem>>, vector<1x128x128xf32>,
    }
    %c2_i32_0 = arith.constant 2 : i32
    %c0_i32_1 = arith.constant 0 : i32
    %c2_i32_2 = arith.constant 2 : i32
    %1 = arith.addi %c0_i32_1, %c2_i32_2 : i32
    %c1_i32_3 = arith.constant 1 : i32
    scf.for %arg12 = %c0_i32_1 to %1 step %c1_i32_3  : i32 {
      %c128_i32_58 = arith.constant 128 : i32
      %71 = arith.muli %arg12, %c128_i32_58 : i32
      %72 = tpu.assume_multiple %71, 128 : i32
      %c0_59 = arith.constant 0 : index
      %c1_60 = arith.constant 1 : index
      %73 = arith.index_cast %72 : i32 to index
      %c0_61 = arith.constant 0 : index
      %74 = vector.load %arg1[%c0_59, %c1_60, %73, %c0_61] : memref<1x4x256x128xf32, #tpu.memory_space<vmem>>, vector<1x1x128x128xf32>
      %75 = vector.shape_cast %74 : vector<1x1x128x128xf32> to vector<128x128xf32>
      %c0_62 = arith.constant 0 : index
      %c0_63 = arith.constant 0 : index
      %76 = vector.load %arg2[%c0_62, %c0_63] : memref<128x128xf32, #tpu.memory_space<vmem>>, vector<128x128xf32>
      %cst_64 = arith.constant dense<0.000000e+00> : vector<128x128xf32>
      %77 = tpu.matmul %75, %76, %cst_64 {dimension_numbers = #tpu.dot_dimension_numbers<[1], [0], [0], [1], [0, 0, 1, 1], [], []>} : vector<128x128xf32>, vector<128x128xf32>, vector<128x128xf32> -> vector<128x128xf32>
      %c0_65 = arith.constant 0 : index
      %c0_66 = arith.constant 0 : index
      %78 = vector.load %arg3[%c0_65, %c0_66] : memref<1x128xf32, #tpu.memory_space<vmem>>, vector<1x128xf32>
      %79 = vector.broadcast %78 : vector<1x128xf32> to vector<128x128xf32>
      %80 = arith.addf %77, %79 : vector<128x128xf32>
      %cst_67 = arith.constant 0.000000e+00 : f32
      %81 = vector.broadcast %cst_67 : f32 to vector<128x128xf32>
      %82 = arith.maximumf %80, %81 : vector<128x128xf32>
      %83 = tpu.iota {dimensions = array<i32: 0>} : vector<128x1xi32>
      %84 = vector.broadcast %72 : i32 to vector<128x1xi32>
      %85 = arith.addi %84, %83 : vector<128x1xi32>
      %86 = arith.sitofp %85 : vector<128x1xi32> to vector<128x1xf32>
      %cst_68 = arith.constant 5.000000e-01 : f32
      %87 = vector.broadcast %cst_68 : f32 to vector<128x1xf32>
      %88 = arith.addf %86, %87 : vector<128x1xf32>
      %cst_69 = arith.constant 6.250000e-02 : f32
      %89 = vector.broadcast %cst_69 : f32 to vector<128x1xf32>
      %90 = arith.mulf %88, %89 : vector<128x1xf32>
      %91 = math.floor %90 : vector<128x1xf32>
      %cst_70 = arith.constant 1.600000e+01 : f32
      %92 = vector.broadcast %cst_70 : f32 to vector<128x1xf32>
      %93 = arith.mulf %91, %92 : vector<128x1xf32>
      %94 = arith.subf %86, %93 : vector<128x1xf32>
      %cst_71 = arith.constant 2.000000e+00 : f32
      %95 = vector.broadcast %cst_71 : f32 to vector<128x1xf32>
      %96 = arith.mulf %91, %95 : vector<128x1xf32>
      %cst_72 = arith.constant 0.000000e+00 : f32
      %97 = vector.broadcast %cst_72 : f32 to vector<128x1xf32>
      %98 = arith.addf %96, %97 : vector<128x1xf32>
      %cst_73 = arith.constant 2.000000e+00 : f32
      %99 = vector.broadcast %cst_73 : f32 to vector<128x1xf32>
      %100 = arith.mulf %94, %99 : vector<128x1xf32>
      %cst_74 = arith.constant 1.000000e+00 : f32
      %101 = vector.broadcast %cst_74 : f32 to vector<128x1xf32>
      %102 = arith.addf %100, %101 : vector<128x1xf32>
      %cst_75 = arith.constant 1.000000e+00 : f32
      %103 = vector.broadcast %cst_75 : f32 to vector<128x1xf32>
      %104 = arith.cmpf oge, %98, %103 : vector<128x1xf32>
      %cst_76 = arith.constant 1.600000e+01 : f32
      %105 = vector.broadcast %cst_76 : f32 to vector<128x1xf32>
      %106 = arith.cmpf ole, %98, %105 : vector<128x1xf32>
      %107 = arith.andi %104, %106 : vector<128x1xi1>
      %cst_77 = arith.constant 1.000000e+00 : f32
      %108 = vector.broadcast %cst_77 : f32 to vector<128x1xf32>
      %109 = arith.cmpf oge, %102, %108 : vector<128x1xf32>
      %110 = arith.andi %107, %109 : vector<128x1xi1>
      %cst_78 = arith.constant 1.600000e+01 : f32
      %111 = vector.broadcast %cst_78 : f32 to vector<128x1xf32>
      %112 = arith.cmpf ole, %102, %111 : vector<128x1xf32>
      %113 = arith.andi %110, %112 : vector<128x1xi1>
      %cst_79 = arith.constant 0.000000e+00 : f32
      %114 = vector.shape_cast %113 : vector<128x1xi1> to vector<128x1xi1>
      %115 = vector.broadcast %114 : vector<128x1xi1> to vector<128x128xi1>
      %116 = vector.broadcast %cst_79 : f32 to vector<128x128xf32>
      %117 = arith.select %115, %82, %116 : vector<128x128xi1>, vector<128x128xf32>
      %c1_80 = arith.constant 1 : index
      %118 = arith.index_cast %72 : i32 to index
      %c0_81 = arith.constant 0 : index
      %119 = vector.load %arg11[%c1_80, %118, %c0_81] : memref<4x256x128xf32, #tpu.memory_space<vmem>>, vector<1x128x128xf32>
      %120 = vector.shape_cast %119 : vector<1x128x128xf32> to vector<128x128xf32>
      %121 = vector.shape_cast %117 : vector<128x128xf32> to vector<1x128x128xf32>
      tpu.vector_store %arg11[%c1_80, %118, %c0_81], %121 {strides = array<i32>} : memref<4x256x128xf32, #tpu.memory_space<vmem>>, vector<1x128x128xf32>,
    }
    %c2_i32_4 = arith.constant 2 : i32
    %c0_i32_5 = arith.constant 0 : i32
    %c2_i32_6 = arith.constant 2 : i32
    %2 = arith.addi %c0_i32_5, %c2_i32_6 : i32
    %c1_i32_7 = arith.constant 1 : i32
    scf.for %arg12 = %c0_i32_5 to %2 step %c1_i32_7  : i32 {
      %c128_i32_58 = arith.constant 128 : i32
      %71 = arith.muli %arg12, %c128_i32_58 : i32
      %72 = tpu.assume_multiple %71, 128 : i32
      %c0_59 = arith.constant 0 : index
      %c2_60 = arith.constant 2 : index
      %73 = arith.index_cast %72 : i32 to index
      %c0_61 = arith.constant 0 : index
      %74 = vector.load %arg1[%c0_59, %c2_60, %73, %c0_61] : memref<1x4x256x128xf32, #tpu.memory_space<vmem>>, vector<1x1x128x128xf32>
      %75 = vector.shape_cast %74 : vector<1x1x128x128xf32> to vector<128x128xf32>
      %c0_62 = arith.constant 0 : index
      %c0_63 = arith.constant 0 : index
      %76 = vector.load %arg2[%c0_62, %c0_63] : memref<128x128xf32, #tpu.memory_space<vmem>>, vector<128x128xf32>
      %cst_64 = arith.constant dense<0.000000e+00> : vector<128x128xf32>
      %77 = tpu.matmul %75, %76, %cst_64 {dimension_numbers = #tpu.dot_dimension_numbers<[1], [0], [0], [1], [0, 0, 1, 1], [], []>} : vector<128x128xf32>, vector<128x128xf32>, vector<128x128xf32> -> vector<128x128xf32>
      %c0_65 = arith.constant 0 : index
      %c0_66 = arith.constant 0 : index
      %78 = vector.load %arg3[%c0_65, %c0_66] : memref<1x128xf32, #tpu.memory_space<vmem>>, vector<1x128xf32>
      %79 = vector.broadcast %78 : vector<1x128xf32> to vector<128x128xf32>
      %80 = arith.addf %77, %79 : vector<128x128xf32>
      %cst_67 = arith.constant 0.000000e+00 : f32
      %81 = vector.broadcast %cst_67 : f32 to vector<128x128xf32>
      %82 = arith.maximumf %80, %81 : vector<128x128xf32>
      %83 = tpu.iota {dimensions = array<i32: 0>} : vector<128x1xi32>
      %84 = vector.broadcast %72 : i32 to vector<128x1xi32>
      %85 = arith.addi %84, %83 : vector<128x1xi32>
      %86 = arith.sitofp %85 : vector<128x1xi32> to vector<128x1xf32>
      %cst_68 = arith.constant 5.000000e-01 : f32
      %87 = vector.broadcast %cst_68 : f32 to vector<128x1xf32>
      %88 = arith.addf %86, %87 : vector<128x1xf32>
      %cst_69 = arith.constant 6.250000e-02 : f32
      %89 = vector.broadcast %cst_69 : f32 to vector<128x1xf32>
      %90 = arith.mulf %88, %89 : vector<128x1xf32>
      %91 = math.floor %90 : vector<128x1xf32>
      %cst_70 = arith.constant 1.600000e+01 : f32
      %92 = vector.broadcast %cst_70 : f32 to vector<128x1xf32>
      %93 = arith.mulf %91, %92 : vector<128x1xf32>
      %94 = arith.subf %86, %93 : vector<128x1xf32>
      %cst_71 = arith.constant 2.000000e+00 : f32
      %95 = vector.broadcast %cst_71 : f32 to vector<128x1xf32>
      %96 = arith.mulf %91, %95 : vector<128x1xf32>
      %cst_72 = arith.constant 1.000000e+00 : f32
      %97 = vector.broadcast %cst_72 : f32 to vector<128x1xf32>
      %98 = arith.addf %96, %97 : vector<128x1xf32>
      %cst_73 = arith.constant 2.000000e+00 : f32
      %99 = vector.broadcast %cst_73 : f32 to vector<128x1xf32>
      %100 = arith.mulf %94, %99 : vector<128x1xf32>
      %cst_74 = arith.constant 0.000000e+00 : f32
      %101 = vector.broadcast %cst_74 : f32 to vector<128x1xf32>
      %102 = arith.addf %100, %101 : vector<128x1xf32>
      %cst_75 = arith.constant 1.000000e+00 : f32
      %103 = vector.broadcast %cst_75 : f32 to vector<128x1xf32>
      %104 = arith.cmpf oge, %98, %103 : vector<128x1xf32>
      %cst_76 = arith.constant 1.600000e+01 : f32
      %105 = vector.broadcast %cst_76 : f32 to vector<128x1xf32>
      %106 = arith.cmpf ole, %98, %105 : vector<128x1xf32>
      %107 = arith.andi %104, %106 : vector<128x1xi1>
      %cst_77 = arith.constant 1.000000e+00 : f32
      %108 = vector.broadcast %cst_77 : f32 to vector<128x1xf32>
      %109 = arith.cmpf oge, %102, %108 : vector<128x1xf32>
      %110 = arith.andi %107, %109 : vector<128x1xi1>
      %cst_78 = arith.constant 1.600000e+01 : f32
      %111 = vector.broadcast %cst_78 : f32 to vector<128x1xf32>
      %112 = arith.cmpf ole, %102, %111 : vector<128x1xf32>
      %113 = arith.andi %110, %112 : vector<128x1xi1>
      %cst_79 = arith.constant 0.000000e+00 : f32
      %114 = vector.shape_cast %113 : vector<128x1xi1> to vector<128x1xi1>
      %115 = vector.broadcast %114 : vector<128x1xi1> to vector<128x128xi1>
      %116 = vector.broadcast %cst_79 : f32 to vector<128x128xf32>
      %117 = arith.select %115, %82, %116 : vector<128x128xi1>, vector<128x128xf32>
      %c2_80 = arith.constant 2 : index
      %118 = arith.index_cast %72 : i32 to index
      %c0_81 = arith.constant 0 : index
      %119 = vector.load %arg11[%c2_80, %118, %c0_81] : memref<4x256x128xf32, #tpu.memory_space<vmem>>, vector<1x128x128xf32>
      %120 = vector.shape_cast %119 : vector<1x128x128xf32> to vector<128x128xf32>
      %121 = vector.shape_cast %117 : vector<128x128xf32> to vector<1x128x128xf32>
      tpu.vector_store %arg11[%c2_80, %118, %c0_81], %121 {strides = array<i32>} : memref<4x256x128xf32, #tpu.memory_space<vmem>>, vector<1x128x128xf32>,
    }
    %c2_i32_8 = arith.constant 2 : i32
    %c0_i32_9 = arith.constant 0 : i32
    %c2_i32_10 = arith.constant 2 : i32
    %3 = arith.addi %c0_i32_9, %c2_i32_10 : i32
    %c1_i32_11 = arith.constant 1 : i32
    scf.for %arg12 = %c0_i32_9 to %3 step %c1_i32_11  : i32 {
      %c128_i32_58 = arith.constant 128 : i32
      %71 = arith.muli %arg12, %c128_i32_58 : i32
      %72 = tpu.assume_multiple %71, 128 : i32
      %c0_59 = arith.constant 0 : index
      %c3_60 = arith.constant 3 : index
      %73 = arith.index_cast %72 : i32 to index
      %c0_61 = arith.constant 0 : index
      %74 = vector.load %arg1[%c0_59, %c3_60, %73, %c0_61] : memref<1x4x256x128xf32, #tpu.memory_space<vmem>>, vector<1x1x128x128xf32>
      %75 = vector.shape_cast %74 : vector<1x1x128x128xf32> to vector<128x128xf32>
      %c0_62 = arith.constant 0 : index
      %c0_63 = arith.constant 0 : index
      %76 = vector.load %arg2[%c0_62, %c0_63] : memref<128x128xf32, #tpu.memory_space<vmem>>, vector<128x128xf32>
      %cst_64 = arith.constant dense<0.000000e+00> : vector<128x128xf32>
      %77 = tpu.matmul %75, %76, %cst_64 {dimension_numbers = #tpu.dot_dimension_numbers<[1], [0], [0], [1], [0, 0, 1, 1], [], []>} : vector<128x128xf32>, vector<128x128xf32>, vector<128x128xf32> -> vector<128x128xf32>
      %c0_65 = arith.constant 0 : index
      %c0_66 = arith.constant 0 : index
      %78 = vector.load %arg3[%c0_65, %c0_66] : memref<1x128xf32, #tpu.memory_space<vmem>>, vector<1x128xf32>
      %79 = vector.broadcast %78 : vector<1x128xf32> to vector<128x128xf32>
      %80 = arith.addf %77, %79 : vector<128x128xf32>
      %cst_67 = arith.constant 0.000000e+00 : f32
      %81 = vector.broadcast %cst_67 : f32 to vector<128x128xf32>
      %82 = arith.maximumf %80, %81 : vector<128x128xf32>
      %83 = tpu.iota {dimensions = array<i32: 0>} : vector<128x1xi32>
      %84 = vector.broadcast %72 : i32 to vector<128x1xi32>
      %85 = arith.addi %84, %83 : vector<128x1xi32>
      %86 = arith.sitofp %85 : vector<128x1xi32> to vector<128x1xf32>
      %cst_68 = arith.constant 5.000000e-01 : f32
      %87 = vector.broadcast %cst_68 : f32 to vector<128x1xf32>
      %88 = arith.addf %86, %87 : vector<128x1xf32>
      %cst_69 = arith.constant 6.250000e-02 : f32
      %89 = vector.broadcast %cst_69 : f32 to vector<128x1xf32>
      %90 = arith.mulf %88, %89 : vector<128x1xf32>
      %91 = math.floor %90 : vector<128x1xf32>
      %cst_70 = arith.constant 1.600000e+01 : f32
      %92 = vector.broadcast %cst_70 : f32 to vector<128x1xf32>
      %93 = arith.mulf %91, %92 : vector<128x1xf32>
      %94 = arith.subf %86, %93 : vector<128x1xf32>
      %cst_71 = arith.constant 2.000000e+00 : f32
      %95 = vector.broadcast %cst_71 : f32 to vector<128x1xf32>
      %96 = arith.mulf %91, %95 : vector<128x1xf32>
      %cst_72 = arith.constant 1.000000e+00 : f32
      %97 = vector.broadcast %cst_72 : f32 to vector<128x1xf32>
      %98 = arith.addf %96, %97 : vector<128x1xf32>
      %cst_73 = arith.constant 2.000000e+00 : f32
      %99 = vector.broadcast %cst_73 : f32 to vector<128x1xf32>
      %100 = arith.mulf %94, %99 : vector<128x1xf32>
      %cst_74 = arith.constant 1.000000e+00 : f32
      %101 = vector.broadcast %cst_74 : f32 to vector<128x1xf32>
      %102 = arith.addf %100, %101 : vector<128x1xf32>
      %cst_75 = arith.constant 1.000000e+00 : f32
      %103 = vector.broadcast %cst_75 : f32 to vector<128x1xf32>
      %104 = arith.cmpf oge, %98, %103 : vector<128x1xf32>
      %cst_76 = arith.constant 1.600000e+01 : f32
      %105 = vector.broadcast %cst_76 : f32 to vector<128x1xf32>
      %106 = arith.cmpf ole, %98, %105 : vector<128x1xf32>
      %107 = arith.andi %104, %106 : vector<128x1xi1>
      %cst_77 = arith.constant 1.000000e+00 : f32
      %108 = vector.broadcast %cst_77 : f32 to vector<128x1xf32>
      %109 = arith.cmpf oge, %102, %108 : vector<128x1xf32>
      %110 = arith.andi %107, %109 : vector<128x1xi1>
      %cst_78 = arith.constant 1.600000e+01 : f32
      %111 = vector.broadcast %cst_78 : f32 to vector<128x1xf32>
      %112 = arith.cmpf ole, %102, %111 : vector<128x1xf32>
      %113 = arith.andi %110, %112 : vector<128x1xi1>
      %cst_79 = arith.constant 0.000000e+00 : f32
      %114 = vector.shape_cast %113 : vector<128x1xi1> to vector<128x1xi1>
      %115 = vector.broadcast %114 : vector<128x1xi1> to vector<128x128xi1>
      %116 = vector.broadcast %cst_79 : f32 to vector<128x128xf32>
      %117 = arith.select %115, %82, %116 : vector<128x128xi1>, vector<128x128xf32>
      %c3_80 = arith.constant 3 : index
      %118 = arith.index_cast %72 : i32 to index
      %c0_81 = arith.constant 0 : index
      %119 = vector.load %arg11[%c3_80, %118, %c0_81] : memref<4x256x128xf32, #tpu.memory_space<vmem>>, vector<1x128x128xf32>
      %120 = vector.shape_cast %119 : vector<1x128x128xf32> to vector<128x128xf32>
      %121 = vector.shape_cast %117 : vector<128x128xf32> to vector<1x128x128xf32>
      tpu.vector_store %arg11[%c3_80, %118, %c0_81], %121 {strides = array<i32>} : memref<4x256x128xf32, #tpu.memory_space<vmem>>, vector<1x128x128xf32>,
    }
    %c2_i32_12 = arith.constant 2 : i32
    %c0_i32_13 = arith.constant 0 : i32
    %c128_i32 = arith.constant 128 : i32
    %4 = arith.muli %c0_i32_13, %c128_i32 : i32
    %5 = tpu.assume_multiple %4, 128 : i32
    %c0_i32_14 = arith.constant 0 : i32
    %6 = arith.addi %c0_i32_14, %5 : i32
    %c0 = arith.constant 0 : index
    %7 = arith.index_cast %6 : i32 to index
    %c0_15 = arith.constant 0 : index
    %8 = vector.load %arg11[%c0, %7, %c0_15] : memref<4x256x128xf32, #tpu.memory_space<vmem>>, vector<1x128x128xf32>
    %9 = vector.shape_cast %8 : vector<1x128x128xf32> to vector<128x128xf32>
    %c0_i32_16 = arith.constant 0 : i32
    %10 = arith.addi %c0_i32_16, %5 : i32
    %c1 = arith.constant 1 : index
    %11 = arith.index_cast %10 : i32 to index
    %c0_17 = arith.constant 0 : index
    %12 = vector.load %arg11[%c1, %11, %c0_17] : memref<4x256x128xf32, #tpu.memory_space<vmem>>, vector<1x128x128xf32>
    %13 = vector.shape_cast %12 : vector<1x128x128xf32> to vector<128x128xf32>
    %c1_i32_18 = arith.constant 1 : i32
    %14 = arith.addi %c1_i32_18, %5 : i32
    %c0_19 = arith.constant 0 : index
    %15 = arith.index_cast %14 : i32 to index
    %c0_20 = arith.constant 0 : index
    %16 = vector.load %arg11[%c0_19, %15, %c0_20] : memref<4x256x128xf32, #tpu.memory_space<vmem>>, vector<1x128x128xf32>
    %17 = vector.shape_cast %16 : vector<1x128x128xf32> to vector<128x128xf32>
    %c0_i32_21 = arith.constant 0 : i32
    %18 = arith.addi %c0_i32_21, %5 : i32
    %c2 = arith.constant 2 : index
    %19 = arith.index_cast %18 : i32 to index
    %c0_22 = arith.constant 0 : index
    %20 = vector.load %arg11[%c2, %19, %c0_22] : memref<4x256x128xf32, #tpu.memory_space<vmem>>, vector<1x128x128xf32>
    %21 = vector.shape_cast %20 : vector<1x128x128xf32> to vector<128x128xf32>
    %c0_i32_23 = arith.constant 0 : i32
    %22 = arith.addi %c0_i32_23, %5 : i32
    %c3 = arith.constant 3 : index
    %23 = arith.index_cast %22 : i32 to index
    %c0_24 = arith.constant 0 : index
    %24 = vector.load %arg11[%c3, %23, %c0_24] : memref<4x256x128xf32, #tpu.memory_space<vmem>>, vector<1x128x128xf32>
    %25 = vector.shape_cast %24 : vector<1x128x128xf32> to vector<128x128xf32>
    %c1_i32_25 = arith.constant 1 : i32
    %26 = arith.addi %c1_i32_25, %5 : i32
    %c2_26 = arith.constant 2 : index
    %27 = arith.index_cast %26 : i32 to index
    %c0_27 = arith.constant 0 : index
    %28 = vector.load %arg11[%c2_26, %27, %c0_27] : memref<4x256x128xf32, #tpu.memory_space<vmem>>, vector<1x128x128xf32>
    %29 = vector.shape_cast %28 : vector<1x128x128xf32> to vector<128x128xf32>
    %c16_i32 = arith.constant 16 : i32
    %30 = arith.addi %c16_i32, %5 : i32
    %c0_28 = arith.constant 0 : index
    %31 = arith.index_cast %30 : i32 to index
    %c0_29 = arith.constant 0 : index
    %32 = vector.load %arg11[%c0_28, %31, %c0_29] : memref<4x256x128xf32, #tpu.memory_space<vmem>>, vector<1x128x128xf32>
    %33 = vector.shape_cast %32 : vector<1x128x128xf32> to vector<128x128xf32>
    %c16_i32_30 = arith.constant 16 : i32
    %34 = arith.addi %c16_i32_30, %5 : i32
    %c1_31 = arith.constant 1 : index
    %35 = arith.index_cast %34 : i32 to index
    %c0_32 = arith.constant 0 : index
    %36 = vector.load %arg11[%c1_31, %35, %c0_32] : memref<4x256x128xf32, #tpu.memory_space<vmem>>, vector<1x128x128xf32>
    %37 = vector.shape_cast %36 : vector<1x128x128xf32> to vector<128x128xf32>
    %c17_i32 = arith.constant 17 : i32
    %38 = arith.addi %c17_i32, %5 : i32
    %c0_33 = arith.constant 0 : index
    %39 = arith.index_cast %38 : i32 to index
    %c0_34 = arith.constant 0 : index
    %40 = vector.load %arg11[%c0_33, %39, %c0_34] : memref<4x256x128xf32, #tpu.memory_space<vmem>>, vector<1x128x128xf32>
    %41 = vector.shape_cast %40 : vector<1x128x128xf32> to vector<128x128xf32>
    %42 = tpu.concatenate %9, %13, %17, %21, %25, %29, %33, %37, %41 in 1 : vector<128x128xf32>, vector<128x128xf32>, vector<128x128xf32>, vector<128x128xf32>, vector<128x128xf32>, vector<128x128xf32>, vector<128x128xf32>, vector<128x128xf32>, vector<128x128xf32> -> vector<128x1152xf32>
    %c0_35 = arith.constant 0 : index
    %c0_36 = arith.constant 0 : index
    %43 = vector.load %arg4[%c0_35, %c0_36] : memref<1152x128xf32, #tpu.memory_space<vmem>>, vector<1152x128xf32>
    %cst = arith.constant dense<0.000000e+00> : vector<128x128xf32>
    %44 = tpu.matmul %42, %43, %cst {dimension_numbers = #tpu.dot_dimension_numbers<[1], [0], [0], [1], [0, 0, 1, 1], [], []>} : vector<128x1152xf32>, vector<1152x128xf32>, vector<128x128xf32> -> vector<128x128xf32>
    %c0_37 = arith.constant 0 : index
    %c0_38 = arith.constant 0 : index
    %45 = vector.load %arg5[%c0_37, %c0_38] : memref<1x128xf32, #tpu.memory_space<vmem>>, vector<1x128xf32>
    %46 = vector.broadcast %45 : vector<1x128xf32> to vector<128x128xf32>
    %47 = arith.addf %44, %46 : vector<128x128xf32>
    %cst_39 = arith.constant 0.000000e+00 : f32
    %48 = vector.broadcast %cst_39 : f32 to vector<128x128xf32>
    %49 = arith.maximumf %47, %48 : vector<128x128xf32>
    %c0_40 = arith.constant 0 : index
    %c0_41 = arith.constant 0 : index
    %50 = vector.load %arg6[%c0_40, %c0_41] : memref<128x128xf32, #tpu.memory_space<vmem>>, vector<128x128xf32>
    %cst_42 = arith.constant dense<0.000000e+00> : vector<128x128xf32>
    %51 = tpu.matmul %49, %50, %cst_42 {dimension_numbers = #tpu.dot_dimension_numbers<[1], [0], [0], [1], [0, 0, 1, 1], [], []>} : vector<128x128xf32>, vector<128x128xf32>, vector<128x128xf32> -> vector<128x128xf32>
    %c0_43 = arith.constant 0 : index
    %c0_44 = arith.constant 0 : index
    %52 = vector.load %arg7[%c0_43, %c0_44] : memref<1x128xf32, #tpu.memory_space<vmem>>, vector<1x128xf32>
    %53 = vector.broadcast %52 : vector<1x128xf32> to vector<128x128xf32>
    %54 = arith.addf %51, %53 : vector<128x128xf32>
    %c0_i32_45 = arith.constant 0 : i32
    %55 = arith.addi %c0_i32_45, %5 : i32
    %c0_46 = arith.constant 0 : index
    %c3_47 = arith.constant 3 : index
    %56 = arith.index_cast %55 : i32 to index
    %c0_48 = arith.constant 0 : index
    %57 = vector.load %arg1[%c0_46, %c3_47, %56, %c0_48] : memref<1x4x256x128xf32, #tpu.memory_space<vmem>>, vector<1x1x128x128xf32>
    %58 = vector.shape_cast %57 : vector<1x1x128x128xf32> to vector<128x128xf32>
    %c0_49 = arith.constant 0 : index
    %c0_50 = arith.constant 0 : index
    %59 = vector.load %arg8[%c0_49, %c0_50] : memref<128x128xf32, #tpu.memory_space<vmem>>, vector<128x128xf32>
    %cst_51 = arith.constant dense<0.000000e+00> : vector<128x128xf32>
    %60 = tpu.matmul %58, %59, %cst_51 {dimension_numbers = #tpu.dot_dimension_numbers<[1], [0], [0], [1], [0, 0, 1, 1], [], []>} : vector<128x128xf32>, vector<128x128xf32>, vector<128x128xf32> -> vector<128x128xf32>
    %c0_52 = arith.constant 0 : index
    %c0_53 = arith.constant 0 : index
    %61 = vector.load %arg9[%c0_52, %c0_53] : memref<1x128xf32, #tpu.memory_space<vmem>>, vector<1x128xf32>
    %62 = vector.broadcast %61 : vector<1x128xf32> to vector<128x128xf32>
    %63 = arith.addf %60, %62 : vector<128x128xf32>
    %64 = arith.addf %54, %63 : vector<128x128xf32>
    %cst_54 = arith.constant 0.000000e+00 : f32
    %65 = vector.broadcast %cst_54 : f32 to vector<128x128xf32>
    %66 = arith.maximumf %64, %65 : vector<128x128xf32>
    %c0_55 = arith.constant 0 : index
    %67 = arith.index_cast %5 : i32 to index
    %c0_56 = arith.constant 0 : index
    %68 = vector.load %arg10[%c0_55, %67, %c0_56] : memref<1x128x128xf32, #tpu.memory_space<vmem>>, vector<1x128x128xf32>
    %69 = vector.shape_cast %68 : vector<1x128x128xf32> to vector<128x128xf32>
    %70 = vector.shape_cast %66 : vector<128x128xf32> to vector<1x128x128xf32>
    tpu.vector_store %arg10[%c0_55, %67, %c0_56], %70 {strides = array<i32>} : memref<1x128x128xf32, #tpu.memory_space<vmem>>, vector<1x128x128xf32>,
    %c1_i32_57 = arith.constant 1 : i32
    return
  }
  func.func @transform_0(%arg0: i32) -> (i32, i32, i32, i32) {
    %c0_i32 = arith.constant 0 : i32
    %c0_i32_0 = arith.constant 0 : i32
    %c0_i32_1 = arith.constant 0 : i32
    %c0_i32_2 = arith.constant 0 : i32
    return %arg0, %c0_i32, %c0_i32_0, %c0_i32_1 : i32, i32, i32, i32
  }
  func.func @transform_1(%arg0: i32) -> (i32, i32) {
    %c0_i32 = arith.constant 0 : i32
    %c0_i32_0 = arith.constant 0 : i32
    %c0_i32_1 = arith.constant 0 : i32
    return %c0_i32, %c0_i32_0 : i32, i32
  }
  func.func @transform_2(%arg0: i32) -> (i32, i32) {
    %c0_i32 = arith.constant 0 : i32
    %c0_i32_0 = arith.constant 0 : i32
    %c0_i32_1 = arith.constant 0 : i32
    return %c0_i32, %c0_i32_0 : i32, i32
  }
  func.func @transform_3(%arg0: i32) -> (i32, i32) {
    %c0_i32 = arith.constant 0 : i32
    %c0_i32_0 = arith.constant 0 : i32
    %c0_i32_1 = arith.constant 0 : i32
    return %c0_i32, %c0_i32_0 : i32, i32
  }
  func.func @transform_4(%arg0: i32) -> (i32, i32) {
    %c0_i32 = arith.constant 0 : i32
    %c0_i32_0 = arith.constant 0 : i32
    %c0_i32_1 = arith.constant 0 : i32
    return %c0_i32, %c0_i32_0 : i32, i32
  }
  func.func @transform_5(%arg0: i32) -> (i32, i32) {
    %c0_i32 = arith.constant 0 : i32
    %c0_i32_0 = arith.constant 0 : i32
    %c0_i32_1 = arith.constant 0 : i32
    return %c0_i32, %c0_i32_0 : i32, i32
  }
  func.func @transform_6(%arg0: i32) -> (i32, i32) {
    %c0_i32 = arith.constant 0 : i32
    %c0_i32_0 = arith.constant 0 : i32
    %c0_i32_1 = arith.constant 0 : i32
    return %c0_i32, %c0_i32_0 : i32, i32
  }
  func.func @transform_7(%arg0: i32) -> (i32, i32) {
    %c0_i32 = arith.constant 0 : i32
    %c0_i32_0 = arith.constant 0 : i32
    %c0_i32_1 = arith.constant 0 : i32
    return %c0_i32, %c0_i32_0 : i32, i32
  }
  func.func @transform_8(%arg0: i32) -> (i32, i32) {
    %c0_i32 = arith.constant 0 : i32
    %c0_i32_0 = arith.constant 0 : i32
    %c0_i32_1 = arith.constant 0 : i32
    return %c0_i32, %c0_i32_0 : i32, i32
  }
  func.func @transform_9(%arg0: i32) -> (i32, i32, i32) {
    %c0_i32 = arith.constant 0 : i32
    %c0_i32_0 = arith.constant 0 : i32
    %c0_i32_1 = arith.constant 0 : i32
    return %arg0, %c0_i32, %c0_i32_0 : i32, i32, i32
  }
}

</mosaic_0001>

<bundles_post_ra>
// kernel: tpu_custom_call.1
= control target key start
LH: loop header
LB: loop body
LE: loop exit
PB: predicated region body
PF: predicated region fallthrough
CT: control target
= control target key end

     0   :  { %s9517_s0 = inlined_call_operand.hbm [shape: f32[2,4,256,128], index: 0, kind: input, shape index: {}]   ;;  %s9518_s1 = inlined_call_operand.hbm [shape: f32[128,128], index: 1, kind: input, shape index: {}]   ;;  %s9519_s2 = inlined_call_operand.vmem [shape: f32[1,128], index: 2, kind: input, shape index: {}]   ;;  %s9520_s3 = inlined_call_operand.hbm [shape: f32[1152,128], index: 3, kind: input, shape index: {}]   ;;  %s9521_s4 = inlined_call_operand.vmem [shape: f32[1,128], index: 4, kind: input, shape index: {}]   ;;  %s9522_s5 = inlined_call_operand.hbm [shape: f32[128,128], index: 5, kind: input, shape index: {}]   ;;  %s9523_s6 = inlined_call_operand.vmem [shape: f32[1,128], index: 6, kind: input, shape index: {}]   ;;  %s9524_s7 = inlined_call_operand.hbm [shape: f32[128,128], index: 7, kind: input, shape index: {}]   ;;  %s9525_s8 = inlined_call_operand.vmem [shape: f32[1,128], index: 8, kind: input, shape index: {}]   ;;  %s9526_s9 = inlined_call_operand.hbm [shape: f32[2,128,128], index: 9, kind: output, shape index: {}]  }
   0x1   :  { %9567 = sst [smem:[#allocation56_spill]] %s9518_s1 }
   0x2   :  { %9568 = sst [smem:[#allocation57_spill]] %s9520_s3 }
   0x3   :  { %9569 = sst [smem:[#allocation58_spill]] %s9522_s5 }
   0x4   :  { %14 = vsyncpa [#allocation4], 0 }
   0x5   :  { %16 = vsyncpa [#allocation4 + $0x1], 0 }
   0x6   :  { %17 = vsyncpa [#allocation7], 0 }
   0x7   :  { %18 = vsyncpa [#allocation10], 0 }
   0x8   :  { %19 = vsyncpa [#allocation5], 0 }
   0x9   :  { %21 = vsyncpa [#allocation5 + $0x1], 0  ;;  %s6027_s30 = smov 0   ;;  %s6029_s10 = smov 0  }
   0xa   :  { %s6031_s11 = smov 0   ;;  %s6033_s12 = smov 0  }
   0xb LB: > { %s6048_s13 = sadd.s32 4294967295, %s5949_s12   ;;  %s4357_s14 = sadd.s32 4294967294, %s5949_s12   ;;  %s5949_s12 = sphi %s6033_s12, %s10183_s12   ;;  %s5945_s11 = sphi %s6031_s11, %s10182_s11   ;;  %s5941_s10 = sphi %s6029_s10, %s10181_s10   ;;  %s5937_s30 = sphi %s6027_s30, %s10180_s30  }
   0xc   : > { %p47_p0 = scmp.ne.s32.totalorder %s5941_s10, %s5937_s30  ;;  %p9527_p1 = scmp.eq.s32.totalorder %s6048_s13, 0 }
   0xd   : > { %p239_p2 = scmp.eq.s32.totalorder %s6048_s13, 1  ;;  %p245_p3 = scmp.eq.s32.totalorder %s4357_s14, 1 }
   0xe   : > { %p6057_p4 = por %p9527_p1, %p47_p0  ;;  %p4358_p5 = scmp.ge.s32.totalorder %s5949_s12, 1 }
   0xf   : > { %p6062_p6 = por %p245_p3, %p47_p0  ;;  %p252_p7 = scmp.lt.s32.totalorder %s5949_s12, 3 }
  0x10   : > { %s9570_s15 = scalar_select %p6057_p4, 1, 0 }
  0x11   : > { %s9571_s16 = scalar_select %p6062_p6, 1, 0 }
  0x12   : > { %p6067_p8 = pnand %p4358_p5, %p252_p7  ;;  %s5967_s18 = smov [#allocation6]  }
  0x13   : > { %s264_s19 = sshll.u32 %s5967_s18, 4  ;;  %s5968_s21 = smov [#allocation9]   ;;  %s265_s19 = int_to_ptr.vmem [resolvable:$true] %s264_s19 }
  0x14   : > { %s9572_s17 = scalar_select %p6067_p8, 1, 0 }
  0x15   : > { %p5626_p9 = pneg %p6067_p8  ;;  %s296_s22 = sshll.u32 %s5968_s21, 4  ;;  %s297_s22 = int_to_ptr.vmem [resolvable:$true] %s296_s22 }
  0x16   : > { %s5969_s23 = smov [#allocation8]   ;;  %s5740_s25 = scalar_lea.vmem %s265_s19, 2048 }
  0x17   : > { %p6076_p11 = pnand %p5626_p9, %p9527_p1  ;;  %s280_s24 = sshll.u32 %s5969_s23, 4  ;;  %s281_s24 = int_to_ptr.vmem [resolvable:$true] %s280_s24 }
  0x18   : > { %p5741_p13 = scmp.ne.s32.totalorder %s265_s19, %s5740_s25  ;;  %p5748_p5 = scmp.lt.s32.totalorder %s265_s19, %s265_s19 }
  0x19   : > { %p5731_p12 = pneg %p6076_p11  ;;  %p5749_p7 = scmp.lt.s32.totalorder %s5740_s25, %s5740_s25 }
  0x1b   : > { %p5743_p0 = pnand %p5741_p13, %p5731_p12  ;;  %p5750_p9 = por %p5749_p7, %p5748_p5 }
  0x1d   : > { %p5744_p3 = pneg %p5743_p0 }
  0x1f   : > { %p5751_p10 = pnand %p5750_p9, %p5744_p3 }
  0x21   : > { %5754 = shalt.err (!%p5751_p10)
}
  0x22   : > { %s9528_s26 = smov 128   ;;  %s9529_s27 = smov 8  }
  0x23   : > { %s9574_s1 = sld [smem:[#allocation56_spill]]  ;;  %s5766_s14 = scalar_lea.vmem %s297_s22, 2048 }
  0x24   : > { %p5767_p13 = scmp.ne.s32.totalorder %s297_s22, %s5766_s14  ;;  %p5774_p3 = scmp.lt.s32.totalorder %s297_s22, %s297_s22 }
  0x25   : > { %p5775_p10 = scmp.lt.s32.totalorder %s5766_s14, %s5766_s14 }
  0x26   : > { %p5769_p0 = pnand %p5767_p13, %p5731_p12 }
  0x27   : > { %p5776_p7 = por %p5775_p10, %p5774_p3 }
  0x28   : > { %p5770_p5 = pneg %p5769_p0 }
  0x29   : > { %5629 = dma.hbm_to_vmem [thread:$0]  (!%p6076_p11), %s9574_s1, 2048, %s265_s19, [#allocation7], %s9528_s26, %s9528_s26, %s9529_s27  }
  0x2a   : > { %p5777_p9 = pnand %p5776_p7, %p5770_p5 }
  0x2c   : > { %5780 = shalt.err (!%p5777_p9)
}
  0x2d   : > { %s9575_s5 = sld [smem:[#allocation58_spill]]  ;;  %s5792_s19 = scalar_lea.vmem %s281_s24, 18432 }
  0x2e   : > { %p5793_p1 = scmp.ne.s32.totalorder %s281_s24, %s5792_s19  ;;  %p5800_p3 = scmp.lt.s32.totalorder %s281_s24, %s281_s24 }
  0x2f   : > { %p5801_p5 = scmp.lt.s32.totalorder %s5792_s19, %s5792_s19 }
  0x30   : > { %p5795_p13 = pnand %p5793_p1, %p5731_p12 }
  0x31   : > { %p5802_p10 = por %p5801_p5, %p5800_p3 }
  0x32   : > { %p5796_p0 = pneg %p5795_p13 }
  0x33   : > { %5635 = dma.hbm_to_vmem [thread:$0]  (!%p6076_p11), %s9575_s5, 2048, %s297_s22, [#allocation10], %s9528_s26, %s9528_s26, %s9529_s27  }
  0x34   : > { %p5803_p7 = pnand %p5802_p10, %p5796_p0 }
  0x36   : > { %5806 = shalt.err (!%p5803_p7)
}
  0x37   : > { %s9576_s3 = sld [smem:[#allocation57_spill]]  ;;  %s5972_s22 = smov [#allocation11]  }
  0x38   : > { %s312_s28 = sshll.u32 %s5972_s22, 4  ;;  %s313_s28 = int_to_ptr.vmem [resolvable:$true] %s312_s28 }
  0x39   : > { %s5818_s29 = scalar_lea.vmem %s313_s28, 2048  ;;  %p5826_p0 = scmp.lt.s32.totalorder %s313_s28, %s313_s28 }
  0x3a   : > { %p5819_p1 = scmp.ne.s32.totalorder %s313_s28, %s5818_s29  ;;  %p5827_p3 = scmp.lt.s32.totalorder %s5818_s29, %s5818_s29 }
  0x3c   : > { %p5821_p9 = pnand %p5819_p1, %p5731_p12  ;;  %p5828_p5 = por %p5827_p3, %p5826_p0 }
  0x3d   : > { %5632 = dma.hbm_to_vmem [thread:$0]  (!%p6076_p11), %s9576_s3, 18432, %s281_s24, [#allocation7], %s9528_s26, %s9528_s26, %s9529_s27  }
  0x3e   : > { %p5822_p13 = pneg %p5821_p9 }
  0x40   : > { %p5829_p10 = pnand %p5828_p5, %p5822_p13 }
  0x42   : > { %5832 = shalt.err (!%p5829_p10)
}
  0x43   : > { %5638 = dma.hbm_to_vmem [thread:$0]  (!%p6076_p11), %s9524_s7, 2048, %s313_s28, [#allocation10], %s9528_s26, %s9528_s26, %s9529_s27  }
  0x44   : > { %s6127_s18 = sadd.s32 1, %s5949_s12   ;;  %s34_s20 = sadd.s32 1, %s5945_s11 }
  0x45   : > { %s31_s21 = ssub.s32 %s5949_s12, %s6127_s18  ;;  %p41_p12 = scmp.ne.s32.totalorder %s5945_s11, %s5941_s10 }
  0x46   : > { %p32_p7 = scmp.eq.s32.totalorder %s31_s21, 0  ;;  %p42_p1 = scmp.eq.s32.totalorder %s5949_s12, 0 }
  0x47   : > { %p6137_p9 = por %p239_p2, %p41_p12  ;;  %p5651_p13 = scmp.lt.s32.totalorder %s5949_s12, 2 }
  0x48   : > { %s6143_s23 = scalar_select %p32_p7, %s5945_s11, %s34_s20  }
  0x49   : > { %s9577_s19 = scalar_select %p6137_p9, 1, 0 }
  0x4a   : > { %p43_p0 = por %p42_p1, %p41_p12  ;;  %s329_s25 = sand.u32 1, %s5945_s11  }
  0x4b   : > { %s4364_s22 = sshll.u32 %s329_s25, 10  ;;  %s4508_s28 = sshll.u32 %s5949_s12, 14 }
  0x4c   : > { %s6150_s14 = scalar_lea.hbm %s9517_s0, %s4508_s28  ;;  %s333_s21 = scalar_lea.vmem [#allocation3], %s4364_s22 }
  0x4d   : > { %s340_s26 = sshll.u32 %s333_s21, 4  ;;  %p6154_p2 = pnand %p5651_p13, %p43_p0  ;;  %s6152_s26 = int_to_ptr.vmem [resolvable:$true] %s340_s26 }
  0x4e   : > { %s6158_s20 = scalar_lea.sflag [#allocation4], %s329_s25  ;;  %s5833_s1 = scalar_lea.hbm %s6150_s14, 16384 }
  0x4f   : > { %p5834_p11 = scmp.ne.s32.totalorder %s6150_s14, %s5833_s1  ;;  %p5835_p3 = pneg %p6154_p2 }
  0x50   : > { %s5838_s22 = scalar_lea.hbm %s9517_s0, 32768  ;;  %p5839_p12 = scmp.lt.s32.totalorder %s6150_s14, %s9517_s0 }
  0x51   : > { %p5836_p5 = pnand %p5835_p3, %p5834_p11  ;;  %p5840_p7 = scmp.lt.s32.totalorder %s5838_s22, %s5833_s1 }
  0x53   : > { %p5837_p10 = pneg %p5836_p5  ;;  %p5841_p1 = por %p5840_p7, %p5839_p12 }
  0x55   : > { %p5842_p13 = pnand %p5841_p1, %p5837_p10 }
  0x57   : > { %5845 = shalt.err (!%p5842_p13)
}
  0x58   : > { %s5846_s25 = scalar_lea.vmem %s6152_s26, 16384  ;;  %s5973_s3 = smov [#allocation3]  }
  0x59   : > { %p5847_p0 = scmp.ne.s32.totalorder %s6152_s26, %s5846_s25  ;;  %s5851_s5 = sshll.u32 %s5973_s3, 4  ;;  %s5852_s5 = int_to_ptr.vmem [resolvable:$false] %s5851_s5 }
  0x5a   : > { %s5853_s28 = scalar_lea.vmem %s5852_s5, 32768  ;;  %p5854_p5 = scmp.lt.s32.totalorder %s6152_s26, %s5852_s5 }
  0x5b   : > { %p5849_p6 = pnand %p5847_p0, %p5835_p3  ;;  %p5855_p9 = scmp.lt.s32.totalorder %s5853_s28, %s5846_s25 }
  0x5d   : > { %p5850_p11 = pneg %p5849_p6  ;;  %p5856_p4 = por %p5855_p9, %p5854_p5 }
  0x5f   : > { %p5857_p8 = pnand %p5856_p4, %p5850_p11 }
  0x61   : > { %5860 = shalt.err (!%p5857_p8)
}
  0x62   : > { %s9579_s1 = smov 8   ;;  %s9580_s29 = smov 128  }
  0x63   : > { %5642 = dma.hbm_to_vmem [thread:$0]  (!%p6154_p2), %s6150_s14, 16384, %s6152_s26, %s6158_s20, %s9580_s29, %s9580_s29, %s9579_s1  }
  0x64   : > { %p9581_p6 = scmp.ne.s32.totalorder %s9572_s17, 0 }
  0x66   : > { %352 = sbr.rel (%p9581_p6) target bundleno = 1719 (0x6b7), region = 56 }
  0x6b   : > { %s6185_s3 = sand.u32 1, %s5941_s10   ;;  %p9582_p4 = scmp.ne.s32.totalorder %s9570_s15, 0 }
  0x6c   : > { %s4368_s5 = sshll.u32 %s6185_s3, 10  ;;  %s355_s22 = scalar_lea.sflag [#allocation4], %s6185_s3 }
  0x6d   : > { %s6189_s24 = scalar_lea.vmem [#allocation3], %s4368_s5 }
  0x6e   : > { %5920 = dma.done.wait (%p9582_p4), %s355_s22, 16384  }
  0x6f   : > { %5922 = vsyncadd (%p9582_p4), %s355_s22, 4294950912  ;;  %p9583_p8 = scmp.eq.s32.totalorder %s6048_s13, 0 }
  0x71   : > { %5924 = dma.done.wait (%p9583_p8), [#allocation7], 20480   ;;  %p9584_p9 = pmov %p9583_p8 }
  0x72   : > { %p9585_p2 = pmov %p9583_p8 }
  0x73   : > { %5926 = vsyncadd (%p9584_p9), [#allocation7], 4294946816 }
  0x74   : > { %5928 = dma.done.wait (%p9585_p2), [#allocation10], 4096   ;;  %p9586_p3 = pmov %p9585_p2 }
  0x75   : > { %s4373_s17 = sshll.u32 %s6185_s3, 7  ;;  %s6206_s27 = smov 0  }
  0x76   : > { %5930 = vsyncadd (%p9586_p3), [#allocation10], 4294963200  ;;  %s6204_s26 = scalar_lea.vmem [#allocation12], %s4373_s17 }
  0x77 LB: >> { %v448_v0 = vld [vmem:[#allocation6 + $0x78] sm:$0xff]  ;;  %v447_v1 = vld [vmem:[#allocation6 + $0x70] sm:$0xff]  ;;  %v446_v2 = vld [vmem:[#allocation6 + $0x68] sm:$0xff]  ;;  %s6212_s15 = sshll.u32 %s5953_s27, 7  ;;  %v617_v32 = vlaneseq  ;;  %s414_s27 = sadd.s32 1, %s5953_s27   ;;  %s5953_s27 = sphi %s6206_s27, %s414_s27  }
  0x78   : >> { %5054 = vmatprep.subr.mxu0 %v448_v0  ;;  %5446 = vmatprep.subr.mxu1 %v448_v0  ;;  %v445_v3 = vld [vmem:[#allocation6 + $0x60] sm:$0xff]  ;;  %v444_v4 = vld [vmem:[#allocation6 + $0x58] sm:$0xff]  ;;  %v443_v5 = vld [vmem:[#allocation6 + $0x50] sm:$0xff]  ;;  %s6216_s14 = scalar_lea.vmem %s6189_s24, %s6212_s15 [#allocation3]  ;;  %v6243_v36 = vstv %s6212_s15  ;;  %s6781_s25 = scalar_lea.vmem [#allocation2], %s6212_s15 }
  0x79   : >> { %5055 = vmatpush3.msra.mxu0 %v448_v0  ;;  %5462 = vmatpush3.msra.mxu1 %v448_v0  ;;  %v442_v6 = vld [vmem:[#allocation6 + $0x48] sm:$0xff]  ;;  %v441_v7 = vld [vmem:[#allocation6 + $0x40] sm:$0xff]  ;;  %v440_v8 = vld [vmem:[#allocation6 + $0x38] sm:$0xff]  ;;  %v6234_v33 = vshrl.u32 %v617_v32, 7  ;;  %p411_p10 = scmp.ge.s32.totalorder %s414_s27, 2  }
  0x7a   : >> { %5056 = vmatprep.subr.mxu0 %v447_v1  ;;  %5447 = vmatprep.subr.mxu1 %v447_v1  ;;  %v439_v9 = vld [vmem:[#allocation6 + $0x30] sm:$0xff]  ;;  %v438_v10 = vld [vmem:[#allocation6 + $0x28] sm:$0xff]  ;;  %v437_v11 = vld [vmem:[#allocation6 + $0x20] sm:$0xff]  ;;  %s6919_s28 = smov (%p411_p10), 0  }
  0x7b   : >> { %5057 = vmatpush3.msra.mxu0 %v447_v1  ;;  %5463 = vmatpush3.msra.mxu1 %v447_v1  ;;  %v436_v12 = vld [vmem:[#allocation6 + $0x18] sm:$0xff]  ;;  %v435_v13 = vld [vmem:[#allocation6 + $0x10] sm:$0xff]  ;;  %v434_v14 = vld [vmem:[#allocation6 + $0x8] sm:$0xff]  ;;  %v6237_v34 = vadd.s32 8, %v6234_v33  ;;  %v6240_v35 = vadd.s32 72, %v6234_v33  ;;  %v6250_v39 = vadd.s32 64, %v6234_v33  ;;  %v635_v40 = vadd.s32 %v6243_v36, %v6234_v33 }
  0x7c   : >> { %5058 = vmatprep.subr.mxu0 %v446_v2  ;;  %5448 = vmatprep.subr.mxu1 %v446_v2  ;;  %v433_v15 = vld [vmem:[#allocation6] sm:$0xff]  ;;  %v418_v18 = vld [vmem:[%s6216_s14 + $0x8] sm:$0xff]  ;;  %v419_v20 = vld [vmem:[%s6216_s14 + $0x10] sm:$0xff]  ;;  %v6257_v45 = vadd.s32 24, %v6234_v33  ;;  %v6260_v46 = vadd.s32 88, %v6234_v33  ;;  %v6271_v56 = vadd.s32 16, %v6234_v33 }
  0x7d   : >> { %5059 = vmatpush3.msra.mxu0 %v446_v2  ;;  %5464 = vmatpush3.msra.mxu1 %v446_v2  ;;  %v417_v16 = vld [vmem:[%s6216_s14] sm:$0xff]  ;;  %v426_v19 = vld [vmem:[%s6216_s14 + $0x48] sm:$0xff]  ;;  %v427_v21 = vld [vmem:[%s6216_s14 + $0x50] sm:$0xff]  ;;  %v636_v37 = vadd.s32 %v6243_v36, %v6237_v34  ;;  %v644_v38 = vadd.s32 %v6243_v36, %v6240_v35  ;;  %v643_v43 = vadd.s32 %v6243_v36, %v6250_v39  ;;  %v651_v44 = vcvt.s32.f32 %v635_v40 }
  0x7e   : >> { %5060 = vmatprep.subr.mxu0 %v445_v3  ;;  %5449 = vmatprep.subr.mxu1 %v445_v3  ;;  %v425_v17 = vld [vmem:[%s6216_s14 + $0x40] sm:$0xff]  ;;  %v420_v22 = vld [vmem:[%s6216_s14 + $0x18] sm:$0xff]  ;;  %v422_v26 = vld [vmem:[%s6216_s14 + $0x28] sm:$0xff]  ;;  %v6264_v51 = vadd.s32 %v6243_v36, %v6257_v45  ;;  %v6268_v52 = vadd.s32 %v6243_v36, %v6260_v46  ;;  %v6274_v57 = vadd.s32 80, %v6234_v33  ;;  %v6280_v0 = vadd.s32 %v6243_v36, %v6271_v56 }
  0x7f   : >> { %5061 = vmatpush3.msra.mxu0 %v445_v3  ;;  %5465 = vmatpush3.msra.mxu1 %v445_v3  ;;  %v428_v23 = vld [vmem:[%s6216_s14 + $0x58] sm:$0xff]  ;;  %v421_v24 = vld [vmem:[%s6216_s14 + $0x20] sm:$0xff]  ;;  %v430_v27 = vld [vmem:[%s6216_s14 + $0x68] sm:$0xff]  ;;  %v652_v41 = vcvt.s32.f32 %v636_v37  ;;  %v660_v42 = vcvt.s32.f32 %v644_v38  ;;  %v659_v49 = vcvt.s32.f32 %v643_v43  ;;  %v667_v50 = vadd.f32 0.5, %v651_v44 }
  0x80   : >> { %5062 = vmatprep.subr.mxu0 %v444_v4  ;;  %5450 = vmatprep.subr.mxu1 %v444_v4  ;;  %v429_v25 = vld [vmem:[%s6216_s14 + $0x60] sm:$0xff]  ;;  %v423_v28 = vld [vmem:[%s6216_s14 + $0x30] sm:$0xff]  ;;  %v424_v30 = vld [vmem:[%s6216_s14 + $0x38] sm:$0xff]  ;;  %v654_v59 = vcvt.s32.f32 %v6264_v51  ;;  %v662_v60 = vcvt.s32.f32 %v6268_v52  ;;  %v6284_v1 = vadd.s32 %v6243_v36, %v6274_v57 }
  0x81   : >> { %5063 = vmatpush3.msra.mxu0 %v444_v4  ;;  %5466 = vmatpush3.msra.mxu1 %v444_v4  ;;  %v431_v29 = vld [vmem:[%s6216_s14 + $0x70] sm:$0xff]  ;;  %v432_v31 = vld [vmem:[%s6216_s14 + $0x78] sm:$0xff]  ;;  %v668_v47 = vadd.f32 0.5, %v652_v41  ;;  %v676_v48 = vadd.f32 0.5, %v660_v42  ;;  %v675_v55 = vadd.f32 0.5, %v659_v49  ;;  %v683_v58 = vmul.f32 0.0625, %v667_v50 }
  0x82   : >> { %5064 = vmatprep.subr.mxu0 %v443_v5  ;;  %5451 = vmatprep.subr.mxu1 %v443_v5  ;;  %v670_v3 = vadd.f32 0.5, %v654_v59  ;;  %v6289_v4 = vadd.s32 40, %v6234_v33 }
  0x83   : >> { %5065 = vmatpush3.msra.mxu0 %v443_v5  ;;  %5467 = vmatpush3.msra.mxu1 %v443_v5  ;;  %v684_v53 = vmul.f32 0.0625, %v668_v47  ;;  %v692_v54 = vmul.f32 0.0625, %v676_v48  ;;  %v691_v63 = vmul.f32 0.0625, %v675_v55  ;;  %v699_v2 = vfloor.f32 %v683_v58 }
  0x84   : >> { %5066 = vmatprep.subr.mxu0 %v442_v6  ;;  %5452 = vmatprep.subr.mxu1 %v442_v6  ;;  %v678_v5 = vadd.f32 0.5, %v662_v60 }
  0x85   : >> { %5067 = vmatpush3.msra.mxu0 %v442_v6  ;;  %5468 = vmatpush3.msra.mxu1 %v442_v6  ;;  %v700_v61 = vfloor.f32 %v684_v53  ;;  %v708_v62 = vfloor.f32 %v692_v54  ;;  %v6294_v6 = vadd.s32 104, %v6234_v33 }
  0x86   : >> { %5068 = vmatprep.subr.mxu0 %v441_v7  ;;  %5453 = vmatprep.subr.mxu1 %v441_v7 }
  0x87   : >> { %5069 = vmatpush3.msra.mxu0 %v441_v7  ;;  %5469 = vmatpush3.msra.mxu1 %v441_v7  ;;  %v716_v7 = vmul.f32 16.0, %v700_v61 }
  0x88   : >> { %5070 = vmatprep.subr.mxu0 %v440_v8  ;;  %5454 = vmatprep.subr.mxu1 %v440_v8 }
  0x89   : >> { %5071 = vmatpush3.msra.mxu0 %v440_v8  ;;  %5470 = vmatpush3.msra.mxu1 %v440_v8  ;;  %v724_v8 = vmul.f32 16.0, %v708_v62 }
  0x8a   : >> { %5072 = vmatprep.subr.mxu0 %v439_v9  ;;  %5455 = vmatprep.subr.mxu1 %v439_v9 }
  0x8b   : >> { %5073 = vmatpush3.msra.mxu0 %v439_v9  ;;  %5471 = vmatpush3.msra.mxu1 %v439_v9  ;;  %v707_v9 = vfloor.f32 %v691_v63 }
  0x8c   : >> { %5074 = vmatprep.subr.mxu0 %v438_v10  ;;  %5456 = vmatprep.subr.mxu1 %v438_v10 }
  0x8d   : >> { %5075 = vmatpush3.msra.mxu0 %v438_v10  ;;  %5472 = vmatpush3.msra.mxu1 %v438_v10  ;;  %v653_v10 = vcvt.s32.f32 %v6280_v0  ;;  %v6339_v43 = vmul.f32 2.0, %v707_v9 }
  0x8e   : >> { %5076 = vmatprep.subr.mxu0 %v437_v11  ;;  %5457 = vmatprep.subr.mxu1 %v437_v11 }
  0x8f   : >> { %5077 = vmatpush3.msra.mxu0 %v437_v11  ;;  %5473 = vmatpush3.msra.mxu1 %v437_v11  ;;  %v661_v11 = vcvt.s32.f32 %v6284_v1  ;;  %vm819_vm8 = vcmp.ge.f32.partialorder %v6339_v43, 1.0  ;;  %vm835_vm10 = vcmp.le.f32.partialorder %v6339_v43, 16.0 }
  0x90   : >> { %5078 = vmatprep.subr.mxu0 %v436_v12  ;;  %5458 = vmatprep.subr.mxu1 %v436_v12 }
  0x91   : >> { %5079 = vmatpush3.msra.mxu0 %v436_v12  ;;  %5474 = vmatpush3.msra.mxu1 %v436_v12  ;;  %v715_v12 = vmul.f32 16.0, %v699_v2 }
  0x92   : >> { %5080 = vmatprep.subr.mxu0 %v435_v13  ;;  %5459 = vmatprep.subr.mxu1 %v435_v13 }
  0x93   : >> { %5081 = vmatpush3.msra.mxu0 %v435_v13  ;;  %5475 = vmatpush3.msra.mxu1 %v435_v13  ;;  %v686_v13 = vmul.f32 0.0625, %v670_v3 }
  0x94   : >> { %5082 = vmatprep.subr.mxu0 %v434_v14  ;;  %5460 = vmatprep.subr.mxu1 %v434_v14 }
  0x95   : >> { %5083 = vmatpush3.msra.mxu0 %v434_v14  ;;  %5476 = vmatpush3.msra.mxu1 %v434_v14  ;;  %v6300_v14 = vadd.s32 %v6243_v36, %v6289_v4 }
  0x96   : >> { %5084 = vmatprep.subr.mxu0 %v433_v15  ;;  %5461 = vmatprep.subr.mxu1 %v433_v15 }
  0x97   : >> { %5085 = vmatpush3.msra.mxu0 %v433_v15  ;;  %5477 = vmatpush3.msra.mxu1 %v433_v15  ;;  %v694_v15 = vmul.f32 0.0625, %v678_v5 }
  0x98   : >> { %5086 = vmatprep.mubr.f32.mxu0 %v417_v16  ;;  %5098 = vmatprep.mubr.f32.mxu1 %v425_v17  ;;  %v6304_v16 = vadd.s32 %v6243_v36, %v6294_v6  ;;  %v6307_v17 = vadd.s32 32, %v6234_v33 }
  0x99   : >> { %5087 = vmatmul.mubr.f32.vlgmr.msra.gmra.mxu0 %v418_v18  ;;  %5099 = vmatmul.mubr.f32.vlgmr.msra.gmra.mxu1 %v426_v19  ;;  %v6310_v18 = vadd.s32 96, %v6234_v33  ;;  %v732_v19 = vsub.f32 %v652_v41, %v716_v7  ;;  %v747_v41 = vmul.f32 2.0, %v699_v2 }
  0x9a   : >> { %5089 = vmatprep.mubr.f32.mxu0 %v419_v20  ;;  %5101 = vmatprep.mubr.f32.mxu1 %v427_v21  ;;  %v740_v20 = vsub.f32 %v660_v42, %v724_v8  ;;  %v723_v21 = vmul.f32 16.0, %v707_v9  ;;  %v6327_v32 = vadd.s32 %v6243_v36, %v6307_v17  ;;  %v6375_v9 = vadd.s32 112, %v6234_v33 }
  0x9b   : >> { %v6331_v37 = vadd.s32 %v6243_v36, %v6310_v18  ;;  %v6333_v38 = vmul.f32 2.0, %v732_v19  ;;  %vm811_vm5 = vcmp.ge.f32.partialorder %v747_v41, 1.0  ;;  %vm827_vm6 = vcmp.le.f32.partialorder %v747_v41, 16.0 }
  0x9c   : >> { %v6335_v40 = vmul.f32 2.0, %v740_v20  ;;  %v739_v42 = vsub.f32 %v659_v49, %v723_v21  ;;  %v6351_v49 = vadd.s32 120, %v6234_v33  ;;  %v655_v55 = vcvt.s32.f32 %v6327_v32 }
  0x9d   : >> { %5090 = vmatmul.mubr.f32.gmra.mxu0 %v420_v22  ;;  %5102 = vmatmul.mubr.f32.gmra.mxu1 %v428_v23  ;;  %v6312_v22 = vmul.f32 2.0, %v700_v61  ;;  %v669_v23 = vadd.f32 0.5, %v653_v10  ;;  %v663_v58 = vcvt.s32.f32 %v6331_v37  ;;  %vm860_vm4 = vcmp.ge.f32.partialorder %v6333_v38, 1.0 }
  0x9e   : >> { %5092 = vmatprep.mubr.f32.mxu0 %v421_v24  ;;  %5104 = vmatprep.mubr.f32.mxu1 %v429_v25  ;;  %v677_v24 = vadd.f32 0.5, %v661_v11  ;;  %v6319_v25 = vadd.s32 56, %v6234_v33  ;;  %v6359_v61 = vmul.f32 2.0, %v739_v42  ;;  %vm868_vm7 = vcmp.ge.f32.partialorder %v6335_v40, 1.0 }
  0x9f   : >> { %vm812_vm0 = vcmp.ge.f32.partialorder %v6312_v22, 1.0  ;;  %vm828_vm1 = vcmp.le.f32.partialorder %v6312_v22, 16.0  ;;  %v6372_v8 = vadd.s32 %v6243_v36, %v6351_v49  ;;  %v679_v19 = vadd.f32 0.5, %v663_v58 }
  0xa0   : >> { %v6343_v47 = vadd.s32 %v6243_v36, %v6319_v25  ;;  %v693_v2 = vmul.f32 0.0625, %v677_v24  ;;  %vm6409_vm12 = vmand %vm812_vm0, %vm828_vm1 }
  0xa1   : >> { %5093 = vmatmul.mubr.f32.gmra.mxu0 %v422_v26  ;;  %5105 = vmatmul.mubr.f32.gmra.mxu1 %v430_v27  ;;  %v6321_v26 = vmul.f32 2.0, %v708_v62  ;;  %v731_v27 = vsub.f32 %v651_v44, %v715_v12  ;;  %v685_v44 = vmul.f32 0.0625, %v669_v23  ;;  %v6362_v62 = vadd.s32 48, %v6234_v33  ;;  %vm6428_vm0 = vmand %vm811_vm5, %vm827_vm6 }
  0xa2   : >> { %5095 = vmatprep.mubr.f32.mxu0 %v423_v28  ;;  %5107 = vmatprep.mubr.f32.mxu1 %v431_v29  ;;  %v702_v28 = vfloor.f32 %v686_v13  ;;  %v656_v29 = vcvt.s32.f32 %v6300_v14  ;;  %v658_v3 = vcvt.s32.f32 %v6343_v47  ;;  %v709_v23 = vfloor.f32 %v693_v2  ;;  %vm6449_vm6 = vmand %vm819_vm8, %vm835_vm10 }
  0xa3   : >> { %vm820_vm2 = vcmp.ge.f32.partialorder %v6321_v26, 1.0  ;;  %v6346_v48 = vmul.f32 2.0, %v731_v27  ;;  %vm836_vm3 = vcmp.le.f32.partialorder %v6321_v26, 16.0  ;;  %v701_v63 = vfloor.f32 %v685_v44 }
  0xa4   : >> { %v718_v50 = vmul.f32 16.0, %v702_v28  ;;  %v672_v53 = vadd.f32 0.5, %v656_v29  ;;  %v750_v51 = vmul.f32 2.0, %v702_v28  ;;  %v674_v24 = vadd.f32 0.5, %v658_v3  ;;  %vm6418_vm15 = vmand %vm820_vm2, %vm836_vm3 }
  0xa5   : >> { %5096 = vmatmul.mubr.f32.gmra.mxu0 %v424_v30  ;;  %5108 = vmatmul.mubr.f32.gmra.mxu1 %v432_v31  ;;  %v710_v30 = vfloor.f32 %v694_v15  ;;  %v664_v31 = vcvt.s32.f32 %v6304_v16  ;;  %vm859_vm9 = vcmp.ge.f32.partialorder %v6346_v48, 1.0  ;;  %v671_v15 = vadd.f32 0.5, %v655_v55  ;;  %vm6439_vm2 = vmand %vm6409_vm12, %vm860_vm4 }
  0xa6   : >> { %v734_v5 = vsub.f32 %v654_v59, %v718_v50  ;;  %v688_v7 = vmul.f32 0.0625, %v672_v53  ;;  %v6387_v59 = vadd.s32 %v6243_v36, %v6362_v62  ;;  %v717_v21 = vmul.f32 16.0, %v701_v63  ;;  %vm6461_vm4 = vmand %vm6418_vm15, %vm868_vm7 }
  0xa7   : >> { %v680_v54 = vadd.f32 0.5, %v664_v31  ;;  %v726_v12 = vmul.f32 16.0, %v710_v30  ;;  %v758_v20 = vmul.f32 2.0, %v710_v30  ;;  %v666_v44 = vcvt.s32.f32 %v6372_v8  ;;  %vm6472_vm12 = vmand %vm6428_vm0, %vm859_vm9 }
  0xa8   : >> { %v6391_v27 = vmul.f32 2.0, %v734_v5  ;;  %v704_v42 = vfloor.f32 %v688_v7  ;;  %v6396_v50 = vadd.s32 %v6243_v36, %v6375_v9  ;;  %v6401_v30 = vmul.f32 0.0625, %v671_v15 }
  0xa9   : >> { %v6377_v13 = vmul.f32 0.0625, %v680_v54  ;;  %v742_v28 = vsub.f32 %v662_v60, %v726_v12  ;;  %v6403_v54 = vmul.f32 0.0625, %v679_v19  ;;  %vm814_vm13 = vcmp.ge.f32.partialorder %v750_v51, 1.0 }
  0xaa   : >> { %vm830_vm14 = vcmp.le.f32.partialorder %v750_v51, 16.0  ;;  %v749_v36 = vmul.f32 2.0, %v701_v63  ;;  %v9533_v52 = vcvt.s32.f32 %v6387_v59  ;;  %vm822_vm11 = vcmp.ge.f32.partialorder %v758_v20, 1.0 }
  0xab   : >> { %v712_v53 = vfloor.f32 %v6377_v13  ;;  %v733_v22 = vsub.f32 %v653_v10, %v717_v21  ;;  %v725_v5 = vmul.f32 16.0, %v709_v23  ;;  %v6424_v7 = vmul.f32 0.0625, %v674_v24  ;;  %vm6499_vm0 = vmand %vm814_vm13, %vm830_vm14 }
  0xac   : >> { %vm838_vm1 = vcmp.le.f32.partialorder %v758_v20, 16.0  ;;  %v720_v12 = vmul.f32 16.0, %v704_v42  ;;  %v682_v26 = vadd.f32 0.5, %v666_v44  ;;  %v665_v13 = vcvt.s32.f32 %v6396_v50 }
  0xad   : >> { %v6453_v41 = vmul.f32 2.0, %v742_v28  ;;  %v728_v15 = vmul.f32 16.0, %v712_v53  ;;  %v703_v19 = vfloor.f32 %v6401_v30  ;;  %v711_v21 = vfloor.f32 %v6403_v54  ;;  %vm6509_vm15 = vmand %vm822_vm11, %vm838_vm1 }
  0xae   : >> { %vm862_vm8 = vcmp.ge.f32.partialorder %v6391_v27, 1.0  ;;  %vm813_vm10 = vcmp.ge.f32.partialorder %v749_v36, 1.0  ;;  %v757_v43 = vmul.f32 2.0, %v709_v23  ;;  %v673_v28 = vadd.f32 0.5, %v9533_v52 }
  0xaf   : >> { %v6478_v54 = vmul.f32 2.0, %v733_v22  ;;  %vm829_vm5 = vcmp.le.f32.partialorder %v749_v36, 16.0  ;;  %v741_v23 = vsub.f32 %v661_v11, %v725_v5  ;;  %v706_v2 = vfloor.f32 %v6424_v7  ;;  %vm6529_vm1 = vmand %vm6499_vm0, %vm862_vm8 }
  0xb0   : >> { %vm9601_vm3 = vcmp.ge.f32.partialorder %v6359_v61, 1.0  ;;  %v736_v63 = vsub.f32 %v656_v29, %v720_v12  ;;  %v752_v52 = vmul.f32 2.0, %v704_v42  ;;  %v6493_v22 = vmul.f32 0.0625, %v682_v26  ;;  %vm6518_vm7 = vmand %vm813_vm10, %vm829_vm5 }
  0xb1   : >> { %vm6487_vm9 = vmand %vm6449_vm6, %vm9601_vm3  ;;  %v681_v1 = vadd.f32 0.5, %v665_v13  ;;  %vm870_vm3 = vcmp.ge.f32.partialorder %v6453_v41, 1.0  ;;  %v744_v5 = vsub.f32 %v664_v31, %v728_v15  ;;  %v719_v7 = vmul.f32 16.0, %v703_v19 }
  0xb2   : >> { %v727_v14 = vmul.f32 16.0, %v711_v21  ;;  %vm821_vm14 = vcmp.ge.f32.partialorder %v757_v43, 1.0  ;;  %v760_v51 = vmul.f32 2.0, %v712_v53  ;;  %v6514_v42 = vmul.f32 0.0625, %v673_v28  ;;  %vm6540_vm10 = vmand %vm6509_vm15, %vm870_vm3 }
  0xb3   : >> { %vm861_vm6 = vcmp.ge.f32.partialorder %v6478_v54, 1.0  ;;  %v6523_v31 = vmul.f32 2.0, %v741_v23  ;;  %vm837_vm11 = vcmp.le.f32.partialorder %v757_v43, 16.0  ;;  %v722_v20 = vmul.f32 16.0, %v706_v2 }
  0xb4   : >> { %v6533_v12 = vmul.f32 2.0, %v736_v63  ;;  %v714_v36 = vfloor.f32 %v6493_v22  ;;  %v697_v26 = vmul.f32 0.0625, %v681_v1  ;;  %vm832_vm13 = vcmp.le.f32.partialorder %v752_v52, 16.0  ;;  %vm6552_vm8 = vmand %vm6518_vm7, %vm861_vm6 }
  0xb5   : >> { %v6544_v15 = vmul.f32 2.0, %v744_v5  ;;  %v735_v28 = vsub.f32 %v655_v55, %v719_v7  ;;  %v743_v23 = vsub.f32 %v663_v58, %v727_v14  ;;  %v9614_v63 = vmov 0  ;;  %vm6559_vm3 = vmand %vm821_vm14, %vm837_vm11 }
  0xb6   : >> { %v9615_v63 = vsel %vm6552_vm8, 4294967295, %v9614_v63  ;;  %v751_v22 = vmul.f32 2.0, %v703_v19  ;;  %v705_v1 = vfloor.f32 %v6514_v42  ;;  %v759_v32 = vmul.f32 2.0, %v711_v21 }
  0xb7   : >> { %v738_v37 = vsub.f32 %v658_v3, %v722_v20  ;;  %v754_v55 = vmul.f32 2.0, %v706_v2  ;;  %vm9618_vm7 = vcmp.le.f32.partialorder %v6333_v38, 16.0  ;;  %v9619_v58 = vmov 0  ;;  %v6640_v2 = vld [vmem:[%s9519_s2] ss:$0 sm:$0xff] }
  0xb8   : >> { %vm6570_vm6 = vmand %vm6439_vm2, %vm9618_vm7  ;;  %vm9621_vm14 = vcmp.le.f32.partialorder %v6335_v40, 16.0  ;;  %vm9624_vm0 = vcmp.ge.f32.partialorder %v752_v52, 1.0  ;;  %vm864_vm2 = vcmp.ge.f32.partialorder %v6533_v12, 1.0  ;;  %v730_v47 = vmul.f32 16.0, %v714_v36 }
  0xb9   : >> { %v9620_v58 = vsel %vm6570_vm6, 4294967295, %v9619_v58  ;;  %vm6578_vm11 = vmand %vm6461_vm4, %vm9621_vm14  ;;  %v713_v3 = vfloor.f32 %v697_v26  ;;  %vm9627_vm6 = vcmp.le.f32.partialorder %v760_v51, 16.0  ;;  %vm9628_vm8 = vcmp.ge.f32.partialorder %v760_v51, 1.0 }
  0xba   : >> { %vm6585_vm15 = vmand %vm9624_vm0, %vm832_vm13  ;;  %v6598_v0 = vmul.f32 2.0, %v735_v28  ;;  %v6600_v52 = vmul.f32 2.0, %v743_v23  ;;  %vm9631_vm13 = vcmp.le.f32.partialorder %v6346_v48, 16.0  ;;  %vm9634_vm7 = vcmp.le.f32.partialorder %v6359_v61, 16.0 }
  0xbb   : >> { %vm6593_vm4 = vmand %vm9628_vm8, %vm9627_vm6  ;;  %v9635_v24 = vmov 0  ;;  %vm9637_vm6 = vcmp.ge.f32.partialorder %v6523_v31, 1.0  ;;  %vm831_vm14 = vcmp.le.f32.partialorder %v751_v22, 16.0  ;;  %v721_v43 = vmul.f32 16.0, %v705_v1 }
  0xbc   : >> { %vm6606_vm0 = vmand %vm6472_vm12, %vm9631_vm13  ;;  %vm815_vm13 = vcmp.ge.f32.partialorder %v751_v22, 1.0  ;;  %v6635_v30 = vmul.f32 2.0, %v738_v37  ;;  %v746_v5 = vsub.f32 %v666_v44, %v730_v47  ;;  %v6652_v7 = vmul.f32 2.0, %v714_v36 }
  0xbd   : >> { %vm6614_vm8 = vmand %vm6487_vm9, %vm9634_vm7  ;;  %v729_v14 = vmul.f32 16.0, %v713_v3  ;;  %v9649_v51 = vmov 0  ;;  %v9658_v42 = vmov 0  ;;  %v753_v53 = vmul.f32 2.0, %v705_v1 }
  0xbe   : >> { %v9636_v24 = vsel %vm6614_vm8, 4294967295, %v9635_v24  ;;  %vm6622_vm5 = vmand %vm6559_vm3, %vm9637_vm6  ;;  %vm9642_vm6 = vcmp.ge.f32.partialorder %v6544_v15, 1.0  ;;  %vm9661_vm8 = vcmp.ge.f32.partialorder %v759_v32, 1.0  ;;  %v6705_v36 = vmul.f32 2.0, %v713_v3 }
  0xbf   : >> { %vm6631_vm9 = vmand %vm6585_vm15, %vm864_vm2  ;;  %vm9645_vm2 = vcmp.le.f32.partialorder %v6391_v27, 16.0  ;;  %v6741_v22 = vmul.f32 2.0, %v746_v5 }
  0xc0   : >> { %vm6646_vm12 = vmand %vm6593_vm4, %vm9642_vm6  ;;  %vm9648_vm4 = vcmp.le.f32.partialorder %v6453_v41, 16.0 }
  0xc1   : >> { %vm6658_vm3 = vmand %vm6529_vm1, %vm9645_vm2  ;;  %vm9660_vm2 = vcmp.le.f32.partialorder %v759_v32, 16.0 }
  0xc2   : >> { %vm6666_vm6 = vmand %vm6540_vm10, %vm9648_vm4  ;;  %vm9653_vm10 = vcmp.le.f32.partialorder %v6478_v54, 16.0  ;;  %vm9654_vm4 = vnez %v9615_v63  ;;  %v9664_v54 = vcvt.s32.f32 %v6387_v59 }
  0xc3   : >> { %v9650_v51 = vsel %vm6666_vm6, 4294967295, %v9649_v51  ;;  %vm6673_vm7 = vmand %vm815_vm13, %vm831_vm14  ;;  %vm9657_vm14 = vcmp.le.f32.partialorder %v6523_v31, 16.0 }
  0xc4   : >> { %vm6684_vm6 = vmand %vm9654_vm4, %vm9653_vm10  ;;  %v737_v20 = vsub.f32 %v9664_v54, %v721_v43  ;;  %vm9666_vm10 = vcmp.ge.f32.partialorder %v754_v55, 1.0 }
  0xc5   : >> { %vm6692_vm13 = vmand %vm6622_vm5, %vm9657_vm14  ;;  %vm9665_vm5 = vcmp.le.f32.partialorder %v754_v55, 16.0  ;;  %vm9669_vm14 = vcmp.le.f32.partialorder %v6533_v12, 16.0 }
  0xc6   : >> { %v9659_v42 = vsel %vm6692_vm13, 4294967295, %v9658_v42  ;;  %vm6698_vm1 = vmand %vm9661_vm8, %vm9660_vm2  ;;  %vm866_vm8 = vcmp.ge.f32.partialorder %v6635_v30, 1.0  ;;  %vm9672_vm13 = vcmp.le.f32.partialorder %v6544_v15, 16.0  ;;  %v745_v15 = vsub.f32 %v665_v13, %v729_v14 }
  0xc7   : >> { %vm6711_vm4 = vmand %vm9666_vm10, %vm9665_vm5  ;;  %vm9675_vm10 = vcmp.ge.f32.partialorder %v6598_v0, 1.0  ;;  %v6765_v13 = vmul.f32 2.0, %v737_v20 }
  0xc8   : >> { %vm6721_vm15 = vmand %vm6631_vm9, %vm9669_vm14  ;;  %vm833_vm9 = vcmp.le.f32.partialorder %v753_v53, 16.0  ;;  %v6795_v14 = vmul.f32 2.0, %v745_v15 }
  0xc9   : >> { %vm6729_vm5 = vmand %vm6646_vm12, %vm9672_vm13  ;;  %vm9678_vm12 = vcmp.ge.f32.partialorder %v6600_v52, 1.0 }
  0xca   : >> { %vm6737_vm2 = vmand %vm6673_vm7, %vm9675_vm10  ;;  %vm817_vm10 = vcmp.ge.f32.partialorder %v753_v53, 1.0 }
  0xcb   : >> { %vm6753_vm7 = vmand %vm6698_vm1, %vm9678_vm12  ;;  %vm9683_vm1 = vnez %v9620_v58  ;;  %vm9684_vm12 = vcmp.le.f32.partialorder %v6598_v0, 16.0 }
  0xcc   : >> { %vm6761_vm13 = vmand %vm6711_vm4, %vm866_vm8 }
  0xcd   : >> { %vm6776_vm4 = vmand %vm6737_vm2, %vm9684_vm12  ;;  %vm841_vm2 = vcmp.le.f32.partialorder %v6705_v36, 16.0  ;;  %vm9691_vm12 = vcmp.le.f32.partialorder %v6635_v30, 16.0 }
  0xce   : >> { %vm6828_vm14 = vmand %vm817_vm10, %vm833_vm9  ;;  %vm873_vm9 = vcmp.ge.f32.partialorder %v6795_v14, 1.0  ;;  %vm9705_vm10 = vcmp.ge.f32.partialorder %v6741_v22, 1.0 }
 0x159   : >> { %v5088_v27 = vpop.f32.mrf.mxu0  ;;  %v5100_v44 = vpop.f32.mrf.mxu1 }
 0x15a   : >> { %v528_v31 = vadd.f32 %v5088_v27, %v6640_v2  ;;  %v568_v26 = vadd.f32 %v5100_v44, %v6640_v2 }
 0x15b   : >> { %v522_v28 = vpop.f32.mrf.mxu0  ;;  %v562_v59 = vpop.f32.mrf.mxu1 }
 0x15c   : >> { %v602_v1 = vmax.f32 %v528_v31, 0.0  ;;  %v610_v11 = vmax.f32 %v568_v26, 0.0  ;;  %v523_v32 = vadd.f32 %v6640_v2, %v522_v28  ;;  %v563_v37 = vadd.f32 %v6640_v2, %v562_v59 }
 0x15d   : >> { %v5091_v38 = vpop.f32.mrf.mxu0  ;;  %v5103_v47 = vpop.f32.mrf.mxu1 }
 0x15e   : >> { %v956_v3 = vsel %vm9683_vm1, %v602_v1, 0.0  ;;  %v964_v40 = vsel %vm6578_vm11, %v610_v11, 0.0  ;;  %v601_v48 = vmax.f32 %v523_v32, 0.0  ;;  %v609_v43 = vmax.f32 %v563_v37, 0.0 }
 0x15f   : >> { %973 = vst [vmem:[%s6781_s25 + $0x8] sm:$0xff] %v956_v3  ;;  %981 = vst [vmem:[%s6781_s25 + $0x48] sm:$0xff] %v964_v40  ;;  %v538_v58 = vadd.f32 %v5091_v38, %v6640_v2  ;;  %v578_v19 = vadd.f32 %v5103_v47, %v6640_v2  ;;  %v532_v60 = vpop.f32.mrf.mxu0  ;;  %v572_v0 = vpop.f32.mrf.mxu1  ;;  %vm9687_vm11 = vcmp.le.f32.partialorder %v6600_v52, 16.0  ;;  %vm9690_vm1 = vnez %v9636_v24 }
 0x160   : >> { %vm6791_vm8 = vmand %vm6753_vm7, %vm9687_vm11  ;;  %v955_v8 = vsel %vm6606_vm0, %v601_v48, 0.0  ;;  %v963_v27 = vsel %vm9690_vm1, %v609_v43, 0.0  ;;  %v533_v44 = vadd.f32 %v6640_v2, %v532_v60  ;;  %v573_v52 = vadd.f32 %v6640_v2, %v572_v0 }
 0x161   : >> { %vm6808_vm7 = vmand %vm6761_vm13, %vm9691_vm12  ;;  %972 = vst [vmem:[%s6781_s25] sm:$0xff] %v955_v8  ;;  %v604_v54 = vmax.f32 %v538_v58, 0.0  ;;  %v612_v21 = vmax.f32 %v578_v19, 0.0  ;;  %v5094_v20 = vpop.f32.mrf.mxu0  ;;  %v5106_v31 = vpop.f32.mrf.mxu1  ;;  %vm9694_vm0 = vcmp.le.f32.partialorder %v6652_v7, 16.0  ;;  %vm9695_vm11 = vcmp.ge.f32.partialorder %v6652_v7, 1.0 }
 0x162   : >> { %980 = vst [vmem:[%s6781_s25 + $0x40] sm:$0xff] %v963_v27  ;;  %vm6818_vm1 = vmand %vm9695_vm11, %vm9694_vm0  ;;  %v603_v30 = vmax.f32 %v533_v44, 0.0  ;;  %v611_v26 = vmax.f32 %v573_v52, 0.0  ;;  %v548_v10 = vadd.f32 %v5094_v20, %v6640_v2  ;;  %v588_v28 = vadd.f32 %v5106_v31, %v6640_v2 }
 0x163   : >> { %v958_v59 = vsel %vm6658_vm3, %v604_v54, 0.0  ;;  %vm9700_vm0 = vnez %v9650_v51  ;;  %v542_v15 = vpop.f32.mrf.mxu0  ;;  %v582_v1 = vpop.f32.mrf.mxu1  ;;  %vm906_vm11 = vcmp.le.f32.partialorder %v6741_v22, 16.0  ;;  %vm9701_vm12 = vcmp.ge.f32.partialorder %v6705_v36, 1.0 }
 0x164   : >> { %v966_v12 = vsel %vm9700_vm0, %v612_v21, 0.0  ;;  %vm6841_vm13 = vmand %vm9701_vm12, %vm841_vm2  ;;  %975 = vst [vmem:[%s6781_s25 + $0x18] sm:$0xff] %v958_v59  ;;  %v957_v29 = vsel %vm6684_vm6, %v603_v30, 0.0  ;;  %vm9704_vm3 = vnez %v9659_v42  ;;  %v606_v11 = vmax.f32 %v548_v10, 0.0 }
 0x165   : >> { %983 = vst [vmem:[%s6781_s25 + $0x58] sm:$0xff] %v966_v12  ;;  %v965_v51 = vsel %vm9704_vm3, %v611_v26, 0.0  ;;  %v614_v32 = vmax.f32 %v588_v28, 0.0  ;;  %vm6856_vm2 = vmand %vm6818_vm1, %vm9705_vm10  ;;  %v543_v41 = vadd.f32 %v6640_v2, %v542_v15  ;;  %v583_v37 = vadd.f32 %v6640_v2, %v582_v1  ;;  %v5097_v42 = vpop.f32.mrf.mxu0  ;;  %v5109_v55 = vpop.f32.mrf.mxu1 }
 0x166   : >> { %974 = vst [vmem:[%s6781_s25 + $0x10] sm:$0xff] %v957_v29  ;;  %982 = vst [vmem:[%s6781_s25 + $0x50] sm:$0xff] %v965_v51  ;;  %vm9708_vm6 = vcmp.ge.f32.partialorder %v6765_v13, 1.0  ;;  %vm897_vm1 = vcmp.le.f32.partialorder %v6765_v13, 16.0  ;;  %vm905_vm0 = vcmp.le.f32.partialorder %v6795_v14, 16.0  ;;  %v960_v47 = vsel %vm6721_vm15, %v606_v11, 0.0 }
 0x167   : >> { %vm6868_vm12 = vmand %vm6828_vm14, %vm9708_vm6  ;;  %v968_v50 = vsel %vm6729_vm5, %v614_v32, 0.0  ;;  %v558_v3 = vadd.f32 %v5097_v42, %v6640_v2  ;;  %v598_v40 = vadd.f32 %v5109_v55, %v6640_v2  ;;  %977 = vst [vmem:[%s6781_s25 + $0x28] sm:$0xff] %v960_v47  ;;  %v605_v23 = vmax.f32 %v543_v41, 0.0  ;;  %v552_v63 = vpop.f32.mrf.mxu0  ;;  %v592_v58 = vpop.f32.mrf.mxu1 }
 0x168   : >> { %vm6884_vm14 = vmand %vm6841_vm13, %vm873_vm9  ;;  %985 = vst [vmem:[%s6781_s25 + $0x68] sm:$0xff] %v968_v50  ;;  %v613_v43 = vmax.f32 %v583_v37, 0.0  ;;  %v553_v0 = vadd.f32 %v6640_v2, %v552_v63  ;;  %v593_v22 = vadd.f32 %v6640_v2, %v592_v58 }
 0x169   : >> { %vm922_vm15 = vmand %vm6856_vm2, %vm906_vm11  ;;  %v608_v19 = vmax.f32 %v558_v3, 0.0  ;;  %v616_v60 = vmax.f32 %v598_v40, 0.0  ;;  %v959_v8 = vsel %vm6776_vm4, %v605_v23, 0.0  ;;  %413 = sbr.rel (!%p411_p10) target bundleno = 119 (0x77), region = 162 }
 0x16a   : >> { %vm913_vm5 = vmand %vm6868_vm12, %vm897_vm1  ;;  %v967_v27 = vsel %vm6791_vm8, %v613_v43, 0.0  ;;  %976 = vst [vmem:[%s6781_s25 + $0x20] sm:$0xff] %v959_v8  ;;  %v607_v52 = vmax.f32 %v553_v0, 0.0  ;;  %v615_v54 = vmax.f32 %v593_v22, 0.0 }
 0x16b   : >> { %vm921_vm13 = vmand %vm6884_vm14, %vm905_vm0  ;;  %984 = vst [vmem:[%s6781_s25 + $0x60] sm:$0xff] %v967_v27  ;;  %v962_v13 = vsel %vm6808_vm7, %v608_v19, 0.0  ;;  %v970_v44 = vsel %vm922_vm15, %v616_v60, 0.0 }
 0x16c   : >> { %979 = vst [vmem:[%s6781_s25 + $0x38] sm:$0xff] %v962_v13  ;;  %987 = vst [vmem:[%s6781_s25 + $0x78] sm:$0xff] %v970_v44  ;;  %v961_v2 = vsel %vm913_vm5, %v607_v52, 0.0  ;;  %v969_v61 = vsel %vm921_vm13, %v615_v54, 0.0 }
 0x16d   : >> { %978 = vst [vmem:[%s6781_s25 + $0x30] sm:$0xff] %v961_v2  ;;  %986 = vst [vmem:[%s6781_s25 + $0x70] sm:$0xff] %v969_v61 }
 0x16e LB: >> { %v1028_v5 = vld [vmem:[#allocation6 + $0x78] sm:$0xff]  ;;  %v1027_v14 = vld [vmem:[#allocation6 + $0x70] sm:$0xff]  ;;  %v1026_v16 = vld [vmem:[#allocation6 + $0x68] sm:$0xff]  ;;  %s6925_s1 = sshll.u32 %s5957_s28, 7  ;;  %s993_s28 = sadd.s32 1, %s5957_s28   ;;  %s5957_s28 = sphi %s6919_s28, %s993_s28  }
 0x16f   : >> { %5110 = vmatprep.subr.mxu0 %v1028_v5  ;;  %5478 = vmatprep.subr.mxu1 %v1028_v5  ;;  %v1025_v21 = vld [vmem:[#allocation6 + $0x60] sm:$0xff]  ;;  %v1024_v20 = vld [vmem:[#allocation6 + $0x58] sm:$0xff]  ;;  %v1023_v31 = vld [vmem:[#allocation6 + $0x50] sm:$0xff]  ;;  %s6929_s29 = scalar_lea.vmem %s6189_s24, %s6925_s1 [#allocation3]  ;;  %v6948_v23 = vstv %s6925_s1  ;;  %s7464_s17 = scalar_lea.vmem [#allocation2], %s6925_s1 }
 0x170   : >> { %5111 = vmatpush3.msra.mxu0 %v1028_v5  ;;  %5494 = vmatpush3.msra.mxu1 %v1028_v5  ;;  %v1022_v24 = vld [vmem:[#allocation6 + $0x48] sm:$0xff]  ;;  %v1021_v30 = vld [vmem:[#allocation6 + $0x40] sm:$0xff]  ;;  %v1020_v26 = vld [vmem:[#allocation6 + $0x38] sm:$0xff]  ;;  %v1216_v43 = vadd.s32 %v6948_v23, %v6237_v34  ;;  %v1224_v63 = vadd.s32 %v6948_v23, %v6240_v35  ;;  %v1215_v60 = vadd.s32 %v6948_v23, %v6234_v33  ;;  %p990_p12 = scmp.ge.s32.totalorder %s993_s28, 2  }
 0x171   : >> { %5112 = vmatprep.subr.mxu0 %v1027_v14  ;;  %5479 = vmatprep.subr.mxu1 %v1027_v14  ;;  %v1019_v10 = vld [vmem:[#allocation6 + $0x30] sm:$0xff]  ;;  %v1018_v28 = vld [vmem:[#allocation6 + $0x28] sm:$0xff]  ;;  %v1017_v7 = vld [vmem:[#allocation6 + $0x20] sm:$0xff]  ;;  %v1223_v0 = vadd.s32 %v6948_v23, %v6250_v39  ;;  %v6960_v44 = vadd.s32 %v6948_v23, %v6257_v45  ;;  %v6964_v61 = vadd.s32 %v6948_v23, %v6260_v46  ;;  %s7602_s27 = smov (%p990_p12), 0  }
 0x172   : >> { %5113 = vmatpush3.msra.mxu0 %v1027_v14  ;;  %5495 = vmatpush3.msra.mxu1 %v1027_v14  ;;  %v1016_v59 = vld [vmem:[#allocation6 + $0x18] sm:$0xff]  ;;  %v1015_v12 = vld [vmem:[#allocation6 + $0x10] sm:$0xff]  ;;  %v1014_v15 = vld [vmem:[#allocation6 + $0x8] sm:$0xff]  ;;  %v1232_v58 = vcvt.s32.f32 %v1216_v43  ;;  %v1240_v19 = vcvt.s32.f32 %v1224_v63  ;;  %v1231_v27 = vcvt.s32.f32 %v1215_v60 }
 0x173   : >> { %5114 = vmatprep.subr.mxu0 %v1026_v16  ;;  %5480 = vmatprep.subr.mxu1 %v1026_v16  ;;  %v1013_v1 = vld [vmem:[#allocation6] sm:$0xff]  ;;  %v4379_v51 = vld [vmem:[%s6929_s29 + $0x108] sm:$0xff]  ;;  %v4380_v32 = vld [vmem:[%s6929_s29 + $0x110] sm:$0xff]  ;;  %v1239_v13 = vcvt.s32.f32 %v1223_v0  ;;  %v1234_v14 = vcvt.s32.f32 %v6960_v44 }
 0x174   : >> { %5115 = vmatpush3.msra.mxu0 %v1026_v16  ;;  %5496 = vmatpush3.msra.mxu1 %v1026_v16  ;;  %v4378_v53 = vld [vmem:[%s6929_s29 + $0x100] sm:$0xff]  ;;  %v4387_v11 = vld [vmem:[%s6929_s29 + $0x148] sm:$0xff]  ;;  %v4388_v36 = vld [vmem:[%s6929_s29 + $0x150] sm:$0xff]  ;;  %v1248_v22 = vadd.f32 0.5, %v1232_v58  ;;  %v1256_v8 = vadd.f32 0.5, %v1240_v19  ;;  %v1247_v2 = vadd.f32 0.5, %v1231_v27 }
 0x175   : >> { %5116 = vmatprep.subr.mxu0 %v1025_v21  ;;  %5481 = vmatprep.subr.mxu1 %v1025_v21  ;;  %v4386_v29 = vld [vmem:[%s6929_s29 + $0x140] sm:$0xff]  ;;  %v4381_v41 = vld [vmem:[%s6929_s29 + $0x118] sm:$0xff]  ;;  %v4383_v38 = vld [vmem:[%s6929_s29 + $0x128] sm:$0xff]  ;;  %v1255_v5 = vadd.f32 0.5, %v1239_v13 }
 0x176   : >> { %5117 = vmatpush3.msra.mxu0 %v1025_v21  ;;  %5497 = vmatpush3.msra.mxu1 %v1025_v21  ;;  %v4389_v37 = vld [vmem:[%s6929_s29 + $0x158] sm:$0xff]  ;;  %v4382_v42 = vld [vmem:[%s6929_s29 + $0x120] sm:$0xff]  ;;  %v4391_v47 = vld [vmem:[%s6929_s29 + $0x168] sm:$0xff]  ;;  %v1264_v52 = vmul.f32 0.0625, %v1248_v22  ;;  %v1272_v54 = vmul.f32 0.0625, %v1256_v8 }
 0x177   : >> { %5118 = vmatprep.subr.mxu0 %v1024_v20  ;;  %5482 = vmatprep.subr.mxu1 %v1024_v20  ;;  %v4390_v55 = vld [vmem:[%s6929_s29 + $0x160] sm:$0xff]  ;;  %v4384_v50 = vld [vmem:[%s6929_s29 + $0x130] sm:$0xff]  ;;  %v4385_v40 = vld [vmem:[%s6929_s29 + $0x138] sm:$0xff] }
 0x178   : >> { %5119 = vmatpush3.msra.mxu0 %v1024_v20  ;;  %5498 = vmatpush3.msra.mxu1 %v1024_v20  ;;  %v4392_v3 = vld [vmem:[%s6929_s29 + $0x170] sm:$0xff]  ;;  %v4393_v48 = vld [vmem:[%s6929_s29 + $0x178] sm:$0xff]  ;;  %v1280_v16 = vfloor.f32 %v1264_v52  ;;  %v1288_v21 = vfloor.f32 %v1272_v54  ;;  %v1263_v20 = vmul.f32 0.0625, %v1247_v2 }
 0x179   : >> { %5120 = vmatprep.subr.mxu0 %v1023_v31  ;;  %5483 = vmatprep.subr.mxu1 %v1023_v31 }
 0x17a   : >> { %5121 = vmatpush3.msra.mxu0 %v1023_v31  ;;  %5499 = vmatpush3.msra.mxu1 %v1023_v31  ;;  %v1242_v31 = vcvt.s32.f32 %v6964_v61  ;;  %v1328_v60 = vmul.f32 2.0, %v1280_v16  ;;  %v7010_v8 = vmul.f32 2.0, %v1288_v21 }
 0x17b   : >> { %5122 = vmatprep.subr.mxu0 %v1022_v24  ;;  %5484 = vmatprep.subr.mxu1 %v1022_v24 }
 0x17c   : >> { %5123 = vmatpush3.msra.mxu0 %v1022_v24  ;;  %5500 = vmatpush3.msra.mxu1 %v1022_v24  ;;  %v1271_v24 = vmul.f32 0.0625, %v1255_v5  ;;  %vm1392_vm4 = vcmp.ge.f32.partialorder %v1328_v60, 1.0  ;;  %vm1408_vm8 = vcmp.le.f32.partialorder %v1328_v60, 16.0  ;;  %vm1400_vm7 = vcmp.ge.f32.partialorder %v7010_v8, 1.0 }
 0x17d   : >> { %5124 = vmatprep.subr.mxu0 %v1021_v30  ;;  %5485 = vmatprep.subr.mxu1 %v1021_v30  ;;  %vm1416_vm11 = vcmp.le.f32.partialorder %v7010_v8, 16.0  ;;  %vm7094_vm14 = vmand %vm1392_vm4, %vm1408_vm8 }
 0x17e   : >> { %5125 = vmatpush3.msra.mxu0 %v1021_v30  ;;  %5501 = vmatpush3.msra.mxu1 %v1021_v30  ;;  %v6970_v30 = vadd.s32 %v6948_v23, %v6271_v56  ;;  %vm7104_vm5 = vmand %vm1400_vm7, %vm1416_vm11 }
 0x17f   : >> { %5126 = vmatprep.subr.mxu0 %v1020_v26  ;;  %5486 = vmatprep.subr.mxu1 %v1020_v26 }
 0x180   : >> { %5127 = vmatpush3.msra.mxu0 %v1020_v26  ;;  %5502 = vmatpush3.msra.mxu1 %v1020_v26  ;;  %v1250_v26 = vadd.f32 0.5, %v1234_v14 }
 0x181   : >> { %5128 = vmatprep.subr.mxu0 %v1019_v10  ;;  %5487 = vmatprep.subr.mxu1 %v1019_v10 }
 0x182   : >> { %5129 = vmatpush3.msra.mxu0 %v1019_v10  ;;  %5503 = vmatpush3.msra.mxu1 %v1019_v10  ;;  %v6974_v10 = vadd.s32 %v6948_v23, %v6274_v57 }
 0x183   : >> { %5130 = vmatprep.subr.mxu0 %v1018_v28  ;;  %5488 = vmatprep.subr.mxu1 %v1018_v28 }
 0x184   : >> { %5131 = vmatpush3.msra.mxu0 %v1018_v28  ;;  %5504 = vmatpush3.msra.mxu1 %v1018_v28  ;;  %v1296_v28 = vmul.f32 16.0, %v1280_v16 }
 0x185   : >> { %5132 = vmatprep.subr.mxu0 %v1017_v7  ;;  %5489 = vmatprep.subr.mxu1 %v1017_v7 }
 0x186   : >> { %5133 = vmatpush3.msra.mxu0 %v1017_v7  ;;  %5505 = vmatpush3.msra.mxu1 %v1017_v7  ;;  %v1304_v7 = vmul.f32 16.0, %v1288_v21 }
 0x187   : >> { %5134 = vmatprep.subr.mxu0 %v1016_v59  ;;  %5490 = vmatprep.subr.mxu1 %v1016_v59 }
 0x188   : >> { %5135 = vmatpush3.msra.mxu0 %v1016_v59  ;;  %5506 = vmatpush3.msra.mxu1 %v1016_v59  ;;  %v1279_v59 = vfloor.f32 %v1263_v20 }
 0x189   : >> { %5136 = vmatprep.subr.mxu0 %v1015_v12  ;;  %5491 = vmatprep.subr.mxu1 %v1015_v12 }
 0x18a   : >> { %5137 = vmatpush3.msra.mxu0 %v1015_v12  ;;  %5507 = vmatpush3.msra.mxu1 %v1015_v12  ;;  %v1258_v12 = vadd.f32 0.5, %v1242_v31 }
 0x18b   : >> { %5138 = vmatprep.subr.mxu0 %v1014_v15  ;;  %5492 = vmatprep.subr.mxu1 %v1014_v15 }
 0x18c   : >> { %5139 = vmatpush3.msra.mxu0 %v1014_v15  ;;  %5508 = vmatpush3.msra.mxu1 %v1014_v15  ;;  %v1287_v15 = vfloor.f32 %v1271_v24 }
 0x18d   : >> { %5140 = vmatprep.subr.mxu0 %v1013_v1  ;;  %5493 = vmatprep.subr.mxu1 %v1013_v1 }
 0x18e   : >> { %5141 = vmatpush3.msra.mxu0 %v1013_v1  ;;  %5509 = vmatpush3.msra.mxu1 %v1013_v1  ;;  %v1233_v1 = vcvt.s32.f32 %v6970_v30 }
 0x18f   : >> { %5142 = vmatprep.mubr.f32.mxu0 %v4378_v53  ;;  %5154 = vmatprep.mubr.f32.mxu1 %v4386_v29  ;;  %v6979_v53 = vmul.f32 0.0625, %v1250_v26  ;;  %v1241_v29 = vcvt.s32.f32 %v6974_v10  ;;  %v7026_v26 = vmul.f32 2.0, %v1279_v59 }
 0x190   : >> { %5143 = vmatmul.mubr.f32.vlgmr.msra.gmra.mxu0 %v4379_v51  ;;  %5155 = vmatmul.mubr.f32.vlgmr.msra.gmra.mxu1 %v4387_v11  ;;  %v1312_v51 = vsub.f32 %v1232_v58, %v1296_v28  ;;  %v1320_v11 = vsub.f32 %v1240_v19, %v1304_v7  ;;  %v7001_v58 = vadd.s32 %v6948_v23, %v6307_v17  ;;  %v7031_v7 = vmul.f32 2.0, %v1287_v15 }
 0x191   : >> { %5145 = vmatprep.mubr.f32.mxu0 %v4380_v32  ;;  %5157 = vmatprep.mubr.f32.mxu1 %v4388_v36  ;;  %v1295_v32 = vmul.f32 16.0, %v1279_v59  ;;  %v6982_v36 = vmul.f32 0.0625, %v1258_v12  ;;  %v7005_v19 = vadd.s32 %v6948_v23, %v6310_v18  ;;  %v7039_v59 = vadd.s32 %v6948_v23, %v6351_v49 }
 0x192   : >> { %v1235_v21 = vcvt.s32.f32 %v7001_v58  ;;  %vm1391_vm10 = vcmp.ge.f32.partialorder %v7026_v26, 1.0  ;;  %vm1407_vm2 = vcmp.le.f32.partialorder %v7026_v26, 16.0  ;;  %vm1399_vm6 = vcmp.ge.f32.partialorder %v7031_v7, 1.0 }
 0x193   : >> { %v9535_v24 = vcvt.s32.f32 %v7005_v19  ;;  %vm1415_vm1 = vcmp.le.f32.partialorder %v7031_v7, 16.0  ;;  %v9788_v58 = vmov 0 }
 0x194   : >> { %5146 = vmatmul.mubr.f32.gmra.mxu0 %v4381_v41  ;;  %5158 = vmatmul.mubr.f32.gmra.mxu1 %v4389_v37  ;;  %v1303_v41 = vmul.f32 16.0, %v1287_v15  ;;  %v6986_v37 = vadd.s32 %v6948_v23, %v6289_v4  ;;  %v1251_v15 = vadd.f32 0.5, %v1235_v21 }
 0x195   : >> { %5148 = vmatprep.mubr.f32.mxu0 %v4382_v42  ;;  %5160 = vmatprep.mubr.f32.mxu1 %v4390_v55  ;;  %v1249_v42 = vadd.f32 0.5, %v1233_v1  ;;  %v6992_v55 = vadd.s32 %v6948_v23, %v6294_v6 }
 0x196   : >> { %v1319_v43 = vsub.f32 %v1239_v13, %v1303_v41  ;;  %v1236_v63 = vcvt.s32.f32 %v6986_v37  ;;  %v7016_v13 = vadd.s32 %v6948_v23, %v6319_v25 }
 0x197   : >> { %v7007_v0 = vmul.f32 0.0625, %v1249_v42  ;;  %v1244_v22 = vcvt.s32.f32 %v6992_v55 }
 0x198   : >> { %5149 = vmatmul.mubr.f32.gmra.mxu0 %v4383_v38  ;;  %5161 = vmatmul.mubr.f32.gmra.mxu1 %v4391_v47  ;;  %v1282_v38 = vfloor.f32 %v6979_v53  ;;  %v1257_v47 = vadd.f32 0.5, %v1241_v29  ;;  %v1367_v16 = vmul.f32 2.0, %v1319_v43  ;;  %v1252_v20 = vadd.f32 0.5, %v1236_v63 }
 0x199   : >> { %5151 = vmatprep.mubr.f32.mxu0 %v4384_v50  ;;  %5163 = vmatprep.mubr.f32.mxu1 %v4392_v3  ;;  %v1360_v50 = vmul.f32 2.0, %v1312_v51  ;;  %v1368_v3 = vmul.f32 2.0, %v1320_v11  ;;  %v1260_v28 = vadd.f32 0.5, %v1244_v22  ;;  %v9534_v53 = vcvt.s32.f32 %v7016_v13 }
 0x19a   : >> { %v7012_v44 = vmul.f32 0.0625, %v1257_v47  ;;  %v1281_v51 = vfloor.f32 %v7007_v0  ;;  %v7052_v41 = vadd.f32 1.0, %v1367_v16  ;;  %v7058_v47 = vadd.s32 %v6948_v23, %v6362_v62 }
 0x19b   : >> { %v7018_v52 = vadd.f32 1.0, %v1360_v50  ;;  %v7020_v54 = vadd.f32 1.0, %v1368_v3  ;;  %v7054_v42 = vmul.f32 0.0625, %v1260_v28  ;;  %v1254_v3 = vadd.f32 0.5, %v9534_v53 }
 0x19c   : >> { %5152 = vmatmul.mubr.f32.gmra.mxu0 %v4385_v40  ;;  %5164 = vmatmul.mubr.f32.gmra.mxu1 %v4393_v48  ;;  %v1311_v40 = vsub.f32 %v1231_v27, %v1295_v32  ;;  %v1290_v48 = vfloor.f32 %v6982_v36  ;;  %v1298_v27 = vmul.f32 16.0, %v1282_v38  ;;  %v1289_v11 = vfloor.f32 %v7012_v44 }
 0x19d   : >> { %v7043_v36 = vmul.f32 0.0625, %v1252_v20  ;;  %vm1440_vm9 = vcmp.ge.f32.partialorder %v7018_v52, 1.0  ;;  %vm1448_vm3 = vcmp.ge.f32.partialorder %v7020_v54, 1.0  ;;  %v1246_v0 = vcvt.s32.f32 %v7039_v59 }
 0x19e   : >> { %v1359_v2 = vmul.f32 2.0, %v1311_v40  ;;  %v1306_v5 = vmul.f32 16.0, %v1290_v48  ;;  %v1314_v12 = vsub.f32 %v1234_v14, %v1298_v27  ;;  %v1259_v14 = vadd.f32 0.5, %v9535_v24  ;;  %vm7119_vm8 = vmand %vm7094_vm14, %vm1440_vm9 }
 0x19f   : >> { %v1297_v40 = vmul.f32 16.0, %v1281_v51  ;;  %v1305_v43 = vmul.f32 16.0, %v1289_v11  ;;  %v7067_v27 = vadd.s32 %v6948_v23, %v6375_v9  ;;  %v1330_v44 = vmul.f32 2.0, %v1282_v38  ;;  %vm7128_vm11 = vmand %vm7104_vm5, %vm1448_vm3 }
 0x1a0   : >> { %v7041_v32 = vadd.f32 1.0, %v1359_v2  ;;  %v1362_v50 = vmul.f32 2.0, %v1314_v12  ;;  %v1284_v2 = vfloor.f32 %v7043_v36  ;;  %v7071_v16 = vmul.f32 0.0625, %v1251_v15  ;;  %vm7137_vm9 = vmand %vm1391_vm10, %vm1407_vm2 }
 0x1a1   : >> { %v7073_v20 = vmul.f32 0.0625, %v1259_v14  ;;  %v1322_v28 = vsub.f32 %v1242_v31, %v1306_v5  ;;  %v1292_v12 = vfloor.f32 %v7054_v42  ;;  %v1237_v53 = vcvt.s32.f32 %v7058_v47  ;;  %vm7149_vm3 = vmand %vm1399_vm6, %vm1415_vm1 }
 0x1a2   : >> { %vm1439_vm12 = vcmp.ge.f32.partialorder %v7041_v32, 1.0  ;;  %vm1447_vm0 = vcmp.ge.f32.partialorder %v7052_v41, 1.0  ;;  %v7081_v23 = vadd.f32 1.0, %v1362_v50  ;;  %v1338_v38 = vmul.f32 2.0, %v1290_v48 }
 0x1a3   : >> { %v7083_v24 = vmul.f32 0.0625, %v1254_v3  ;;  %v1313_v36 = vsub.f32 %v1233_v1, %v1297_v40  ;;  %v1321_v15 = vsub.f32 %v1241_v29, %v1305_v43  ;;  %v1262_v61 = vadd.f32 0.5, %v1246_v0  ;;  %vm7174_vm14 = vmand %vm7137_vm9, %vm1439_vm12 }
 0x1a4   : >> { %v9536_v31 = vcvt.s32.f32 %v7067_v27  ;;  %vm1394_vm15 = vcmp.ge.f32.partialorder %v1330_v44, 1.0  ;;  %v1300_v48 = vmul.f32 16.0, %v1284_v2  ;;  %v1283_v14 = vfloor.f32 %v7071_v16 }
 0x1a5   : >> { %v1291_v30 = vfloor.f32 %v7073_v20  ;;  %vm1410_vm13 = vcmp.le.f32.partialorder %v1330_v44, 16.0  ;;  %v1370_v1 = vmul.f32 2.0, %v1322_v28  ;;  %v1308_v29 = vmul.f32 16.0, %v1292_v12 }
 0x1a6   : >> { %v1253_v60 = vadd.f32 0.5, %v1237_v53  ;;  %v1329_v42 = vmul.f32 2.0, %v1281_v51  ;;  %v1337_v50 = vmul.f32 2.0, %v1289_v11  ;;  %v1286_v3 = vfloor.f32 %v7083_v24  ;;  %vm7164_vm4 = vmand %vm1394_vm15, %vm1410_vm13 }
 0x1a7   : >> { %v1361_v40 = vmul.f32 2.0, %v1313_v36  ;;  %v1369_v43 = vmul.f32 2.0, %v1321_v15  ;;  %v7111_v16 = vmul.f32 0.0625, %v1262_v61  ;;  %v1261_v8 = vadd.f32 0.5, %v9536_v31  ;;  %vm7189_vm15 = vmand %vm7149_vm3, %vm1447_vm0 }
 0x1a8   : >> { %v1316_v36 = vsub.f32 %v1236_v63, %v1300_v48  ;;  %v1299_v15 = vmul.f32 16.0, %v1283_v14  ;;  %v1307_v61 = vmul.f32 16.0, %v1291_v30  ;;  %vm1442_vm10 = vcmp.ge.f32.partialorder %v7081_v23, 1.0 }
 0x1a9   : >> { %v7154_v26 = vadd.f32 1.0, %v1370_v1  ;;  %v1324_v37 = vsub.f32 %v1244_v22, %v1308_v29  ;;  %v7158_v63 = vmul.f32 0.0625, %v1253_v60  ;;  %vm1393_vm6 = vcmp.ge.f32.partialorder %v1329_v42, 1.0  ;;  %vm7201_vm12 = vmand %vm7164_vm4, %vm1442_vm10  ;;  %v7328_v29 = vld [vmem:[%s9519_s2] ss:$0 sm:$0xff] }
 0x1aa   : >> { %vm1409_vm1 = vcmp.le.f32.partialorder %v1329_v42, 16.0  ;;  %vm1401_vm7 = vcmp.ge.f32.partialorder %v1337_v50, 1.0  ;;  %v1302_v48 = vmul.f32 16.0, %v1286_v3  ;;  %v7178_v22 = vadd.f32 1.0, %v1361_v40 }
 0x1ab   : >> { %v7180_v44 = vadd.f32 1.0, %v1369_v43  ;;  %v1294_v10 = vfloor.f32 %v7111_v16  ;;  %v7183_v1 = vmul.f32 0.0625, %v1261_v8  ;;  %v1332_v60 = vmul.f32 2.0, %v1284_v2  ;;  %vm7219_vm10 = vmand %vm1393_vm6, %vm1409_vm1 }
 0x1ac   : >> { %v1364_v11 = vmul.f32 2.0, %v1316_v36  ;;  %v1315_v40 = vsub.f32 %v1235_v21, %v1299_v15  ;;  %v9731_v43 = vcvt.s32.f32 %v7005_v19  ;;  %vm1417_vm13 = vcmp.le.f32.partialorder %v1337_v50, 16.0 }
 0x1ad   : >> { %v1340_v8 = vmul.f32 2.0, %v1292_v12  ;;  %v1372_v2 = vmul.f32 2.0, %v1324_v37  ;;  %v1285_v36 = vfloor.f32 %v7158_v63  ;;  %vm9734_vm9 = vcmp.le.f32.partialorder %v1338_v38, 16.0 }
 0x1ae   : >> { %v1323_v31 = vsub.f32 %v9731_v43, %v1307_v61  ;;  %vm9735_vm3 = vcmp.ge.f32.partialorder %v1338_v38, 1.0  ;;  %vm1450_vm2 = vcmp.ge.f32.partialorder %v7154_v26, 1.0  ;;  %v1331_v19 = vmul.f32 2.0, %v1283_v14 }
 0x1af   : >> { %vm7209_vm5 = vmand %vm9735_vm3, %vm9734_vm9  ;;  %v9738_v21 = vcvt.s32.f32 %v7016_v13  ;;  %vm1441_vm0 = vcmp.ge.f32.partialorder %v7178_v22, 1.0  ;;  %v1310_v38 = vmul.f32 16.0, %v1294_v10  ;;  %v1293_v61 = vfloor.f32 %v7183_v1 }
 0x1b0   : >> { %vm7227_vm3 = vmand %vm1401_vm7, %vm1417_vm13  ;;  %v7231_v13 = vadd.f32 1.0, %v1364_v11  ;;  %v1363_v14 = vmul.f32 2.0, %v1315_v40  ;;  %v1371_v42 = vmul.f32 2.0, %v1323_v31  ;;  %vm1412_vm1 = vcmp.le.f32.partialorder %v1332_v60, 16.0 }
 0x1b1   : >> { %v1318_v15 = vsub.f32 %v9738_v21, %v1302_v48  ;;  %vm7235_vm6 = vmand %vm7209_vm5, %vm1450_vm2  ;;  %v1388_v7 = vadd.f32 1.0, %v1372_v2  ;;  %v1301_v50 = vmul.f32 16.0, %v1285_v36  ;;  %vm1420_vm13 = vcmp.le.f32.partialorder %v1340_v8, 16.0 }
 0x1b2   : >> { %vm7243_vm7 = vmand %vm7219_vm10, %vm1441_vm0  ;;  %v1339_v31 = vmul.f32 2.0, %v1291_v30  ;;  %vm9747_vm2 = vcmp.le.f32.partialorder %v7018_v52, 16.0  ;;  %v9748_v11 = vmov 0  ;;  %vm9750_vm9 = vcmp.le.f32.partialorder %v7020_v54, 16.0 }
 0x1b3   : >> { %v1366_v1 = vmul.f32 2.0, %v1318_v15  ;;  %vm7253_vm5 = vmand %vm7119_vm8, %vm9747_vm2  ;;  %v9751_v40 = vmov 0  ;;  %vm9753_vm10 = vcmp.ge.f32.partialorder %v7180_v44, 1.0  ;;  %v1334_v20 = vmul.f32 2.0, %v1286_v3 }
 0x1b4   : >> { %v9749_v11 = vsel %vm7253_vm5, 4294967295, %v9748_v11  ;;  %vm7261_vm0 = vmand %vm7128_vm11, %vm9750_vm9  ;;  %v1326_v54 = vsub.f32 %v1246_v0, %v1310_v38  ;;  %v1309_v30 = vmul.f32 16.0, %v1293_v61  ;;  %vm9756_vm9 = vcmp.ge.f32.partialorder %v1332_v60, 1.0 }
 0x1b5   : >> { %v9752_v40 = vsel %vm7261_vm0, 4294967295, %v9751_v40  ;;  %vm7269_vm4 = vmand %vm7227_vm3, %vm9753_vm10  ;;  %v7285_v51 = vadd.f32 1.0, %v1363_v14  ;;  %v7287_v43 = vadd.f32 1.0, %v1371_v42  ;;  %vm9759_vm10 = vcmp.le.f32.partialorder %v7041_v32, 16.0 }
 0x1b6   : >> { %vm7280_vm2 = vmand %vm9756_vm9, %vm1412_vm1  ;;  %v9760_v24 = vmov 0  ;;  %vm9762_vm11 = vcmp.le.f32.partialorder %v7052_v41, 16.0  ;;  %vm9765_vm0 = vcmp.ge.f32.partialorder %v1340_v8, 1.0  ;;  %v1317_v41 = vsub.f32 %v1237_v53, %v1301_v50 }
 0x1b7   : >> { %vm7293_vm8 = vmand %vm7174_vm14, %vm9759_vm10  ;;  %vm1452_vm14 = vcmp.ge.f32.partialorder %v1388_v7, 1.0  ;;  %vm9768_vm10 = vcmp.le.f32.partialorder %v1331_v19, 16.0  ;;  %v7321_v3 = vadd.f32 1.0, %v1366_v1  ;;  %v7323_v55 = vmul.f32 2.0, %v1294_v10 }
 0x1b8   : >> { %v9761_v24 = vsel %vm7293_vm8, 4294967295, %v9760_v24  ;;  %vm7301_vm1 = vmand %vm7189_vm15, %vm9762_vm11  ;;  %vm9769_vm8 = vcmp.ge.f32.partialorder %v1331_v19, 1.0  ;;  %v1374_v47 = vmul.f32 2.0, %v1326_v54  ;;  %v9775_v60 = vcvt.s32.f32 %v7067_v27 }
 0x1b9   : >> { %vm7309_vm5 = vmand %vm9765_vm0, %vm1420_vm13  ;;  %vm9772_vm13 = vcmp.ge.f32.partialorder %v7231_v13, 1.0  ;;  %vm9776_vm3 = vcmp.le.f32.partialorder %v7081_v23, 16.0  ;;  %vm9779_vm9 = vcmp.le.f32.partialorder %v7154_v26, 16.0  ;;  %v1365_v21 = vmul.f32 2.0, %v1317_v41 }
 0x1ba   : >> { %vm7317_vm15 = vmand %vm9769_vm8, %vm9768_vm10  ;;  %v1325_v10 = vsub.f32 %v9775_v60, %v1309_v30  ;;  %vm9791_vm10 = vcmp.ge.f32.partialorder %v1339_v31, 1.0  ;;  %v7391_v15 = vmul.f32 2.0, %v1293_v61  ;;  %v9802_v61 = vmov 0 }
 0x1bb   : >> { %vm7334_vm0 = vmand %vm7280_vm2, %vm9772_vm13  ;;  %v7448_v54 = vadd.f32 1.0, %v1365_v21 }
 0x1bc   : >> { %vm7344_vm11 = vmand %vm7201_vm12, %vm9776_vm3  ;;  %vm9790_vm3 = vcmp.le.f32.partialorder %v1339_v31, 16.0  ;;  %v1373_v42 = vmul.f32 2.0, %v1325_v10 }
 0x1bd   : >> { %vm7352_vm2 = vmand %vm7235_vm6, %vm9779_vm9  ;;  %vm9784_vm6 = vcmp.le.f32.partialorder %v7178_v22, 16.0  ;;  %v1333_v22 = vmul.f32 2.0, %v1285_v36 }
 0x1be   : >> { %vm7359_vm13 = vmand %vm7309_vm5, %vm1452_vm14  ;;  %vm9787_vm5 = vcmp.le.f32.partialorder %v7180_v44, 16.0  ;;  %v7478_v60 = vadd.f32 1.0, %v1373_v42 }
 0x1bf   : >> { %vm7370_vm9 = vmand %vm7243_vm7, %vm9784_vm6  ;;  %vm9795_vm7 = vcmp.ge.f32.partialorder %v1334_v20, 1.0 }
 0x1c0   : >> { %vm7378_vm14 = vmand %vm7269_vm4, %vm9787_vm5  ;;  %vm9794_vm4 = vcmp.le.f32.partialorder %v1334_v20, 16.0  ;;  %vm9798_vm5 = vcmp.le.f32.partialorder %v7231_v13, 16.0  ;;  %v7427_v13 = vadd.f32 1.0, %v1374_v47 }
 0x1c1   : >> { %v9789_v58 = vsel %vm7378_vm14, 4294967295, %v9788_v58  ;;  %vm7384_vm12 = vmand %vm9791_vm10, %vm9790_vm3  ;;  %vm1446_vm10 = vcmp.ge.f32.partialorder %v7321_v3, 1.0  ;;  %vm9801_vm14 = vcmp.le.f32.partialorder %v1388_v7, 16.0 }
 0x1c2   : >> { %vm7397_vm6 = vmand %vm9795_vm7, %vm9794_vm4  ;;  %vm9804_vm7 = vcmp.ge.f32.partialorder %v7285_v51, 1.0 }
 0x1c3   : >> { %vm7407_vm8 = vmand %vm7334_vm0, %vm9798_vm5  ;;  %vm1413_vm5 = vcmp.le.f32.partialorder %v1333_v22, 16.0 }
 0x1c4   : >> { %vm7414_vm4 = vmand %vm7359_vm13, %vm9801_vm14  ;;  %vm9807_vm13 = vcmp.ge.f32.partialorder %v7287_v43, 1.0 }
 0x1c5   : >> { %v9803_v61 = vsel %vm7414_vm4, 4294967295, %v9802_v61  ;;  %vm7422_vm3 = vmand %vm7317_vm15, %vm9804_vm7  ;;  %vm1397_vm7 = vcmp.ge.f32.partialorder %v1333_v22, 1.0  ;;  %vm9814_vm4 = vcmp.le.f32.partialorder %v7285_v51, 16.0 }
 0x1c6   : >> { %vm7436_vm15 = vmand %vm7384_vm12, %vm9807_vm13  ;;  %vm9812_vm12 = vnez %v9749_v11  ;;  %vm9813_vm13 = vnez %v9752_v40 }
 0x1c7   : >> { %vm7444_vm14 = vmand %vm7397_vm6, %vm1446_vm10  ;;  %vm9817_vm10 = vcmp.le.f32.partialorder %v7287_v43, 16.0 }
 0x1c8   : >> { %vm7459_vm6 = vmand %vm7422_vm3, %vm9814_vm4  ;;  %vm1421_vm4 = vcmp.le.f32.partialorder %v7391_v15, 16.0 }
 0x1c9   : >> { %vm7474_vm3 = vmand %vm7436_vm15, %vm9817_vm10  ;;  %vm9825_vm10 = vcmp.ge.f32.partialorder %v7323_v55, 1.0 }
 0x1ca   : >> { %vm7511_vm0 = vmand %vm1397_vm7, %vm1413_vm5  ;;  %vm1453_vm5 = vcmp.ge.f32.partialorder %v7478_v60, 1.0 }
 0x250   : >> { %v5144_v23 = vpop.f32.mrf.mxu0  ;;  %v5156_v26 = vpop.f32.mrf.mxu1 }
 0x251   : >> { %v1108_v44 = vadd.f32 %v5144_v23, %v7328_v29  ;;  %v1148_v12 = vadd.f32 %v5156_v26, %v7328_v29 }
 0x252   : >> { %v1102_v5 = vpop.f32.mrf.mxu0  ;;  %v1142_v63 = vpop.f32.mrf.mxu1 }
 0x253   : >> { %v1182_v37 = vmax.f32 %v1108_v44, 0.0  ;;  %v1190_v7 = vmax.f32 %v1148_v12, 0.0  ;;  %v1103_v50 = vadd.f32 %v7328_v29, %v1102_v5  ;;  %v1143_v48 = vadd.f32 %v7328_v29, %v1142_v63 }
 0x254   : >> { %v5147_v1 = vpop.f32.mrf.mxu0  ;;  %v5159_v52 = vpop.f32.mrf.mxu1 }
 0x255   : >> { %v1536_v30 = vsel %vm9812_vm12, %v1182_v37, 0.0  ;;  %v1544_v28 = vsel %vm9813_vm13, %v1190_v7, 0.0  ;;  %v1181_v32 = vmax.f32 %v1103_v50, 0.0  ;;  %v1189_v41 = vmax.f32 %v1143_v48, 0.0 }
 0x256   : >> { %4397 = vst [vmem:[%s7464_s17 + $0x108] sm:$0xff] %v1536_v30  ;;  %4405 = vst [vmem:[%s7464_s17 + $0x148] sm:$0xff] %v1544_v28  ;;  %v1118_v11 = vadd.f32 %v5147_v1, %v7328_v29  ;;  %v1158_v40 = vadd.f32 %v5159_v52, %v7328_v29  ;;  %v1112_v53 = vpop.f32.mrf.mxu0  ;;  %v1152_v51 = vpop.f32.mrf.mxu1  ;;  %vm9820_vm12 = vnez %v9761_v24  ;;  %vm9821_vm13 = vcmp.le.f32.partialorder %v7321_v3, 16.0 }
 0x257   : >> { %v1535_v10 = vsel %vm9820_vm12, %v1181_v32, 0.0  ;;  %v1543_v27 = vsel %vm7301_vm1, %v1189_v41, 0.0  ;;  %v1113_v23 = vadd.f32 %v7328_v29, %v1112_v53  ;;  %v1153_v43 = vadd.f32 %v7328_v29, %v1152_v51  ;;  %vm7491_vm15 = vmand %vm7444_vm14, %vm9821_vm13 }
 0x258   : >> { %4396 = vst [vmem:[%s7464_s17 + $0x100] sm:$0xff] %v1535_v10  ;;  %4404 = vst [vmem:[%s7464_s17 + $0x140] sm:$0xff] %v1543_v27  ;;  %v1184_v19 = vmax.f32 %v1118_v11, 0.0  ;;  %v1192_v24 = vmax.f32 %v1158_v40, 0.0  ;;  %v5150_v21 = vpop.f32.mrf.mxu0  ;;  %v5162_v44 = vpop.f32.mrf.mxu1  ;;  %vm9824_vm1 = vcmp.le.f32.partialorder %v7323_v55, 16.0  ;;  %vm1454_vm14 = vcmp.ge.f32.partialorder %v7427_v13, 1.0 }
 0x259   : >> { %vm7501_vm12 = vmand %vm9825_vm10, %vm9824_vm1  ;;  %v1183_v3 = vmax.f32 %v1113_v23, 0.0  ;;  %v1191_v12 = vmax.f32 %v1153_v43, 0.0  ;;  %v1128_v38 = vadd.f32 %v5150_v21, %v7328_v29  ;;  %v1168_v5 = vadd.f32 %v5162_v44, %v7328_v29 }
 0x25a   : >> { %v1538_v63 = vsel %vm7344_vm11, %v1184_v19, 0.0  ;;  %v1546_v14 = vsel %vm7352_vm2, %v1192_v24, 0.0  ;;  %v1122_v42 = vpop.f32.mrf.mxu0  ;;  %v1162_v37 = vpop.f32.mrf.mxu1  ;;  %vm1486_vm1 = vcmp.le.f32.partialorder %v7427_v13, 16.0  ;;  %vm9830_vm10 = vcmp.ge.f32.partialorder %v7391_v15, 1.0  ;;  %vm7539_vm2 = vmand %vm7501_vm12, %vm1454_vm14 }
 0x25b   : >> { %vm7524_vm13 = vmand %vm9830_vm10, %vm1421_vm4  ;;  %4399 = vst [vmem:[%s7464_s17 + $0x118] sm:$0xff] %v1538_v63  ;;  %v1537_v8 = vsel %vm7370_vm9, %v1183_v3, 0.0  ;;  %vm9833_vm11 = vnez %v9789_v58  ;;  %v1186_v7 = vmax.f32 %v1128_v38, 0.0  ;;  %v1194_v50 = vmax.f32 %v1168_v5, 0.0 }
 0x25c   : >> { %4407 = vst [vmem:[%s7464_s17 + $0x158] sm:$0xff] %v1546_v14  ;;  %v1545_v2 = vsel %vm9833_vm11, %v1191_v12, 0.0  ;;  %4398 = vst [vmem:[%s7464_s17 + $0x110] sm:$0xff] %v1537_v8  ;;  %v1123_v16 = vadd.f32 %v7328_v29, %v1122_v42  ;;  %v1163_v48 = vadd.f32 %v7328_v29, %v1162_v37  ;;  %v5153_v58 = vpop.f32.mrf.mxu0  ;;  %v5165_v31 = vpop.f32.mrf.mxu1  ;;  %vm9836_vm9 = vcmp.ge.f32.partialorder %v7448_v54, 1.0 }
 0x25d   : >> { %4406 = vst [vmem:[%s7464_s17 + $0x150] sm:$0xff] %v1545_v2  ;;  %vm7551_vm7 = vmand %vm7511_vm0, %vm9836_vm9  ;;  %vm1477_vm4 = vcmp.le.f32.partialorder %v7448_v54, 16.0  ;;  %vm1485_vm12 = vcmp.le.f32.partialorder %v7478_v60, 16.0  ;;  %v1540_v52 = vsel %vm7407_vm8, %v1186_v7, 0.0  ;;  %vm9839_vm14 = vnez %v9803_v61 }
 0x25e   : >> { %v1548_v20 = vsel %vm9839_vm14, %v1194_v50, 0.0  ;;  %v1138_v30 = vadd.f32 %v5153_v58, %v7328_v29  ;;  %v1178_v28 = vadd.f32 %v5165_v31, %v7328_v29  ;;  %vm7567_vm0 = vmand %vm7524_vm13, %vm1453_vm5  ;;  %4401 = vst [vmem:[%s7464_s17 + $0x128] sm:$0xff] %v1540_v52  ;;  %v1185_v36 = vmax.f32 %v1123_v16, 0.0  ;;  %v1132_v61 = vpop.f32.mrf.mxu0  ;;  %v1172_v11 = vpop.f32.mrf.mxu1 }
 0x25f   : >> { %4409 = vst [vmem:[%s7464_s17 + $0x168] sm:$0xff] %v1548_v20  ;;  %v1193_v41 = vmax.f32 %v1163_v48, 0.0  ;;  %vm1502_vm8 = vmand %vm7539_vm2, %vm1486_vm1  ;;  %v1133_v51 = vadd.f32 %v7328_v29, %v1132_v61  ;;  %v1173_v13 = vadd.f32 %v7328_v29, %v1172_v11 }
 0x260   : >> { %v1188_v40 = vmax.f32 %v1138_v30, 0.0  ;;  %v1196_v53 = vmax.f32 %v1178_v28, 0.0  ;;  %vm1493_vm13 = vmand %vm7551_vm7, %vm1477_vm4  ;;  %v1539_v10 = vsel %vm7459_vm6, %v1185_v36, 0.0  ;;  %992 = sbr.rel (!%p990_p12) target bundleno = 366 (0x16e), region = 173 }
 0x261   : >> { %v1547_v27 = vsel %vm7474_vm3, %v1193_v41, 0.0  ;;  %vm1501_vm1 = vmand %vm7567_vm0, %vm1485_vm12  ;;  %4400 = vst [vmem:[%s7464_s17 + $0x120] sm:$0xff] %v1539_v10  ;;  %v1187_v43 = vmax.f32 %v1133_v51, 0.0  ;;  %v1195_v19 = vmax.f32 %v1173_v13, 0.0 }
 0x262   : >> { %4408 = vst [vmem:[%s7464_s17 + $0x160] sm:$0xff] %v1547_v27  ;;  %v1542_v54 = vsel %vm7491_vm15, %v1188_v40, 0.0  ;;  %v1550_v23 = vsel %vm1502_vm8, %v1196_v53, 0.0 }
 0x263   : >> { %4403 = vst [vmem:[%s7464_s17 + $0x138] sm:$0xff] %v1542_v54  ;;  %4411 = vst [vmem:[%s7464_s17 + $0x178] sm:$0xff] %v1550_v23  ;;  %v1541_v29 = vsel %vm1493_vm13, %v1187_v43, 0.0  ;;  %v1549_v0 = vsel %vm1501_vm1, %v1195_v19, 0.0 }
 0x264   : >> { %4402 = vst [vmem:[%s7464_s17 + $0x130] sm:$0xff] %v1541_v29  ;;  %4410 = vst [vmem:[%s7464_s17 + $0x170] sm:$0xff] %v1549_v0 }
 0x265 LB: >> { %v1608_v47 = vld [vmem:[#allocation6 + $0x78] sm:$0xff]  ;;  %v1607_v60 = vld [vmem:[#allocation6 + $0x70] sm:$0xff]  ;;  %v1606_v26 = vld [vmem:[#allocation6 + $0x68] sm:$0xff]  ;;  %s7608_s15 = sshll.u32 %s5961_s27, 7  ;;  %s1573_s27 = sadd.s32 1, %s5961_s27   ;;  %s5961_s27 = sphi %s7602_s27, %s1573_s27  }
 0x266   : >> { %5166 = vmatprep.subr.mxu0 %v1608_v47  ;;  %5510 = vmatprep.subr.mxu1 %v1608_v47  ;;  %v1605_v24 = vld [vmem:[#allocation6 + $0x60] sm:$0xff]  ;;  %v1604_v21 = vld [vmem:[#allocation6 + $0x58] sm:$0xff]  ;;  %v1603_v44 = vld [vmem:[#allocation6 + $0x50] sm:$0xff]  ;;  %s7612_s14 = scalar_lea.vmem %s6189_s24, %s7608_s15 [#allocation3]  ;;  %v7631_v36 = vstv %s7608_s15  ;;  %s8127_s25 = scalar_lea.vmem [#allocation2], %s7608_s15 }
 0x267   : >> { %5167 = vmatpush3.msra.mxu0 %v1608_v47  ;;  %5526 = vmatpush3.msra.mxu1 %v1608_v47  ;;  %v1602_v59 = vld [vmem:[#allocation6 + $0x48] sm:$0xff]  ;;  %v1601_v3 = vld [vmem:[#allocation6 + $0x40] sm:$0xff]  ;;  %v1600_v12 = vld [vmem:[#allocation6 + $0x38] sm:$0xff]  ;;  %v1796_v41 = vadd.s32 %v7631_v36, %v6237_v34  ;;  %v1804_v61 = vadd.s32 %v7631_v36, %v6240_v35  ;;  %v1795_v11 = vadd.s32 %v7631_v36, %v6234_v33  ;;  %p1570_p7 = scmp.ge.s32.totalorder %s1573_s27, 2  }
 0x268   : >> { %5168 = vmatprep.subr.mxu0 %v1607_v60  ;;  %5511 = vmatprep.subr.mxu1 %v1607_v60  ;;  %v1599_v38 = vld [vmem:[#allocation6 + $0x30] sm:$0xff]  ;;  %v1598_v5 = vld [vmem:[#allocation6 + $0x28] sm:$0xff]  ;;  %v1597_v55 = vld [vmem:[#allocation6 + $0x20] sm:$0xff]  ;;  %v1803_v40 = vadd.s32 %v7631_v36, %v6250_v39  ;;  %v7643_v27 = vadd.s32 %v7631_v36, %v6257_v45  ;;  %v7648_v0 = vadd.s32 %v7631_v36, %v6260_v46  ;;  %s8260_s28 = smov (%p1570_p7), 0  }
 0x269   : >> { %5169 = vmatpush3.msra.mxu0 %v1607_v60  ;;  %5527 = vmatpush3.msra.mxu1 %v1607_v60  ;;  %v1596_v63 = vld [vmem:[#allocation6 + $0x18] sm:$0xff]  ;;  %v1595_v14 = vld [vmem:[#allocation6 + $0x10] sm:$0xff]  ;;  %v1594_v42 = vld [vmem:[#allocation6 + $0x8] sm:$0xff]  ;;  %v1812_v53 = vcvt.s32.f32 %v1796_v41  ;;  %v1820_v51 = vcvt.s32.f32 %v1804_v61  ;;  %v1811_v13 = vcvt.s32.f32 %v1795_v11 }
 0x26a   : >> { %5170 = vmatprep.subr.mxu0 %v1606_v26  ;;  %5512 = vmatprep.subr.mxu1 %v1606_v26  ;;  %v1593_v37 = vld [vmem:[#allocation6] sm:$0xff]  ;;  %v4415_v2 = vld [vmem:[%s7612_s14 + $0x208] sm:$0xff]  ;;  %v4416_v50 = vld [vmem:[%s7612_s14 + $0x210] sm:$0xff]  ;;  %v1819_v10 = vcvt.s32.f32 %v1803_v40  ;;  %v1814_v29 = vcvt.s32.f32 %v7643_v27 }
 0x26b   : >> { %5171 = vmatpush3.msra.mxu0 %v1606_v26  ;;  %5528 = vmatpush3.msra.mxu1 %v1606_v26  ;;  %v4414_v22 = vld [vmem:[%s7612_s14 + $0x200] sm:$0xff]  ;;  %v4423_v7 = vld [vmem:[%s7612_s14 + $0x248] sm:$0xff]  ;;  %v4424_v15 = vld [vmem:[%s7612_s14 + $0x250] sm:$0xff]  ;;  %v1828_v54 = vadd.f32 0.5, %v1812_v53  ;;  %v1836_v23 = vadd.f32 0.5, %v1820_v51  ;;  %v1827_v43 = vadd.f32 0.5, %v1811_v13 }
 0x26c   : >> { %5172 = vmatprep.subr.mxu0 %v1605_v24  ;;  %5513 = vmatprep.subr.mxu1 %v1605_v24  ;;  %v4422_v8 = vld [vmem:[%s7612_s14 + $0x240] sm:$0xff]  ;;  %v4417_v16 = vld [vmem:[%s7612_s14 + $0x218] sm:$0xff]  ;;  %v4419_v1 = vld [vmem:[%s7612_s14 + $0x228] sm:$0xff]  ;;  %v1835_v19 = vadd.f32 0.5, %v1819_v10 }
 0x26d   : >> { %5173 = vmatpush3.msra.mxu0 %v1605_v24  ;;  %5529 = vmatpush3.msra.mxu1 %v1605_v24  ;;  %v4425_v48 = vld [vmem:[%s7612_s14 + $0x258] sm:$0xff]  ;;  %v4418_v58 = vld [vmem:[%s7612_s14 + $0x220] sm:$0xff]  ;;  %v4427_v52 = vld [vmem:[%s7612_s14 + $0x268] sm:$0xff]  ;;  %v1844_v47 = vmul.f32 0.0625, %v1828_v54  ;;  %v1852_v60 = vmul.f32 0.0625, %v1836_v23  ;;  %v1843_v26 = vmul.f32 0.0625, %v1827_v43 }
 0x26e   : >> { %5174 = vmatprep.subr.mxu0 %v1604_v21  ;;  %5514 = vmatprep.subr.mxu1 %v1604_v21  ;;  %v4426_v31 = vld [vmem:[%s7612_s14 + $0x260] sm:$0xff]  ;;  %v4420_v20 = vld [vmem:[%s7612_s14 + $0x230] sm:$0xff]  ;;  %v4421_v28 = vld [vmem:[%s7612_s14 + $0x238] sm:$0xff]  ;;  %v1851_v24 = vmul.f32 0.0625, %v1835_v19 }
 0x26f   : >> { %5175 = vmatpush3.msra.mxu0 %v1604_v21  ;;  %5530 = vmatpush3.msra.mxu1 %v1604_v21  ;;  %v4428_v30 = vld [vmem:[%s7612_s14 + $0x270] sm:$0xff]  ;;  %v4429_v32 = vld [vmem:[%s7612_s14 + $0x278] sm:$0xff]  ;;  %v1830_v21 = vadd.f32 0.5, %v1814_v29 }
 0x270   : >> { %5176 = vmatprep.subr.mxu0 %v1603_v44  ;;  %5515 = vmatprep.subr.mxu1 %v1603_v44 }
 0x271   : >> { %5177 = vmatpush3.msra.mxu0 %v1603_v44  ;;  %5531 = vmatpush3.msra.mxu1 %v1603_v44  ;;  %v1822_v44 = vcvt.s32.f32 %v7648_v0  ;;  %v7746_v0 = vadd.s32 %v7631_v36, %v6375_v9 }
 0x272   : >> { %5178 = vmatprep.subr.mxu0 %v1602_v59  ;;  %5516 = vmatprep.subr.mxu1 %v1602_v59 }
 0x273   : >> { %5179 = vmatpush3.msra.mxu0 %v1602_v59  ;;  %5532 = vmatpush3.msra.mxu1 %v1602_v59  ;;  %v7653_v59 = vadd.s32 %v7631_v36, %v6271_v56 }
 0x274   : >> { %5180 = vmatprep.subr.mxu0 %v1601_v3  ;;  %5517 = vmatprep.subr.mxu1 %v1601_v3 }
 0x275   : >> { %5181 = vmatpush3.msra.mxu0 %v1601_v3  ;;  %5533 = vmatpush3.msra.mxu1 %v1601_v3  ;;  %v1860_v3 = vfloor.f32 %v1844_v47 }
 0x276   : >> { %5182 = vmatprep.subr.mxu0 %v1600_v12  ;;  %5518 = vmatprep.subr.mxu1 %v1600_v12 }
 0x277   : >> { %5183 = vmatpush3.msra.mxu0 %v1600_v12  ;;  %5534 = vmatpush3.msra.mxu1 %v1600_v12  ;;  %v1868_v12 = vfloor.f32 %v1852_v60 }
 0x278   : >> { %5184 = vmatprep.subr.mxu0 %v1599_v38  ;;  %5519 = vmatprep.subr.mxu1 %v1599_v38 }
 0x279   : >> { %5185 = vmatpush3.msra.mxu0 %v1599_v38  ;;  %5535 = vmatpush3.msra.mxu1 %v1599_v38  ;;  %v1859_v38 = vfloor.f32 %v1843_v26 }
 0x27a   : >> { %5186 = vmatprep.subr.mxu0 %v1598_v5  ;;  %5520 = vmatprep.subr.mxu1 %v1598_v5 }
 0x27b   : >> { %5187 = vmatpush3.msra.mxu0 %v1598_v5  ;;  %5536 = vmatpush3.msra.mxu1 %v1598_v5  ;;  %v7657_v5 = vadd.s32 %v7631_v36, %v6274_v57 }
 0x27c   : >> { %5188 = vmatprep.subr.mxu0 %v1597_v55  ;;  %5521 = vmatprep.subr.mxu1 %v1597_v55 }
 0x27d   : >> { %5189 = vmatpush3.msra.mxu0 %v1597_v55  ;;  %5537 = vmatpush3.msra.mxu1 %v1597_v55  ;;  %v1867_v55 = vfloor.f32 %v1851_v24 }
 0x27e   : >> { %5190 = vmatprep.subr.mxu0 %v1596_v63  ;;  %5522 = vmatprep.subr.mxu1 %v1596_v63 }
 0x27f   : >> { %5191 = vmatpush3.msra.mxu0 %v1596_v63  ;;  %5538 = vmatpush3.msra.mxu1 %v1596_v63  ;;  %v1846_v63 = vmul.f32 0.0625, %v1830_v21 }
 0x280   : >> { %5192 = vmatprep.subr.mxu0 %v1595_v14  ;;  %5523 = vmatprep.subr.mxu1 %v1595_v14 }
 0x281   : >> { %5193 = vmatpush3.msra.mxu0 %v1595_v14  ;;  %5539 = vmatpush3.msra.mxu1 %v1595_v14  ;;  %v1838_v14 = vadd.f32 0.5, %v1822_v44 }
 0x282   : >> { %5194 = vmatprep.subr.mxu0 %v1594_v42  ;;  %5524 = vmatprep.subr.mxu1 %v1594_v42 }
 0x283   : >> { %5195 = vmatpush3.msra.mxu0 %v1594_v42  ;;  %5540 = vmatpush3.msra.mxu1 %v1594_v42  ;;  %v1813_v42 = vcvt.s32.f32 %v7653_v59 }
 0x284   : >> { %5196 = vmatprep.subr.mxu0 %v1593_v37  ;;  %5525 = vmatprep.subr.mxu1 %v1593_v37 }
 0x285   : >> { %5197 = vmatpush3.msra.mxu0 %v1593_v37  ;;  %5541 = vmatpush3.msra.mxu1 %v1593_v37  ;;  %v1876_v37 = vmul.f32 16.0, %v1860_v3 }
 0x286   : >> { %5198 = vmatprep.mubr.f32.mxu0 %v4414_v22  ;;  %5210 = vmatprep.mubr.f32.mxu1 %v4422_v8  ;;  %v1884_v22 = vmul.f32 16.0, %v1868_v12  ;;  %v1908_v8 = vmul.f32 2.0, %v1860_v3  ;;  %v7703_v3 = vadd.s32 %v7631_v36, %v6319_v25 }
 0x287   : >> { %5199 = vmatmul.mubr.f32.vlgmr.msra.gmra.mxu0 %v4415_v2  ;;  %5211 = vmatmul.mubr.f32.vlgmr.msra.gmra.mxu1 %v4423_v7  ;;  %v1916_v2 = vmul.f32 2.0, %v1868_v12  ;;  %v1875_v7 = vmul.f32 16.0, %v1859_v38 }
 0x288   : >> { %5201 = vmatprep.mubr.f32.mxu0 %v4416_v50  ;;  %5213 = vmatprep.mubr.f32.mxu1 %v4424_v15  ;;  %v1821_v50 = vcvt.s32.f32 %v7657_v5  ;;  %v1883_v15 = vmul.f32 16.0, %v1867_v55 }
 0x289   : >> { %v7675_v41 = vadd.f32 1.0, %v1916_v2  ;;  %v1891_v61 = vsub.f32 %v1811_v13, %v1875_v7 }
 0x28a   : >> { %v1837_v11 = vadd.f32 0.5, %v1821_v50  ;;  %v1899_v40 = vsub.f32 %v1819_v10, %v1883_v15  ;;  %v1818_v15 = vcvt.s32.f32 %v7703_v3 }
 0x28b   : >> { %5202 = vmatmul.mubr.f32.gmra.mxu0 %v4417_v16  ;;  %5214 = vmatmul.mubr.f32.gmra.mxu1 %v4425_v48  ;;  %v1862_v16 = vfloor.f32 %v1846_v63  ;;  %v1854_v48 = vmul.f32 0.0625, %v1838_v14  ;;  %v7699_v26 = vmul.f32 2.0, %v1891_v61  ;;  %vm1980_vm15 = vcmp.ge.f32.partialorder %v7675_v41, 1.0 }
 0x28c   : >> { %5204 = vmatprep.mubr.f32.mxu0 %v4418_v58  ;;  %5216 = vmatprep.mubr.f32.mxu1 %v4426_v31  ;;  %v7665_v58 = vadd.s32 %v7631_v36, %v6289_v4  ;;  %v1829_v31 = vadd.f32 0.5, %v1813_v42  ;;  %v1853_v21 = vmul.f32 0.0625, %v1837_v11  ;;  %vm1996_vm10 = vcmp.le.f32.partialorder %v7675_v41, 16.0 }
 0x28d   : >> { %v1878_v27 = vmul.f32 16.0, %v1862_v16  ;;  %v1870_v54 = vfloor.f32 %v1854_v48  ;;  %v1910_v24 = vmul.f32 2.0, %v1862_v16  ;;  %v7707_v12 = vmul.f32 2.0, %v1899_v40  ;;  %vm7773_vm13 = vmand %vm1980_vm15, %vm1996_vm10 }
 0x28e   : >> { %v1816_v23 = vcvt.s32.f32 %v7665_v58  ;;  %v1845_v43 = vmul.f32 0.0625, %v1829_v31  ;;  %v1869_v7 = vfloor.f32 %v1853_v21  ;;  %v7725_v16 = vadd.s32 %v7631_v36, %v6351_v49 }
 0x28f   : >> { %5205 = vmatmul.mubr.f32.gmra.mxu0 %v4419_v1  ;;  %5217 = vmatmul.mubr.f32.gmra.mxu1 %v4427_v52  ;;  %v7671_v1 = vadd.s32 %v7631_v36, %v6294_v6  ;;  %v1892_v52 = vsub.f32 %v1812_v53, %v1876_v37  ;;  %v7683_v53 = vadd.s32 %v7631_v36, %v6307_v17  ;;  %v7720_v2 = vadd.f32 1.0, %v1910_v24 }
 0x290   : >> { %5207 = vmatprep.mubr.f32.mxu0 %v4420_v20  ;;  %5219 = vmatprep.mubr.f32.mxu1 %v4428_v30  ;;  %v1900_v20 = vsub.f32 %v1820_v51, %v1884_v22  ;;  %v1907_v30 = vmul.f32 2.0, %v1859_v38  ;;  %v7687_v51 = vadd.s32 %v7631_v36, %v6310_v18  ;;  %v1894_v38 = vsub.f32 %v1814_v29, %v1878_v27 }
 0x291   : >> { %v1824_v19 = vcvt.s32.f32 %v7671_v1  ;;  %v7689_v13 = vmul.f32 2.0, %v1892_v52  ;;  %v1832_v63 = vadd.f32 0.5, %v1816_v23  ;;  %v1861_v14 = vfloor.f32 %v1845_v43 }
 0x292   : >> { %v7691_v47 = vmul.f32 2.0, %v1900_v20  ;;  %v7693_v10 = vadd.f32 1.0, %v1907_v30  ;;  %v1815_v22 = vcvt.s32.f32 %v7683_v53  ;;  %v1918_v29 = vmul.f32 2.0, %v1870_v54 }
 0x293   : >> { %5208 = vmatmul.mubr.f32.gmra.mxu0 %v4421_v28  ;;  %5220 = vmatmul.mubr.f32.gmra.mxu1 %v4429_v32  ;;  %v1915_v28 = vmul.f32 2.0, %v1867_v55  ;;  %v7673_v32 = vadd.f32 1.0, %v1908_v8  ;;  %v1886_v55 = vmul.f32 16.0, %v1870_v54  ;;  %v1840_v37 = vadd.f32 0.5, %v1824_v19 }
 0x294   : >> { %v1823_v8 = vcvt.s32.f32 %v7687_v51  ;;  %vm2020_vm5 = vcmp.ge.f32.partialorder %v7689_v13, 1.0  ;;  %vm1971_vm11 = vcmp.ge.f32.partialorder %v7693_v10, 1.0  ;;  %vm1987_vm2 = vcmp.le.f32.partialorder %v7693_v10, 16.0 }
 0x295   : >> { %v7695_v60 = vadd.f32 1.0, %v1915_v28  ;;  %vm1972_vm6 = vcmp.ge.f32.partialorder %v7673_v32, 1.0  ;;  %vm1988_vm3 = vcmp.le.f32.partialorder %v7673_v32, 16.0  ;;  %vm2028_vm7 = vcmp.ge.f32.partialorder %v7691_v47, 1.0 }
 0x296   : >> { %vm2019_vm4 = vcmp.ge.f32.partialorder %v7699_v26, 1.0  ;;  %v7729_v48 = vmul.f32 2.0, %v1894_v38  ;;  %v1902_v31 = vsub.f32 %v1822_v44, %v1886_v55  ;;  %v1848_v52 = vmul.f32 0.0625, %v1832_v63  ;;  %vm7762_vm1 = vmand %vm1972_vm6, %vm1988_vm3 }
 0x297   : >> { %vm1979_vm9 = vcmp.ge.f32.partialorder %v7695_v60, 1.0  ;;  %vm1995_vm12 = vcmp.le.f32.partialorder %v7695_v60, 16.0  ;;  %vm2027_vm14 = vcmp.ge.f32.partialorder %v7707_v12, 1.0  ;;  %v1877_v20 = vmul.f32 16.0, %v1861_v14  ;;  %vm7786_vm3 = vmand %vm1971_vm11, %vm1987_vm2 }
 0x298   : >> { %v1856_v30 = vmul.f32 0.0625, %v1840_v37  ;;  %v1831_v28 = vadd.f32 0.5, %v1815_v22  ;;  %v1839_v61 = vadd.f32 0.5, %v1823_v8  ;;  %v7738_v11 = vadd.f32 1.0, %v1918_v29  ;;  %vm7795_vm10 = vmand %vm7762_vm1, %vm2020_vm5 }
 0x299   : >> { %v1909_v40 = vmul.f32 2.0, %v1861_v14  ;;  %v7742_v27 = vadd.s32 %v7631_v36, %v6362_v62  ;;  %v1885_v44 = vmul.f32 16.0, %v1869_v7  ;;  %v1834_v54 = vadd.f32 0.5, %v1818_v15  ;;  %vm7805_vm2 = vmand %vm1979_vm9, %vm1995_vm12 }
 0x29a   : >> { %v1826_v43 = vcvt.s32.f32 %v7725_v16  ;;  %vm1990_vm8 = vcmp.le.f32.partialorder %v7720_v2, 16.0  ;;  %v7753_v24 = vmul.f32 2.0, %v1902_v31  ;;  %v1917_v21 = vmul.f32 2.0, %v1869_v7  ;;  %vm7815_vm5 = vmand %vm7773_vm13, %vm2028_vm7 }
 0x29b   : >> { %v1864_v38 = vfloor.f32 %v1848_v52  ;;  %v1893_v36 = vsub.f32 %v1813_v42, %v1877_v20  ;;  %v1872_v55 = vfloor.f32 %v1856_v30  ;;  %v1847_v63 = vmul.f32 0.0625, %v1831_v28  ;;  %vm7827_vm9 = vmand %vm7786_vm3, %vm2019_vm4 }
 0x29c   : >> { %v1855_v14 = vmul.f32 0.0625, %v1839_v61  ;;  %v1925_v29 = vadd.f32 1.0, %v1909_v40  ;;  %v1817_v7 = vcvt.s32.f32 %v7742_v27  ;;  %v9537_v31 = vcvt.s32.f32 %v7746_v0  ;;  %vm7839_vm11 = vmand %vm7805_vm2, %vm2027_vm14 }
 0x29d   : >> { %vm1998_vm6 = vcmp.le.f32.partialorder %v7738_v11, 16.0  ;;  %v1901_v42 = vsub.f32 %v1821_v50, %v1885_v44  ;;  %v1850_v32 = vmul.f32 0.0625, %v1834_v54  ;;  %v1842_v52 = vadd.f32 0.5, %v1826_v43 }
 0x29e   : >> { %vm2030_vm15 = vcmp.ge.f32.partialorder %v7753_v24, 1.0  ;;  %v1933_v41 = vadd.f32 1.0, %v1917_v21  ;;  %v1880_v30 = vmul.f32 16.0, %v1864_v38  ;;  %v1912_v28 = vmul.f32 2.0, %v1864_v38 }
 0x29f   : >> { %v7809_v10 = vmul.f32 2.0, %v1893_v36  ;;  %v1888_v61 = vmul.f32 16.0, %v1872_v55  ;;  %v1863_v40 = vfloor.f32 %v1847_v63  ;;  %v1871_v44 = vfloor.f32 %v1855_v14 }
 0x2a0   : >> { %vm1973_vm1 = vcmp.ge.f32.partialorder %v1925_v29, 1.0  ;;  %v1920_v21 = vmul.f32 2.0, %v1872_v55  ;;  %v1833_v60 = vadd.f32 0.5, %v1817_v7  ;;  %v1841_v38 = vadd.f32 0.5, %v9537_v31 }
 0x2a1   : >> { %vm1989_vm13 = vcmp.le.f32.partialorder %v1925_v29, 16.0  ;;  %v7833_v55 = vmul.f32 2.0, %v1901_v42  ;;  %v1866_v63 = vfloor.f32 %v1850_v32  ;;  %v1858_v14 = vmul.f32 0.0625, %v1842_v52 }
 0x2a2   : >> { %vm1997_vm3 = vcmp.le.f32.partialorder %v1933_v41, 16.0  ;;  %v1896_v59 = vsub.f32 %v1816_v23, %v1880_v30  ;;  %v1928_v20 = vadd.f32 1.0, %v1912_v28  ;;  %vm9858_vm12 = vcmp.ge.f32.partialorder %v7720_v2, 1.0  ;;  %vm7868_vm4 = vmand %vm1973_vm1, %vm1989_vm13 }
 0x2a3   : >> { %vm7849_vm7 = vmand %vm9858_vm12, %vm1990_vm8  ;;  %v1904_v32 = vsub.f32 %v1824_v19, %v1888_v61  ;;  %v1879_v52 = vmul.f32 16.0, %v1863_v40  ;;  %v1911_v50 = vmul.f32 2.0, %v1863_v40  ;;  %v1887_v31 = vmul.f32 16.0, %v1871_v44 }
 0x2a4   : >> { %vm9861_vm2 = vcmp.ge.f32.partialorder %v7738_v11, 1.0  ;;  %vm2021_vm12 = vcmp.ge.f32.partialorder %v7809_v10, 1.0  ;;  %v1936_v23 = vadd.f32 1.0, %v1920_v21  ;;  %v1849_v1 = vmul.f32 0.0625, %v1833_v60 }
 0x2a5   : >> { %vm7860_vm0 = vmand %vm9861_vm2, %vm1998_vm6  ;;  %v1857_v19 = vmul.f32 0.0625, %v1841_v38  ;;  %v1919_v11 = vmul.f32 2.0, %v1871_v44  ;;  %v1882_v30 = vmul.f32 16.0, %v1866_v63  ;;  %v1874_v28 = vfloor.f32 %v1858_v14 }
 0x2a6   : >> { %vm9866_vm2 = vcmp.ge.f32.partialorder %v7729_v48, 1.0  ;;  %v7882_v29 = vmul.f32 2.0, %v1896_v59  ;;  %vm1992_vm13 = vcmp.le.f32.partialorder %v1928_v20, 16.0  ;;  %v1914_v40 = vmul.f32 2.0, %v1866_v63  ;;  %vm7888_vm14 = vmand %vm7860_vm0, %vm2030_vm15 }
 0x2a7   : >> { %vm7878_vm8 = vmand %vm7849_vm7, %vm9866_vm2  ;;  %v7892_v21 = vmul.f32 2.0, %v1904_v32  ;;  %v1895_v60 = vsub.f32 %v1815_v22, %v1879_v52  ;;  %v1927_v38 = vadd.f32 1.0, %v1911_v50  ;;  %v1903_v14 = vsub.f32 %v1823_v8, %v1887_v31 }
 0x2a8   : >> { %vm7902_vm7 = vmand %vm7868_vm4, %vm2021_vm12  ;;  %v9871_v63 = vmov 0  ;;  %v1865_v59 = vfloor.f32 %v1849_v1  ;;  %v1873_v42 = vfloor.f32 %v1857_v19  ;;  %vm9873_vm2 = vcmp.ge.f32.partialorder %v1933_v41, 1.0 }
 0x2a9   : >> { %v9872_v63 = vsel %vm7902_vm7, 4294967295, %v9871_v63  ;;  %vm7908_vm6 = vmand %vm9873_vm2, %vm1997_vm3  ;;  %v1935_v51 = vadd.f32 1.0, %v1919_v11  ;;  %v1898_v22 = vsub.f32 %v1818_v15, %v1882_v30  ;;  %v1890_v8 = vmul.f32 16.0, %v1874_v28 }
 0x2aa   : >> { %vm9876_vm4 = vcmp.le.f32.partialorder %v7689_v13, 16.0  ;;  %v9877_v31 = vmov 0  ;;  %vm9879_vm3 = vcmp.le.f32.partialorder %v7691_v47, 16.0  ;;  %vm9882_vm1 = vcmp.ge.f32.partialorder %v1928_v20, 1.0 }
 0x2ab   : >> { %vm7919_vm12 = vmand %vm7795_vm10, %vm9876_vm4  ;;  %vm2024_vm15 = vcmp.ge.f32.partialorder %v7882_v29, 1.0  ;;  %v1930_v13 = vadd.f32 1.0, %v1914_v40  ;;  %v1922_v15 = vmul.f32 2.0, %v1874_v28  ;;  %vm9885_vm4 = vcmp.le.f32.partialorder %v1936_v23, 16.0 }
 0x2ac   : >> { %v9878_v31 = vsel %vm7919_vm12, 4294967295, %v9877_v31  ;;  %vm7927_vm2 = vmand %vm7815_vm5, %vm9879_vm3  ;;  %vm9886_vm12 = vcmp.ge.f32.partialorder %v1936_v23, 1.0  ;;  %vm2032_vm5 = vcmp.ge.f32.partialorder %v7892_v21, 1.0  ;;  %v7946_v5 = vmul.f32 2.0, %v1895_v60  ;;  %v7989_v23 = vld [vmem:[%s9519_s2] ss:$0 sm:$0xff] }
 0x2ad   : >> { %vm7933_vm0 = vmand %vm9882_vm1, %vm1992_vm13  ;;  %v7948_v54 = vmul.f32 2.0, %v1903_v14  ;;  %vm9889_vm13 = vcmp.le.f32.partialorder %v7699_v26, 16.0  ;;  %vm9895_vm10 = vcmp.ge.f32.partialorder %v7833_v55, 1.0  ;;  %v1881_v36 = vmul.f32 16.0, %v1865_v59 }
 0x2ae   : >> { %vm7941_vm7 = vmand %vm9886_vm12, %vm9885_vm4  ;;  %vm9892_vm12 = vcmp.le.f32.partialorder %v7707_v12, 16.0  ;;  %v1913_v52 = vmul.f32 2.0, %v1865_v59  ;;  %v1889_v50 = vmul.f32 16.0, %v1873_v42  ;;  %v7982_v37 = vmul.f32 2.0, %v1898_v22 }
 0x2af   : >> { %vm7954_vm3 = vmand %vm7827_vm9, %vm9889_vm13  ;;  %vm1991_vm9 = vcmp.le.f32.partialorder %v1927_v38, 16.0  ;;  %v1906_v58 = vsub.f32 %v1826_v43, %v1890_v8  ;;  %v7999_v19 = vadd.f32 1.0, %v1922_v15  ;;  %v1921_v2 = vmul.f32 2.0, %v1873_v42 }
 0x2b0   : >> { %vm7962_vm4 = vmand %vm7839_vm11, %vm9892_vm12  ;;  %v9903_v16 = vmov 0  ;;  %vm9905_vm12 = vcmp.le.f32.partialorder %v7753_v24, 16.0  ;;  %v9906_v43 = vmov 0  ;;  %v9916_v28 = vmov 0 }
 0x2b1   : >> { %vm7970_vm1 = vmand %vm7908_vm6, %vm9895_vm10  ;;  %vm9902_vm10 = vcmp.le.f32.partialorder %v7729_v48, 16.0  ;;  %v1929_v40 = vadd.f32 1.0, %v1913_v52  ;;  %v8088_v59 = vmul.f32 2.0, %v1906_v58 }
 0x2b2   : >> { %vm7978_vm11 = vmand %vm7933_vm0, %vm2024_vm15  ;;  %vm9908_vm0 = vcmp.ge.f32.partialorder %v1927_v38, 1.0 }
 0x2b3   : >> { %vm7995_vm6 = vmand %vm7941_vm7, %vm2032_vm5 }
 0x2b4   : >> { %vm8005_vm13 = vmand %vm7878_vm8, %vm9902_vm10  ;;  %vm9918_vm10 = vcmp.le.f32.partialorder %v1935_v51, 16.0 }
 0x2b5   : >> { %v9904_v16 = vsel %vm8005_vm13, 4294967295, %v9903_v16  ;;  %vm8013_vm7 = vmand %vm7888_vm14, %vm9905_vm12  ;;  %vm9911_vm14 = vcmp.le.f32.partialorder %v7809_v10, 16.0  ;;  %vm9912_vm12 = vnez %v9872_v63  ;;  %vm9919_vm13 = vcmp.ge.f32.partialorder %v1935_v51, 1.0 }
 0x2b6   : >> { %v9907_v43 = vsel %vm8013_vm7, 4294967295, %v9906_v43  ;;  %vm8020_vm15 = vmand %vm9908_vm0, %vm1991_vm9  ;;  %vm9915_vm9 = vcmp.le.f32.partialorder %v7833_v55, 16.0  ;;  %v1897_v10 = vsub.f32 %v1817_v7, %v1881_v36  ;;  %v9922_v55 = vcvt.s32.f32 %v7746_v0 }
 0x2b7   : >> { %vm8031_vm7 = vmand %vm9912_vm12, %vm9911_vm14  ;;  %vm9924_vm14 = vcmp.ge.f32.partialorder %v1930_v13, 1.0 }
 0x2b8   : >> { %vm8039_vm0 = vmand %vm7970_vm1, %vm9915_vm9  ;;  %v1905_v44 = vsub.f32 %v9922_v55, %v1889_v50  ;;  %vm9923_vm1 = vcmp.le.f32.partialorder %v1930_v13, 16.0  ;;  %vm9927_vm9 = vcmp.le.f32.partialorder %v7882_v29, 16.0  ;;  %v8110_v47 = vmul.f32 2.0, %v1897_v10 }
 0x2b9   : >> { %v9917_v28 = vsel %vm8039_vm0, 4294967295, %v9916_v28  ;;  %vm8045_vm8 = vmand %vm9919_vm13, %vm9918_vm10  ;;  %vm2026_vm13 = vcmp.ge.f32.partialorder %v7982_v37, 1.0  ;;  %vm9930_vm0 = vcmp.le.f32.partialorder %v7892_v21, 16.0  ;;  %v1937_v21 = vadd.f32 1.0, %v1921_v2 }
 0x2ba   : >> { %vm8058_vm12 = vmand %vm9924_vm14, %vm9923_vm1  ;;  %vm9933_vm14 = vcmp.ge.f32.partialorder %v7946_v5, 1.0  ;;  %v8112_v26 = vmul.f32 2.0, %v1905_v44 }
 0x2bb   : >> { %vm8068_vm5 = vmand %vm7978_vm11, %vm9927_vm9  ;;  %vm2002_vm9 = vcmp.le.f32.partialorder %v7999_v19, 16.0  ;;  %vm1993_vm11 = vcmp.le.f32.partialorder %v1929_v40, 16.0 }
 0x2bc   : >> { %vm8076_vm1 = vmand %vm7995_vm6, %vm9930_vm0  ;;  %vm9936_vm6 = vcmp.ge.f32.partialorder %v7948_v54, 1.0 }
 0x2bd   : >> { %vm8084_vm10 = vmand %vm8020_vm15, %vm9933_vm14  ;;  %vm1977_vm14 = vcmp.ge.f32.partialorder %v1929_v40, 1.0 }
 0x2be   : >> { %vm8098_vm15 = vmand %vm8045_vm8, %vm9936_vm6  ;;  %vm9941_vm8 = vnez %v9878_v31  ;;  %vm9942_vm6 = vcmp.le.f32.partialorder %v7946_v5, 16.0 }
 0x2bf   : >> { %vm8106_vm0 = vmand %vm8058_vm12, %vm2026_vm13 }
 0x2c0   : >> { %vm8122_vm12 = vmand %vm8084_vm10, %vm9942_vm6  ;;  %vm1985_vm10 = vcmp.ge.f32.partialorder %v1937_v21, 1.0  ;;  %vm9948_vm6 = vcmp.le.f32.partialorder %v7982_v37, 16.0 }
 0x347   : >> { %v5200_v24 = vpop.f32.mrf.mxu0  ;;  %v5212_v11 = vpop.f32.mrf.mxu1 }
 0x348   : >> { %v1688_v60 = vadd.f32 %v5200_v24, %v7989_v23  ;;  %v1728_v38 = vadd.f32 %v5212_v11, %v7989_v23 }
 0x349   : >> { %v1682_v27 = vpop.f32.mrf.mxu0  ;;  %v1722_v7 = vpop.f32.mrf.mxu1 }
 0x34a   : >> { %v1762_v42 = vmax.f32 %v1688_v60, 0.0  ;;  %v1770_v53 = vmax.f32 %v1728_v38, 0.0  ;;  %v1683_v51 = vadd.f32 %v7989_v23, %v1682_v27  ;;  %v1723_v22 = vadd.f32 %v7989_v23, %v1722_v7 }
 0x34b   : >> { %v5203_v3 = vpop.f32.mrf.mxu0  ;;  %v5215_v13 = vpop.f32.mrf.mxu1 }
 0x34c   : >> { %v2116_v36 = vsel %vm9941_vm8, %v1762_v42, 0.0  ;;  %v2124_v52 = vsel %vm7927_vm2, %v1770_v53, 0.0  ;;  %v1761_v50 = vmax.f32 %v1683_v51, 0.0  ;;  %v1769_v12 = vmax.f32 %v1723_v22, 0.0 }
 0x34d   : >> { %4433 = vst [vmem:[%s8127_s25 + $0x208] sm:$0xff] %v2116_v36  ;;  %4441 = vst [vmem:[%s8127_s25 + $0x248] sm:$0xff] %v2124_v52  ;;  %v1698_v31 = vadd.f32 %v5203_v3, %v7989_v23  ;;  %v1738_v41 = vadd.f32 %v5215_v13, %v7989_v23  ;;  %v1692_v1 = vpop.f32.mrf.mxu0  ;;  %v1732_v5 = vpop.f32.mrf.mxu1  ;;  %vm9945_vm2 = vcmp.le.f32.partialorder %v7948_v54, 16.0  ;;  %vm2001_vm8 = vcmp.le.f32.partialorder %v1937_v21, 16.0 }
 0x34e   : >> { %vm8137_vm13 = vmand %vm8098_vm15, %vm9945_vm2  ;;  %v2115_v48 = vsel %vm7954_vm3, %v1761_v50, 0.0  ;;  %v2123_v24 = vsel %vm7962_vm4, %v1769_v12, 0.0  ;;  %v1693_v11 = vadd.f32 %v7989_v23, %v1692_v1  ;;  %v1733_v61 = vadd.f32 %v7989_v23, %v1732_v5 }
 0x34f   : >> { %vm8151_vm15 = vmand %vm8106_vm0, %vm9948_vm6  ;;  %4432 = vst [vmem:[%s8127_s25 + $0x200] sm:$0xff] %v2115_v48  ;;  %v1764_v10 = vmax.f32 %v1698_v31, 0.0  ;;  %v1772_v20 = vmax.f32 %v1738_v41, 0.0  ;;  %v5206_v55 = vpop.f32.mrf.mxu0  ;;  %v5218_v44 = vpop.f32.mrf.mxu1  ;;  %vm9951_vm3 = vcmp.ge.f32.partialorder %v7999_v19, 1.0  ;;  %vm2066_vm2 = vcmp.le.f32.partialorder %v8088_v59, 16.0 }
 0x350   : >> { %4440 = vst [vmem:[%s8127_s25 + $0x240] sm:$0xff] %v2123_v24  ;;  %vm8161_vm4 = vmand %vm9951_vm3, %vm2002_vm9  ;;  %v1763_v37 = vmax.f32 %v1693_v11, 0.0  ;;  %v1771_v60 = vmax.f32 %v1733_v61, 0.0  ;;  %v1708_v38 = vadd.f32 %v5206_v55, %v7989_v23  ;;  %v1748_v14 = vadd.f32 %v5218_v44, %v7989_v23 }
 0x351   : >> { %vm8171_vm6 = vmand %vm1977_vm14, %vm1993_vm11  ;;  %vm9956_vm9 = vnez %v9904_v16  ;;  %vm9957_vm3 = vnez %v9907_v43  ;;  %v1702_v29 = vpop.f32.mrf.mxu0  ;;  %v1742_v42 = vpop.f32.mrf.mxu1  ;;  %vm2033_vm11 = vcmp.ge.f32.partialorder %v8112_v26, 1.0  ;;  %vm9960_vm14 = vnez %v9917_v28 }
 0x352   : >> { %v2118_v27 = vsel %vm9956_vm9, %v1764_v10, 0.0  ;;  %v2126_v7 = vsel %vm9957_vm3, %v1772_v20, 0.0  ;;  %vm8182_vm0 = vmand %vm1985_vm10, %vm2001_vm8  ;;  %v2117_v16 = vsel %vm8031_vm7, %v1763_v37, 0.0  ;;  %v2125_v43 = vsel %vm9960_vm14, %v1771_v60, 0.0 }
 0x353   : >> { %4435 = vst [vmem:[%s8127_s25 + $0x218] sm:$0xff] %v2118_v27  ;;  %4443 = vst [vmem:[%s8127_s25 + $0x258] sm:$0xff] %v2126_v7  ;;  %v1766_v53 = vmax.f32 %v1708_v38, 0.0  ;;  %v1774_v51 = vmax.f32 %v1748_v14, 0.0  ;;  %vm9961_vm9 = vcmp.ge.f32.partialorder %v8088_v59, 1.0  ;;  %v1703_v30 = vadd.f32 %v7989_v23, %v1702_v29  ;;  %v5209_v28 = vpop.f32.mrf.mxu0  ;;  %v5221_v8 = vpop.f32.mrf.mxu1 }
 0x354   : >> { %vm8197_vm10 = vmand %vm8161_vm4, %vm9961_vm9  ;;  %4434 = vst [vmem:[%s8127_s25 + $0x210] sm:$0xff] %v2117_v16  ;;  %v1743_v22 = vadd.f32 %v7989_v23, %v1742_v42  ;;  %vm9964_vm7 = vcmp.ge.f32.partialorder %v8110_v47, 1.0  ;;  %vm2057_vm4 = vcmp.le.f32.partialorder %v8110_v47, 16.0  ;;  %vm2065_vm3 = vcmp.le.f32.partialorder %v8112_v26, 16.0 }
 0x355   : >> { %4442 = vst [vmem:[%s8127_s25 + $0x250] sm:$0xff] %v2125_v43  ;;  %vm8209_vm8 = vmand %vm8171_vm6, %vm9964_vm7  ;;  %v2120_v13 = vsel %vm8068_vm5, %v1766_v53, 0.0  ;;  %v2128_v15 = vsel %vm8076_vm1, %v1774_v51, 0.0  ;;  %v1718_v36 = vadd.f32 %v5209_v28, %v7989_v23  ;;  %v1758_v52 = vadd.f32 %v5221_v8, %v7989_v23  ;;  %v1712_v63 = vpop.f32.mrf.mxu0  ;;  %v1752_v31 = vpop.f32.mrf.mxu1 }
 0x356   : >> { %vm8225_vm6 = vmand %vm8182_vm0, %vm2033_vm11  ;;  %4437 = vst [vmem:[%s8127_s25 + $0x228] sm:$0xff] %v2120_v13  ;;  %v1765_v0 = vmax.f32 %v1703_v30, 0.0  ;;  %v1773_v12 = vmax.f32 %v1743_v22, 0.0  ;;  %v1713_v5 = vadd.f32 %v7989_v23, %v1712_v63  ;;  %v1753_v59 = vadd.f32 %v7989_v23, %v1752_v31 }
 0x357   : >> { %4445 = vst [vmem:[%s8127_s25 + $0x268] sm:$0xff] %v2128_v15  ;;  %vm2082_vm5 = vmand %vm8197_vm10, %vm2066_vm2  ;;  %v1768_v41 = vmax.f32 %v1718_v36, 0.0  ;;  %v1776_v1 = vmax.f32 %v1758_v52, 0.0 }
 0x358   : >> { %vm2073_vm1 = vmand %vm8209_vm8, %vm2057_vm4  ;;  %v2119_v48 = vsel %vm8122_vm12, %v1765_v0, 0.0  ;;  %v2127_v24 = vsel %vm8137_vm13, %v1773_v12, 0.0  ;;  %v1767_v61 = vmax.f32 %v1713_v5, 0.0  ;;  %v1775_v10 = vmax.f32 %v1753_v59, 0.0  ;;  %1572 = sbr.rel (!%p1570_p7) target bundleno = 613 (0x265), region = 184 }
 0x359   : >> { %vm2081_vm0 = vmand %vm8225_vm6, %vm2065_vm3  ;;  %4436 = vst [vmem:[%s8127_s25 + $0x220] sm:$0xff] %v2119_v48  ;;  %v2122_v47 = vsel %vm8151_vm15, %v1768_v41, 0.0  ;;  %v2130_v11 = vsel %vm2082_vm5, %v1776_v1, 0.0 }
 0x35a   : >> { %4444 = vst [vmem:[%s8127_s25 + $0x260] sm:$0xff] %v2127_v24  ;;  %4439 = vst [vmem:[%s8127_s25 + $0x238] sm:$0xff] %v2122_v47  ;;  %v2121_v23 = vsel %vm2073_vm1, %v1767_v61, 0.0  ;;  %v2129_v58 = vsel %vm2081_vm0, %v1775_v10, 0.0 }
 0x35b   : >> { %4447 = vst [vmem:[%s8127_s25 + $0x278] sm:$0xff] %v2130_v11  ;;  %4438 = vst [vmem:[%s8127_s25 + $0x230] sm:$0xff] %v2121_v23 }
 0x35c   : >> { %4446 = vst [vmem:[%s8127_s25 + $0x270] sm:$0xff] %v2129_v58 }
 0x35d LB: >> { %v2188_v26 = vld [vmem:[#allocation6 + $0x78] sm:$0xff]  ;;  %v2187_v2 = vld [vmem:[#allocation6 + $0x70] sm:$0xff]  ;;  %v2186_v54 = vld [vmem:[#allocation6 + $0x68] sm:$0xff]  ;;  %s8266_s1 = sshll.u32 %s5965_s28, 7  ;;  %s2153_s28 = sadd.s32 1, %s5965_s28   ;;  %s5965_s28 = sphi %s8260_s28, %s2153_s28  }
 0x35e   : >> { %5222 = vmatprep.subr.mxu0 %v2188_v26  ;;  %5542 = vmatprep.subr.mxu1 %v2188_v26  ;;  %v2185_v20 = vld [vmem:[#allocation6 + $0x60] sm:$0xff]  ;;  %v2184_v55 = vld [vmem:[#allocation6 + $0x58] sm:$0xff]  ;;  %v2183_v44 = vld [vmem:[#allocation6 + $0x50] sm:$0xff]  ;;  %s8270_s29 = scalar_lea.vmem %s6189_s24, %s8266_s1 [#allocation3]  ;;  %v8289_v0 = vstv %s8266_s1  ;;  %s8805_s17 = scalar_lea.vmem [#allocation2], %s8266_s1 }
 0x35f   : >> { %5223 = vmatpush3.msra.mxu0 %v2188_v26  ;;  %5558 = vmatpush3.msra.mxu1 %v2188_v26  ;;  %v2182_v32 = vld [vmem:[#allocation6 + $0x48] sm:$0xff]  ;;  %v2181_v37 = vld [vmem:[#allocation6 + $0x40] sm:$0xff]  ;;  %v2180_v60 = vld [vmem:[#allocation6 + $0x38] sm:$0xff]  ;;  %v2376_v12 = vadd.s32 %v8289_v0, %v6237_v34  ;;  %v2384_v63 = vadd.s32 %v8289_v0, %v6240_v35  ;;  %v2375_v41 = vadd.s32 %v8289_v0, %v6234_v33  ;;  %p2150_p1 = scmp.ge.s32.totalorder %s2153_s28, 2  }
 0x360   : >> { %5224 = vmatprep.subr.mxu0 %v2187_v2  ;;  %5543 = vmatprep.subr.mxu1 %v2187_v2  ;;  %v2179_v38 = vld [vmem:[#allocation6 + $0x30] sm:$0xff]  ;;  %v2178_v14 = vld [vmem:[#allocation6 + $0x28] sm:$0xff]  ;;  %v2177_v19 = vld [vmem:[#allocation6 + $0x20] sm:$0xff]  ;;  %v2383_v5 = vadd.s32 %v8289_v0, %v6250_v39  ;;  %v2378_v11 = vadd.s32 %v8289_v0, %v6257_v45  ;;  %v8303_v23 = vadd.s32 %v8289_v0, %v6260_v46  ;;  %s4195_s28 = sshll.u32 (%p2150_p1), %s6204_s26, 4  ;;  %s4182_s22 = scalar_lea.sflag (%p2150_p1), [#allocation5], %s6185_s3  ;;  %s9472_s28 = int_to_ptr.vmem [resolvable:$true] %s4195_s28 }
 0x361   : >> { %5225 = vmatpush3.msra.mxu0 %v2187_v2  ;;  %5559 = vmatpush3.msra.mxu1 %v2187_v2  ;;  %v2176_v27 = vld [vmem:[#allocation6 + $0x18] sm:$0xff]  ;;  %v2175_v7 = vld [vmem:[#allocation6 + $0x10] sm:$0xff]  ;;  %v2174_v29 = vld [vmem:[#allocation6 + $0x8] sm:$0xff]  ;;  %v2392_v31 = vcvt.s32.f32 %v2376_v12  ;;  %v2400_v1 = vcvt.s32.f32 %v2384_v63  ;;  %v2391_v48 = vcvt.s32.f32 %v2375_v41  ;;  %p10177_p0 = scmp.ne.s32.totalorder (%p2150_p1), %s9577_s19, 0 }
 0x362   : >> { %5226 = vmatprep.subr.mxu0 %v2186_v54  ;;  %5544 = vmatprep.subr.mxu1 %v2186_v54  ;;  %v2173_v42 = vld [vmem:[#allocation6] sm:$0xff]  ;;  %v4451_v43 = vld [vmem:[%s8270_s29 + $0x308] sm:$0xff]  ;;  %v4452_v51 = vld [vmem:[%s8270_s29 + $0x310] sm:$0xff]  ;;  %v2399_v47 = vcvt.s32.f32 %v2383_v5  ;;  %v2394_v2 = vcvt.s32.f32 %v2378_v11  ;;  %v8334_v11 = vadd.s32 %v8289_v0, %v6307_v17 }
 0x363   : >> { %5227 = vmatpush3.msra.mxu0 %v2186_v54  ;;  %5560 = vmatpush3.msra.mxu1 %v2186_v54  ;;  %v4450_v40 = vld [vmem:[%s8270_s29 + $0x300] sm:$0xff]  ;;  %v4459_v53 = vld [vmem:[%s8270_s29 + $0x348] sm:$0xff]  ;;  %v4460_v21 = vld [vmem:[%s8270_s29 + $0x350] sm:$0xff]  ;;  %v2408_v59 = vadd.f32 0.5, %v2392_v31  ;;  %v2416_v24 = vadd.f32 0.5, %v2400_v1  ;;  %v2407_v10 = vadd.f32 0.5, %v2391_v48 }
 0x364   : >> { %5228 = vmatprep.subr.mxu0 %v2185_v20  ;;  %5545 = vmatprep.subr.mxu1 %v2185_v20  ;;  %v4458_v16 = vld [vmem:[%s8270_s29 + $0x340] sm:$0xff]  ;;  %v4453_v30 = vld [vmem:[%s8270_s29 + $0x318] sm:$0xff]  ;;  %v4455_v3 = vld [vmem:[%s8270_s29 + $0x328] sm:$0xff]  ;;  %v2415_v26 = vadd.f32 0.5, %v2399_v47 }
 0x365   : >> { %5229 = vmatpush3.msra.mxu0 %v2185_v20  ;;  %5561 = vmatpush3.msra.mxu1 %v2185_v20  ;;  %v4461_v22 = vld [vmem:[%s8270_s29 + $0x358] sm:$0xff]  ;;  %v4454_v28 = vld [vmem:[%s8270_s29 + $0x320] sm:$0xff]  ;;  %v4463_v13 = vld [vmem:[%s8270_s29 + $0x368] sm:$0xff]  ;;  %v2424_v61 = vmul.f32 0.0625, %v2408_v59  ;;  %v2432_v58 = vmul.f32 0.0625, %v2416_v24  ;;  %v2423_v20 = vmul.f32 0.0625, %v2407_v10 }
 0x366   : >> { %5230 = vmatprep.subr.mxu0 %v2184_v55  ;;  %5546 = vmatprep.subr.mxu1 %v2184_v55  ;;  %v4462_v8 = vld [vmem:[%s8270_s29 + $0x360] sm:$0xff]  ;;  %v4456_v15 = vld [vmem:[%s8270_s29 + $0x330] sm:$0xff]  ;;  %v4457_v52 = vld [vmem:[%s8270_s29 + $0x338] sm:$0xff] }
 0x367   : >> { %5231 = vmatpush3.msra.mxu0 %v2184_v55  ;;  %5562 = vmatpush3.msra.mxu1 %v2184_v55  ;;  %v4464_v36 = vld [vmem:[%s8270_s29 + $0x370] sm:$0xff]  ;;  %v4465_v50 = vld [vmem:[%s8270_s29 + $0x378] sm:$0xff]  ;;  %v2440_v54 = vfloor.f32 %v2424_v61  ;;  %v2402_v55 = vcvt.s32.f32 %v8303_v23  ;;  %v8338_v61 = vadd.s32 %v8289_v0, %v6310_v18  ;;  %v2900_v33 = vld [vmem:[#allocation8 + $0x60] sm:$0xff] (%p2150_p1) }
 0x368   : >> { %5232 = vmatprep.subr.mxu0 %v2183_v44  ;;  %5547 = vmatprep.subr.mxu1 %v2183_v44  ;;  %v2948_v34 = vld [vmem:[#allocation8 + $0x1e0] sm:$0xff] (%p2150_p1)  ;;  %v2915_v35 = vld [vmem:[#allocation8 + $0xd8] sm:$0xff] (%p2150_p1)  ;;  %v2913_v17 = vld [vmem:[#allocation8 + $0xc8] sm:$0xff] (%p2150_p1) }
 0x369   : >> { %5233 = vmatpush3.msra.mxu0 %v2183_v44  ;;  %5563 = vmatpush3.msra.mxu1 %v2183_v44  ;;  %v2448_v44 = vfloor.f32 %v2432_v58  ;;  %v2932_v39 = vld [vmem:[#allocation8 + $0x160] sm:$0xff] (%p2150_p1)  ;;  %v2899_v45 = vld [vmem:[#allocation8 + $0x58] sm:$0xff] (%p2150_p1)  ;;  %v2930_v18 = vld [vmem:[#allocation8 + $0x150] sm:$0xff] (%p2150_p1) }
 0x36a   : >> { %5234 = vmatprep.subr.mxu0 %v2182_v32  ;;  %5548 = vmatprep.subr.mxu1 %v2182_v32  ;;  %v2947_v46 = vld [vmem:[#allocation8 + $0x1d8] sm:$0xff] (%p2150_p1) }
 0x36b   : >> { %5235 = vmatpush3.msra.mxu0 %v2182_v32  ;;  %5564 = vmatpush3.msra.mxu1 %v2182_v32  ;;  %v2431_v32 = vmul.f32 0.0625, %v2415_v26 }
 0x36c   : >> { %5236 = vmatprep.subr.mxu0 %v2181_v37  ;;  %5549 = vmatprep.subr.mxu1 %v2181_v37 }
 0x36d   : >> { %5237 = vmatpush3.msra.mxu0 %v2181_v37  ;;  %5565 = vmatpush3.msra.mxu1 %v2181_v37  ;;  %v2410_v37 = vadd.f32 0.5, %v2394_v2 }
 0x36e   : >> { %5238 = vmatprep.subr.mxu0 %v2180_v60  ;;  %5550 = vmatprep.subr.mxu1 %v2180_v60 }
 0x36f   : >> { %5239 = vmatpush3.msra.mxu0 %v2180_v60  ;;  %5566 = vmatpush3.msra.mxu1 %v2180_v60  ;;  %v8308_v60 = vadd.s32 %v8289_v0, %v6271_v56  ;;  %v2914_v56 = vld [vmem:[#allocation8 + $0xd0] sm:$0xff] (%p2150_p1) }
 0x370   : >> { %5240 = vmatprep.subr.mxu0 %v2179_v38  ;;  %5551 = vmatprep.subr.mxu1 %v2179_v38 }
 0x371   : >> { %5241 = vmatpush3.msra.mxu0 %v2179_v38  ;;  %5567 = vmatpush3.msra.mxu1 %v2179_v38  ;;  %v8312_v38 = vadd.s32 %v8289_v0, %v6274_v57  ;;  %v2931_v57 = vld [vmem:[#allocation8 + $0x158] sm:$0xff] (%p2150_p1) }
 0x372   : >> { %5242 = vmatprep.subr.mxu0 %v2178_v14  ;;  %5552 = vmatprep.subr.mxu1 %v2178_v14 }
 0x373   : >> { %5243 = vmatpush3.msra.mxu0 %v2178_v14  ;;  %5568 = vmatpush3.msra.mxu1 %v2178_v14  ;;  %v2456_v14 = vmul.f32 16.0, %v2440_v54 }
 0x374   : >> { %5244 = vmatprep.subr.mxu0 %v2177_v19  ;;  %5553 = vmatprep.subr.mxu1 %v2177_v19 }
 0x375   : >> { %5245 = vmatpush3.msra.mxu0 %v2177_v19  ;;  %5569 = vmatpush3.msra.mxu1 %v2177_v19  ;;  %v2439_v19 = vfloor.f32 %v2423_v20 }
 0x376   : >> { %5246 = vmatprep.subr.mxu0 %v2176_v27  ;;  %5554 = vmatprep.subr.mxu1 %v2176_v27 }
 0x377   : >> { %5247 = vmatpush3.msra.mxu0 %v2176_v27  ;;  %5570 = vmatpush3.msra.mxu1 %v2176_v27  ;;  %v2418_v27 = vadd.f32 0.5, %v2402_v55  ;;  %v2487_v59 = vmul.f32 2.0, %v2439_v19 }
 0x378   : >> { %5248 = vmatprep.subr.mxu0 %v2175_v7  ;;  %5555 = vmatprep.subr.mxu1 %v2175_v7 }
 0x379   : >> { %5249 = vmatpush3.msra.mxu0 %v2175_v7  ;;  %5571 = vmatpush3.msra.mxu1 %v2175_v7  ;;  %v2464_v7 = vmul.f32 16.0, %v2448_v44 }
 0x37a   : >> { %5250 = vmatprep.subr.mxu0 %v2174_v29  ;;  %5556 = vmatprep.subr.mxu1 %v2174_v29 }
 0x37b   : >> { %5251 = vmatpush3.msra.mxu0 %v2174_v29  ;;  %5572 = vmatpush3.msra.mxu1 %v2174_v29  ;;  %v2447_v29 = vfloor.f32 %v2431_v32 }
 0x37c   : >> { %5252 = vmatprep.subr.mxu0 %v2173_v42  ;;  %5557 = vmatprep.subr.mxu1 %v2173_v42 }
 0x37d   : >> { %5253 = vmatpush3.msra.mxu0 %v2173_v42  ;;  %5573 = vmatpush3.msra.mxu1 %v2173_v42  ;;  %v2426_v42 = vmul.f32 0.0625, %v2410_v37  ;;  %v2495_v58 = vmul.f32 2.0, %v2447_v29 }
 0x37e   : >> { %5254 = vmatprep.mubr.f32.mxu0 %v4450_v40  ;;  %5266 = vmatprep.mubr.f32.mxu1 %v4458_v16  ;;  %v2393_v40 = vcvt.s32.f32 %v8308_v60  ;;  %v2401_v16 = vcvt.s32.f32 %v8312_v38 }
 0x37f   : >> { %5255 = vmatmul.mubr.f32.vlgmr.msra.gmra.mxu0 %v4451_v43  ;;  %5267 = vmatmul.mubr.f32.vlgmr.msra.gmra.mxu1 %v4459_v53  ;;  %v2472_v43 = vsub.f32 %v2392_v31, %v2456_v14  ;;  %v2455_v53 = vmul.f32 16.0, %v2439_v19 }
 0x380   : >> { %5257 = vmatprep.mubr.f32.mxu0 %v4452_v51  ;;  %5269 = vmatprep.mubr.f32.mxu1 %v4460_v21  ;;  %v2434_v51 = vmul.f32 0.0625, %v2418_v27  ;;  %v8320_v21 = vadd.s32 %v8289_v0, %v6289_v4  ;;  %v8352_v27 = vadd.f32 1.0, %v2487_v59  ;;  %v2898_v4 = vld [vmem:[#allocation8 + $0x50] sm:$0xff] (%p2150_p1) }
 0x382   : >> { %v2450_v12 = vfloor.f32 %v2434_v51  ;;  %v2396_v63 = vcvt.s32.f32 %v8320_v21  ;;  %vm2551_vm11 = vcmp.ge.f32.partialorder %v8352_v27, 1.0  ;;  %vm2567_vm14 = vcmp.le.f32.partialorder %v8352_v27, 16.0 }
 0x383   : >> { %5258 = vmatmul.mubr.f32.gmra.mxu0 %v4453_v30  ;;  %5270 = vmatmul.mubr.f32.gmra.mxu1 %v4461_v22  ;;  %v2480_v30 = vsub.f32 %v2400_v1, %v2464_v7  ;;  %v2463_v22 = vmul.f32 16.0, %v2447_v29  ;;  %v2395_v29 = vcvt.s32.f32 %v8334_v11 }
 0x384   : >> { %5260 = vmatprep.mubr.f32.mxu0 %v4454_v28  ;;  %5272 = vmatprep.mubr.f32.mxu1 %v4462_v8  ;;  %v2442_v28 = vfloor.f32 %v2426_v42  ;;  %v2409_v8 = vadd.f32 0.5, %v2393_v40  ;;  %v2412_v20 = vadd.f32 0.5, %v2396_v63  ;;  %v2466_v14 = vmul.f32 16.0, %v2450_v12 }
 0x385   : >> { %v2528_v31 = vmul.f32 2.0, %v2480_v30  ;;  %v2479_v41 = vsub.f32 %v2399_v47, %v2463_v22  ;;  %v2403_v42 = vcvt.s32.f32 %v8338_v61  ;;  %v2498_v22 = vmul.f32 2.0, %v2450_v12 }
 0x386   : >> { %v2458_v1 = vmul.f32 16.0, %v2442_v28  ;;  %v2425_v5 = vmul.f32 0.0625, %v2409_v8  ;;  %v2490_v51 = vmul.f32 2.0, %v2442_v28  ;;  %v8366_v8 = vmul.f32 0.0625, %v2412_v20 }
 0x387   : >> { %5261 = vmatmul.mubr.f32.gmra.mxu0 %v4455_v3  ;;  %5273 = vmatmul.mubr.f32.gmra.mxu1 %v4463_v13  ;;  %v8326_v3 = vadd.s32 %v8289_v0, %v6294_v6  ;;  %v2488_v13 = vmul.f32 2.0, %v2440_v54  ;;  %v2527_v32 = vmul.f32 2.0, %v2479_v41  ;;  %v2482_v28 = vsub.f32 %v2402_v55, %v2466_v14  ;;  %v2946_v6 = vld [vmem:[#allocation8 + $0x1d0] sm:$0xff] (%p2150_p1) }
 0x388   : >> { %5263 = vmatprep.mubr.f32.mxu0 %v4456_v15  ;;  %5275 = vmatprep.mubr.f32.mxu1 %v4464_v36  ;;  %v2496_v15 = vmul.f32 2.0, %v2448_v44  ;;  %v2417_v36 = vadd.f32 0.5, %v2401_v16  ;;  %v8350_v44 = vadd.s32 %v8289_v0, %v6319_v25  ;;  %v2474_v37 = vsub.f32 %v2394_v2, %v2458_v1  ;;  %v2897_v25 = vld [vmem:[#allocation8 + $0x48] sm:$0xff] (%p2150_p1) }
 0x389   : >> { %v2404_v24 = vcvt.s32.f32 %v8326_v3  ;;  %v8340_v10 = vadd.f32 1.0, %v2488_v13  ;;  %v2441_v19 = vfloor.f32 %v2425_v5  ;;  %v2411_v12 = vadd.f32 0.5, %v2395_v29 }
 0x38a   : >> { %v2433_v26 = vmul.f32 0.0625, %v2417_v36  ;;  %v2398_v13 = vcvt.s32.f32 %v8350_v44  ;;  %v2522_v36 = vmul.f32 2.0, %v2474_v37  ;;  %v8385_v41 = vadd.f32 1.0, %v2490_v51 }
 0x38b   : >> { %5264 = vmatmul.mubr.f32.gmra.mxu0 %v4457_v52  ;;  %5276 = vmatmul.mubr.f32.gmra.mxu1 %v4465_v50  ;;  %v2520_v52 = vmul.f32 2.0, %v2472_v43  ;;  %v2471_v50 = vsub.f32 %v2391_v48, %v2455_v53  ;;  %v8342_v48 = vadd.f32 1.0, %v2496_v15  ;;  %v2420_v7 = vadd.f32 0.5, %v2404_v24 }
 0x38c   : >> { %v8358_v43 = vadd.f32 1.0, %v2528_v31  ;;  %v8360_v53 = vadd.f32 1.0, %v2495_v58  ;;  %v2449_v30 = vfloor.f32 %v2433_v26  ;;  %vm2552_vm12 = vcmp.ge.f32.partialorder %v8340_v10, 1.0 }
 0x38d   : >> { %v8344_v47 = vadd.f32 1.0, %v2520_v52  ;;  %v2519_v54 = vmul.f32 2.0, %v2471_v50  ;;  %vm2568_vm13 = vcmp.le.f32.partialorder %v8340_v10, 16.0  ;;  %vm2560_vm15 = vcmp.ge.f32.partialorder %v8342_v48, 1.0 }
 0x38e   : >> { %vm2576_vm2 = vcmp.le.f32.partialorder %v8342_v48, 16.0  ;;  %v8371_v15 = vadd.f32 1.0, %v2527_v32  ;;  %v2457_v52 = vmul.f32 16.0, %v2441_v19  ;;  %v8377_v50 = vmul.f32 0.0625, %v2420_v7  ;;  %vm8432_vm0 = vmand %vm2552_vm12, %vm2568_vm13 }
 0x38f   : >> { %v8364_v2 = vadd.f32 1.0, %v2519_v54  ;;  %v2419_v31 = vadd.f32 0.5, %v2403_v42  ;;  %vm2600_vm9 = vcmp.ge.f32.partialorder %v8344_v47, 1.0  ;;  %vm2559_vm10 = vcmp.ge.f32.partialorder %v8360_v53, 1.0  ;;  %vm8445_vm1 = vmand %vm2560_vm15, %vm2576_vm2 }
 0x390   : >> { %v2465_v23 = vmul.f32 16.0, %v2449_v30  ;;  %v8389_v55 = vadd.s32 %v8289_v0, %v6351_v49  ;;  %v8393_v1 = vadd.s32 %v8289_v0, %v6362_v62  ;;  %vm2608_vm7 = vcmp.ge.f32.partialorder %v8358_v43, 1.0  ;;  %vm8459_vm13 = vmand %vm2551_vm11, %vm2567_vm14  ;;  %v2945_v49 = vld [vmem:[#allocation8 + $0x1c8] sm:$0xff] (%p2150_p1)  ;;  %v2912_v62 = vld [vmem:[#allocation8 + $0xc0] sm:$0xff] (%p2150_p1) }
 0x391   : >> { %vm2575_vm8 = vcmp.le.f32.partialorder %v8360_v53, 16.0  ;;  %v8397_v5 = vadd.f32 1.0, %v2498_v22  ;;  %v2444_v59 = vfloor.f32 %v8366_v8  ;;  %v2414_v58 = vadd.f32 0.5, %v2398_v13  ;;  %vm8472_vm2 = vmand %vm8432_vm0, %vm2600_vm9 }
 0x392   : >> { %vm2599_vm4 = vcmp.ge.f32.partialorder %v8364_v2, 1.0  ;;  %v8403_v26 = vadd.f32 1.0, %v2522_v36  ;;  %v2530_v54 = vmul.f32 2.0, %v2482_v28  ;;  %v2473_v20 = vsub.f32 %v2393_v40, %v2457_v52  ;;  %vm8482_vm15 = vmand %vm2559_vm10, %vm2575_vm8 }
 0x393   : >> { %v8409_v32 = vadd.s32 %v8289_v0, %v6375_v9  ;;  %vm2607_vm3 = vcmp.ge.f32.partialorder %v8371_v15, 1.0  ;;  %v2489_v37 = vmul.f32 2.0, %v2441_v19  ;;  %v2452_v14 = vfloor.f32 %v8377_v50  ;;  %vm8492_vm9 = vmand %vm8445_vm1, %vm2608_vm7  ;;  %v2929_v9 = vld [vmem:[#allocation8 + $0x148] sm:$0xff] (%p2150_p1) }
 0x394   : >> { %v2427_v7 = vmul.f32 0.0625, %v2411_v12  ;;  %v8413_v51 = vmul.f32 0.0625, %v2419_v31  ;;  %v2481_v22 = vsub.f32 %v2401_v16, %v2465_v23  ;;  %v2406_v60 = vcvt.s32.f32 %v8389_v55  ;;  %vm8502_vm10 = vmand %vm8459_vm13, %vm2599_vm4  ;;  %v8664_v55 = vld [vmem:[%s9519_s2] ss:$0 sm:$0xff] }
 0x395   : >> { %v2397_v40 = vcvt.s32.f32 %v8393_v1  ;;  %vm2570_vm5 = vcmp.le.f32.partialorder %v8385_v41, 16.0  ;;  %v2497_v0 = vmul.f32 2.0, %v2449_v30  ;;  %v2460_v8 = vmul.f32 16.0, %v2444_v59  ;;  %vm8513_vm14 = vmand %vm8482_vm15, %vm2607_vm3  ;;  %v2919_v1 = vld [vmem:[#allocation8 + $0xf8] sm:$0xff] (%p2150_p1) }
 0x396   : >> { %v8421_v36 = vmul.f32 0.0625, %v2414_v58  ;;  %v8423_v19 = vadd.f32 1.0, %v2530_v54  ;;  %v2521_v28 = vmul.f32 2.0, %v2473_v20  ;;  %v2405_v52 = vcvt.s32.f32 %v8409_v32  ;;  %4638 = vmatprep.subr.mxu0 (%p2150_p1), %v2919_v1  ;;  %v2936_v1 = vld [vmem:[#allocation8 + $0x180] sm:$0xff] (%p2150_p1) }
 0x397   : >> { %v2505_v50 = vadd.f32 1.0, %v2489_v37  ;;  %v2468_v38 = vmul.f32 16.0, %v2452_v14  ;;  %v2443_v16 = vfloor.f32 %v2427_v7  ;;  %v2451_v12 = vfloor.f32 %v8413_v51 }
 0x398   : >> { %vm2578_vm6 = vcmp.le.f32.partialorder %v8397_v5, 16.0  ;;  %v2529_v31 = vmul.f32 2.0, %v2481_v22  ;;  %v2422_v23 = vadd.f32 0.5, %v2406_v60  ;;  %v2413_v58 = vadd.f32 0.5, %v2397_v40 }
 0x399   : >> { %v8450_v10 = vadd.f32 1.0, %v2497_v0  ;;  %v2476_v20 = vsub.f32 %v2396_v63, %v2460_v8  ;;  %v2446_v37 = vfloor.f32 %v8421_v36  ;;  %v8464_v48 = vadd.f32 1.0, %v2521_v28 }
 0x39a   : >> { %v2492_v51 = vmul.f32 2.0, %v2444_v59  ;;  %v2421_v22 = vadd.f32 0.5, %v2405_v52  ;;  %vm2553_vm12 = vcmp.ge.f32.partialorder %v2505_v50, 1.0  ;;  %v2484_v27 = vsub.f32 %v2404_v24, %v2468_v38 }
 0x39b   : >> { %v2459_v59 = vmul.f32 16.0, %v2443_v16  ;;  %v2467_v0 = vmul.f32 16.0, %v2451_v12  ;;  %v8496_v36 = vadd.f32 1.0, %v2529_v31  ;;  %v2500_v53 = vmul.f32 2.0, %v2452_v14 }
 0x39c   : >> { %v2438_v28 = vmul.f32 0.0625, %v2422_v23  ;;  %v2429_v30 = vmul.f32 0.0625, %v2413_v58  ;;  %vm2569_vm1 = vcmp.le.f32.partialorder %v2505_v50, 16.0  ;;  %v2524_v24 = vmul.f32 2.0, %v2476_v20 }
 0x39d   : >> { %v2462_v38 = vmul.f32 16.0, %v2446_v37  ;;  %vm2601_vm4 = vcmp.ge.f32.partialorder %v8464_v48, 1.0  ;;  %vm2577_vm13 = vcmp.le.f32.partialorder %v8450_v10, 16.0  ;;  %v2508_v31 = vadd.f32 1.0, %v2492_v51  ;;  %vm8544_vm0 = vmand %vm2553_vm12, %vm2569_vm1 }
 0x39e   : >> { %v2437_v23 = vmul.f32 0.0625, %v2421_v22  ;;  %vm9985_vm7 = vcmp.ge.f32.partialorder %v8385_v41, 1.0  ;;  %v2532_v54 = vmul.f32 2.0, %v2484_v27  ;;  %v2475_v20 = vsub.f32 %v2395_v29, %v2459_v59 }
 0x39f   : >> { %vm8523_vm8 = vmand %vm9985_vm7, %vm2570_vm5  ;;  %v2491_v7 = vmul.f32 2.0, %v2443_v16  ;;  %v2483_v63 = vsub.f32 %v2403_v42, %v2467_v0  ;;  %vm9988_vm15 = vcmp.ge.f32.partialorder %v8397_v5, 1.0  ;;  %v2516_v11 = vadd.f32 1.0, %v2500_v53 }
 0x3a0   : >> { %vm8536_vm11 = vmand %vm9988_vm15, %vm2578_vm6  ;;  %v2454_v29 = vfloor.f32 %v2438_v28  ;;  %v2445_v16 = vfloor.f32 %v2429_v30  ;;  %v8549_v42 = vadd.f32 1.0, %v2524_v24  ;;  %v2499_v5 = vmul.f32 2.0, %v2451_v12 }
 0x3a1   : >> { %v2478_v51 = vsub.f32 %v2398_v13, %v2462_v38  ;;  %v2494_v22 = vmul.f32 2.0, %v2446_v37  ;;  %vm9993_vm6 = vcmp.ge.f32.partialorder %v8403_v26, 1.0  ;;  %vm2572_vm5 = vcmp.le.f32.partialorder %v2508_v31, 16.0 }
 0x3a2   : >> { %vm8557_vm15 = vmand %vm8523_vm8, %vm9993_vm6  ;;  %v2453_v50 = vfloor.f32 %v2437_v23  ;;  %vm9996_vm3 = vcmp.ge.f32.partialorder %v8423_v19, 1.0  ;;  %v8570_v13 = vadd.f32 1.0, %v2532_v54  ;;  %v2507_v12 = vadd.f32 1.0, %v2491_v7 }
 0x3a3   : >> { %vm8566_vm7 = vmand %vm8536_vm11, %vm9996_vm3  ;;  %v2523_v37 = vmul.f32 2.0, %v2475_v20  ;;  %v2531_v59 = vmul.f32 2.0, %v2483_v63  ;;  %v2470_v53 = vmul.f32 16.0, %v2454_v29  ;;  %v2461_v28 = vmul.f32 16.0, %v2445_v16 }
 0x3a4   : >> { %vm8576_vm8 = vmand %vm8544_vm0, %vm2601_vm4  ;;  %vm10001_vm11 = vcmp.ge.f32.partialorder %v8450_v10, 1.0  ;;  %v2515_v24 = vadd.f32 1.0, %v2499_v5  ;;  %v2510_v38 = vadd.f32 1.0, %v2494_v22  ;;  %v2526_v23 = vmul.f32 2.0, %v2478_v51  ;;  %v2951_v51 = vld [vmem:[#allocation8 + $0x1f8] sm:$0xff] (%p2150_p1) }
 0x3a5   : >> { %vm8584_vm3 = vmand %vm10001_vm11, %vm2577_vm13  ;;  %vm10004_vm0 = vcmp.le.f32.partialorder %v8344_v47, 16.0  ;;  %v10005_v58 = vmov 0  ;;  %vm10007_vm6 = vcmp.le.f32.partialorder %v8358_v43, 16.0  ;;  %vm10010_vm11 = vcmp.ge.f32.partialorder %v2508_v31, 1.0  ;;  %4718 = vmatprep.subr.mxu1 (%p2150_p1), %v2951_v51 }
 0x3a6   : >> { %vm8593_vm4 = vmand %vm8472_vm2, %vm10004_vm0  ;;  %v2502_v47 = vmul.f32 2.0, %v2454_v29  ;;  %v2493_v21 = vmul.f32 2.0, %v2445_v16  ;;  %v2469_v20 = vmul.f32 16.0, %v2453_v50  ;;  %vm10013_vm2 = vcmp.le.f32.partialorder %v2516_v11, 16.0 }
 0x3a7   : >> { %v10006_v58 = vsel %vm8593_vm4, 4294967295, %v10005_v58  ;;  %vm8601_vm13 = vmand %vm8492_vm9, %vm10007_vm6  ;;  %vm10014_vm0 = vcmp.ge.f32.partialorder %v2516_v11, 1.0  ;;  %vm2612_vm9 = vcmp.ge.f32.partialorder %v8570_v13, 1.0  ;;  %v8619_v8 = vadd.f32 1.0, %v2523_v37 }
 0x3a8   : >> { %vm8607_vm1 = vmand %vm10010_vm11, %vm2572_vm5  ;;  %v8621_v31 = vadd.f32 1.0, %v2531_v59  ;;  %vm10017_vm5 = vcmp.le.f32.partialorder %v8364_v2, 16.0  ;;  %v10021_v63 = vmov 0  ;;  %vm10023_vm12 = vcmp.ge.f32.partialorder %v8496_v36, 1.0 }
 0x3a9   : >> { %vm8614_vm4 = vmand %vm10014_vm0, %vm10013_vm2  ;;  %vm10020_vm2 = vcmp.le.f32.partialorder %v8371_v15, 16.0  ;;  %v2486_v3 = vsub.f32 %v2406_v60, %v2470_v53  ;;  %v2477_v15 = vsub.f32 %v2397_v40, %v2461_v28  ;;  %v2501_v14 = vmul.f32 2.0, %v2453_v50 }
 0x3aa   : >> { %vm8627_vm11 = vmand %vm8502_vm10, %vm10017_vm5  ;;  %v8659_v11 = vadd.f32 1.0, %v2526_v23  ;;  %v8674_v60 = vadd.f32 1.0, %v2502_v47  ;;  %v8676_v40 = vadd.f32 1.0, %v2493_v21  ;;  %v2485_v29 = vsub.f32 %v2405_v52, %v2469_v20 }
 0x3ab   : >> { %vm8635_vm0 = vmand %vm8513_vm14, %vm10020_vm2  ;;  %vm10026_vm14 = vcmp.ge.f32.partialorder %v8549_v42, 1.0  ;;  %v10032_v16 = vmov 0  ;;  %v10045_v5 = vmov 0  ;;  %v2525_v22 = vmul.f32 2.0, %v2477_v15 }
 0x3ac   : >> { %v10022_v63 = vsel %vm8635_vm0, 4294967295, %v10021_v63  ;;  %vm8643_vm6 = vmand %vm8584_vm3, %vm10023_vm12  ;;  %vm10037_vm12 = vcmp.le.f32.partialorder %v2507_v12, 16.0  ;;  %vm10038_vm3 = vcmp.ge.f32.partialorder %v2507_v12, 1.0  ;;  %v8729_v27 = vadd.f32 1.0, %v2501_v14 }
 0x3ad   : >> { %vm8655_vm5 = vmand %vm8607_vm1, %vm10026_vm14  ;;  %vm10031_vm14 = vcmp.le.f32.partialorder %v8403_v26, 16.0  ;;  %v8788_v20 = vadd.f32 1.0, %v2525_v22 }
 0x3ae   : >> { %vm8670_vm10 = vmand %vm8614_vm4, %vm2612_vm9  ;;  %vm10034_vm4 = vcmp.le.f32.partialorder %v8423_v19, 16.0 }
 0x3af   : >> { %vm8684_vm2 = vmand %vm8557_vm15, %vm10031_vm14  ;;  %vm10047_vm14 = vcmp.le.f32.partialorder %v2515_v24, 16.0 }
 0x3b0   : >> { %v10033_v16 = vsel %vm8684_vm2, 4294967295, %v10032_v16  ;;  %vm8692_vm9 = vmand %vm8566_vm7, %vm10034_vm4  ;;  %vm10041_vm7 = vcmp.le.f32.partialorder %v8464_v48, 16.0  ;;  %vm10048_vm2 = vcmp.ge.f32.partialorder %v2515_v24, 1.0  ;;  %v2534_v48 = vmul.f32 2.0, %v2486_v3 }
 0x3b1   : >> { %vm8699_vm0 = vmand %vm10038_vm3, %vm10037_vm12  ;;  %vm10044_vm12 = vcmp.le.f32.partialorder %v8496_v36, 16.0 }
 0x3b2   : >> { %vm8710_vm4 = vmand %vm8576_vm8, %vm10041_vm7  ;;  %vm10051_vm8 = vcmp.le.f32.partialorder %v2510_v38, 16.0  ;;  %v8786_v21 = vadd.f32 1.0, %v2534_v48 }
 0x3b3   : >> { %vm8718_vm3 = vmand %vm8643_vm6, %vm10044_vm12  ;;  %vm10052_vm6 = vcmp.ge.f32.partialorder %v2510_v38, 1.0  ;;  %vm10055_vm12 = vcmp.le.f32.partialorder %v8549_v42, 16.0 }
 0x3b4   : >> { %v10046_v5 = vsel %vm8718_vm3, 4294967295, %v10045_v5  ;;  %vm8724_vm15 = vmand %vm10048_vm2, %vm10047_vm14  ;;  %vm10058_vm3 = vcmp.le.f32.partialorder %v8570_v13, 16.0  ;;  %v2533_v13 = vmul.f32 2.0, %v2485_v29  ;;  %vm2573_vm2 = vcmp.le.f32.partialorder %v8676_v40, 16.0 }
 0x3b5   : >> { %vm8735_vm7 = vmand %vm10052_vm6, %vm10051_vm8  ;;  %vm10061_vm6 = vcmp.ge.f32.partialorder %v8619_v8, 1.0 }
 0x3b6   : >> { %vm8745_vm1 = vmand %vm8655_vm5, %vm10055_vm12  ;;  %vm2566_vm5 = vcmp.ge.f32.partialorder %v8674_v60, 1.0  ;;  %vm2582_vm12 = vcmp.le.f32.partialorder %v8674_v60, 16.0  ;;  %v8819_v29 = vadd.f32 1.0, %v2533_v13  ;;  %v2916_v60 = vld [vmem:[#allocation8 + $0xe0] sm:$0xff] (%p2150_p1) }
 0x3b7   : >> { %vm8753_vm8 = vmand %vm8670_vm10, %vm10058_vm3  ;;  %vm10064_vm10 = vcmp.ge.f32.partialorder %v8621_v31, 1.0  ;;  %vm10067_vm3 = vcmp.ge.f32.partialorder %v8659_v11, 1.0 }
 0x3b8   : >> { %vm8761_vm14 = vmand %vm8699_vm0, %vm10061_vm6 }
 0x3b9   : >> { %vm8774_vm0 = vmand %vm8724_vm15, %vm10064_vm10  ;;  %vm10070_vm10 = vnez %v10006_v58  ;;  %vm10078_vm15 = vcmp.le.f32.partialorder %v8659_v11, 16.0 }
 0x3ba   : >> { %vm8782_vm6 = vmand %vm8735_vm7, %vm10067_vm3  ;;  %vm10071_vm7 = vcmp.le.f32.partialorder %v8619_v8, 16.0 }
 0x3bb   : >> { %vm8800_vm3 = vmand %vm8761_vm14, %vm10071_vm7  ;;  %vm10077_vm7 = vnez %v10022_v63  ;;  %v2917_v63 = vld [vmem:[#allocation8 + $0xe8] sm:$0xff] (%p2150_p1) }
 0x43f   : >> { %v5256_v32 = vpop.f32.mrf.mxu0  ;;  %v5268_v19 = vpop.f32.mrf.mxu1 }
 0x440   : >> { %v2268_v36 = vadd.f32 %v5256_v32, %v8664_v55  ;;  %v2308_v50 = vadd.f32 %v5268_v19, %v8664_v55 }
 0x441   : >> { %v2262_v12 = vpop.f32.mrf.mxu0  ;;  %v2302_v37 = vpop.f32.mrf.mxu1 }
 0x442   : >> { %v2342_v53 = vmax.f32 %v2268_v36, 0.0  ;;  %v2350_v28 = vmax.f32 %v2308_v50, 0.0  ;;  %v2263_v30 = vadd.f32 %v8664_v55, %v2262_v12  ;;  %v2303_v24 = vadd.f32 %v8664_v55, %v2302_v37 }
 0x443   : >> { %v5259_v23 = vpop.f32.mrf.mxu0  ;;  %v5271_v54 = vpop.f32.mrf.mxu1 }
 0x444   : >> { %v2696_v43 = vsel %vm10070_vm10, %v2342_v53, 0.0  ;;  %v2704_v2 = vsel %vm8601_vm13, %v2350_v28, 0.0  ;;  %v2341_v3 = vmax.f32 %v2263_v30, 0.0  ;;  %v2349_v15 = vmax.f32 %v2303_v24, 0.0 }
 0x445   : >> { %4469 = vst [vmem:[%s8805_s17 + $0x308] sm:$0xff] %v2696_v43  ;;  %4477 = vst [vmem:[%s8805_s17 + $0x348] sm:$0xff] %v2704_v2  ;;  %v2278_v58 = vadd.f32 %v5259_v23, %v8664_v55  ;;  %v2318_v10 = vadd.f32 %v5271_v54, %v8664_v55  ;;  %v2272_v41 = vpop.f32.mrf.mxu0  ;;  %v2312_v8 = vpop.f32.mrf.mxu1  ;;  %vm10074_vm13 = vcmp.le.f32.partialorder %v8621_v31, 16.0  ;;  %vm2581_vm10 = vcmp.le.f32.partialorder %v8729_v27, 16.0  ;;  %v2941_v23 = vld [vmem:[#allocation8 + $0x1a8] sm:$0xff] (%p2150_p1) }
 0x446   : >> { %vm8815_vm14 = vmand %vm8774_vm0, %vm10074_vm13  ;;  %v2695_v26 = vsel %vm8627_vm11, %v2341_v3, 0.0  ;;  %v2703_v32 = vsel %vm10077_vm7, %v2349_v15, 0.0  ;;  %v2273_v19 = vadd.f32 %v8664_v55, %v2272_v41  ;;  %v2313_v31 = vadd.f32 %v8664_v55, %v2312_v8  ;;  %v2907_v3 = vld [vmem:[#allocation8 + $0x98] sm:$0xff] (%p2150_p1) }
 0x447   : >> { %vm8832_vm0 = vmand %vm8782_vm6, %vm10078_vm15  ;;  %4468 = vst [vmem:[%s8805_s17 + $0x300] sm:$0xff] %v2695_v26  ;;  %v2344_v48 = vmax.f32 %v2278_v58, 0.0  ;;  %v2352_v7 = vmax.f32 %v2318_v10, 0.0  ;;  %v5262_v22 = vpop.f32.mrf.mxu0  ;;  %v5274_v36 = vpop.f32.mrf.mxu1  ;;  %vm10083_vm13 = vcmp.ge.f32.partialorder %v8676_v40, 1.0  ;;  %vm2646_vm7 = vcmp.le.f32.partialorder %v8786_v21, 16.0  ;;  %v2928_v40 = vld [vmem:[#allocation8 + $0x140] sm:$0xff] (%p2150_p1) }
 0x448   : >> { %4476 = vst [vmem:[%s8805_s17 + $0x340] sm:$0xff] %v2703_v32  ;;  %vm8842_vm11 = vmand %vm2566_vm5, %vm2582_vm12  ;;  %v2343_v11 = vmax.f32 %v2273_v19, 0.0  ;;  %v2351_v50 = vmax.f32 %v2313_v31, 0.0  ;;  %v2288_v44 = vadd.f32 %v5262_v22, %v8664_v55  ;;  %v2328_v12 = vadd.f32 %v5274_v36, %v8664_v55  ;;  %v2902_v22 = vld [vmem:[#allocation8 + $0x70] sm:$0xff] (%p2150_p1)  ;;  %v2935_v36 = vld [vmem:[#allocation8 + $0x178] sm:$0xff] (%p2150_p1) }
 0x449   : >> { %vm8854_vm5 = vmand %vm10083_vm13, %vm2573_vm2  ;;  %vm10086_vm12 = vnez %v10033_v16  ;;  %v2706_v42 = vsel %vm8692_vm9, %v2352_v7, 0.0  ;;  %v2282_v13 = vpop.f32.mrf.mxu0  ;;  %v2322_v53 = vpop.f32.mrf.mxu1  ;;  %vm10087_vm15 = vcmp.ge.f32.partialorder %v8729_v27, 1.0  ;;  %vm2613_vm2 = vcmp.ge.f32.partialorder %v8819_v29, 1.0  ;;  %v2918_v7 = vld [vmem:[#allocation8 + $0xf0] sm:$0xff] (%p2150_p1)  ;;  %4719 = vmatpush3.msra.mxu1 (%p2150_p1), %v2935_v36 }
 0x44a   : >> { %v2698_v37 = vsel %vm10086_vm12, %v2344_v48, 0.0  ;;  %vm8867_vm6 = vmand %vm10087_vm15, %vm2581_vm10  ;;  %4479 = vst [vmem:[%s8805_s17 + $0x358] sm:$0xff] %v2706_v42  ;;  %v2697_v16 = vsel %vm8710_vm4, %v2343_v11, 0.0  ;;  %vm10090_vm9 = vnez %v10046_v5  ;;  %v2346_v28 = vmax.f32 %v2288_v44, 0.0  ;;  %v2950_v11 = vld [vmem:[#allocation8 + $0x1f0] sm:$0xff] (%p2150_p1)  ;;  %v2896_v42 = vld [vmem:[#allocation8 + $0x40] sm:$0xff] (%p2150_p1) }
 0x44b   : >> { %4471 = vst [vmem:[%s8805_s17 + $0x318] sm:$0xff] %v2698_v37  ;;  %v2705_v61 = vsel %vm10090_vm9, %v2351_v50, 0.0  ;;  %v2354_v30 = vmax.f32 %v2328_v12, 0.0  ;;  %vm10091_vm13 = vcmp.ge.f32.partialorder %v8786_v21, 1.0  ;;  %4470 = vst [vmem:[%s8805_s17 + $0x310] sm:$0xff] %v2697_v16  ;;  %v2283_v52 = vadd.f32 %v8664_v55, %v2282_v13  ;;  %v5265_v5 = vpop.f32.mrf.mxu0  ;;  %v5277_v38 = vpop.f32.mrf.mxu1  ;;  %v2901_v50 = vld [vmem:[#allocation8 + $0x68] sm:$0xff] (%p2150_p1)  ;;  %4720 = vmatprep.subr.mxu1 (%p2150_p1), %v2950_v11 }
 0x44c   : >> { %vm8882_vm10 = vmand %vm8842_vm11, %vm10091_vm13  ;;  %4478 = vst [vmem:[%s8805_s17 + $0x350] sm:$0xff] %v2705_v61  ;;  %v2323_v24 = vadd.f32 %v8664_v55, %v2322_v53  ;;  %vm10094_vm4 = vcmp.ge.f32.partialorder %v8788_v20, 1.0  ;;  %vm2637_vm11 = vcmp.le.f32.partialorder %v8788_v20, 16.0  ;;  %vm2645_vm12 = vcmp.le.f32.partialorder %v8819_v29, 16.0  ;;  %v2903_v29 = vld [vmem:[#allocation8 + $0x78] sm:$0xff] (%p2150_p1)  ;;  %v2934_v44 = vld [vmem:[#allocation8 + $0x170] sm:$0xff] (%p2150_p1) }
 0x44d   : >> { %vm8894_vm15 = vmand %vm8854_vm5, %vm10094_vm4  ;;  %v2700_v54 = vsel %vm8745_vm1, %v2346_v28, 0.0  ;;  %v2708_v47 = vsel %vm8753_vm8, %v2354_v30, 0.0  ;;  %v2298_v43 = vadd.f32 %v5265_v5, %v8664_v55  ;;  %v2338_v2 = vadd.f32 %v5277_v38, %v8664_v55  ;;  %v2292_v0 = vpop.f32.mrf.mxu0  ;;  %v2332_v58 = vpop.f32.mrf.mxu1  ;;  %4639 = vmatpush3.msra.mxu0 (%p2150_p1), %v2903_v29  ;;  %v2949_v12 = vld [vmem:[#allocation8 + $0x1e8] sm:$0xff] (%p2150_p1)  ;;  %4721 = vmatpush3.msra.mxu1 (%p2150_p1), %v2934_v44  ;;  %v2944_v13 = vld [vmem:[#allocation8 + $0x1c0] sm:$0xff] (%p2150_p1) }
 0x44e   : >> { %vm8910_vm5 = vmand %vm8867_vm6, %vm2613_vm2  ;;  %4473 = vst [vmem:[%s8805_s17 + $0x328] sm:$0xff] %v2700_v54  ;;  %v2345_v59 = vmax.f32 %v2283_v52, 0.0  ;;  %v2353_v15 = vmax.f32 %v2323_v24, 0.0  ;;  %v2293_v8 = vadd.f32 %v8664_v55, %v2292_v0  ;;  %v2333_v21 = vadd.f32 %v8664_v55, %v2332_v58  ;;  %4640 = vmatprep.subr.mxu0 (%p2150_p1), %v2918_v7  ;;  %v2933_v37 = vld [vmem:[#allocation8 + $0x168] sm:$0xff] (%p2150_p1)  ;;  %4722 = vmatprep.subr.mxu1 (%p2150_p1), %v2949_v12  ;;  %v2911_v53 = vld [vmem:[#allocation8 + $0xb8] sm:$0xff] (%p2150_p1) }
 0x44f   : >> { %4481 = vst [vmem:[%s8805_s17 + $0x368] sm:$0xff] %v2708_v47  ;;  %vm2662_vm1 = vmand %vm8882_vm10, %vm2646_vm7  ;;  %v2348_v10 = vmax.f32 %v2298_v43, 0.0  ;;  %v2356_v41 = vmax.f32 %v2338_v2, 0.0  ;;  %4641 = vmatpush3.msra.mxu0 (%p2150_p1), %v2902_v22  ;;  %4723 = vmatpush3.msra.mxu1 (%p2150_p1), %v2933_v37  ;;  %v2895_v16 = vld [vmem:[#allocation8 + $0x38] sm:$0xff] (%p2150_p1)  ;;  %v2910_v28 = vld [vmem:[#allocation8 + $0xb0] sm:$0xff] (%p2150_p1) }
 0x450   : >> { %vm2653_vm8 = vmand %vm8894_vm15, %vm2637_vm11  ;;  %v2699_v26 = vsel %vm8800_vm3, %v2345_v59, 0.0  ;;  %v2707_v32 = vsel %vm8815_vm14, %v2353_v15, 0.0  ;;  %v2347_v31 = vmax.f32 %v2293_v8, 0.0  ;;  %v2355_v48 = vmax.f32 %v2333_v21, 0.0  ;;  %2152 = sbr.rel (!%p2150_p1) target bundleno = 861 (0x35d), region = 195  ;;  %4642 = vmatprep.subr.mxu0 (%p2150_p1), %v2917_v63  ;;  %4724 = vmatprep.subr.mxu1 (%p2150_p1), %v2948_v34  ;;  %v2943_v61 = vld [vmem:[#allocation8 + $0x1b8] sm:$0xff] (%p2150_p1) }
 0x451   : >> { %vm2661_vm6 = vmand %vm8910_vm5, %vm2645_vm12  ;;  %4472 = vst [vmem:[%s8805_s17 + $0x320] sm:$0xff] %v2699_v26  ;;  %v2702_v20 = vsel %vm8832_vm0, %v2348_v10, 0.0  ;;  %v2710_v19 = vsel %vm2662_vm1, %v2356_v41, 0.0  ;;  %4643 = vmatpush3.msra.mxu0 (%p2150_p1), %v2901_v50  ;;  %4725 = vmatpush3.msra.mxu1 (%p2150_p1), %v2932_v39  ;;  %v2927_v30 = vld [vmem:[#allocation8 + $0x138] sm:$0xff] (%p2150_p1)  ;;  %v2894_v27 = vld [vmem:[#allocation8 + $0x30] sm:$0xff] (%p2150_p1) }
 0x452   : >> { %4480 = vst [vmem:[%s8805_s17 + $0x360] sm:$0xff] %v2707_v32  ;;  %4475 = vst [vmem:[%s8805_s17 + $0x338] sm:$0xff] %v2702_v20  ;;  %v2701_v55 = vsel %vm2653_vm8, %v2347_v31, 0.0  ;;  %v2709_v14 = vsel %vm2661_vm6, %v2355_v48, 0.0  ;;  %4644 = vmatprep.subr.mxu0 (%p2150_p1), %v2916_v60  ;;  %4726 = vmatprep.subr.mxu1 (%p2150_p1), %v2947_v46  ;;  %v2942_v52 = vld [vmem:[#allocation8 + $0x1b0] sm:$0xff] (%p2150_p1)  ;;  %v2909_v24 = vld [vmem:[#allocation8 + $0xa8] sm:$0xff] (%p2150_p1) }
 0x453   : >> { %4483 = vst [vmem:[%s8805_s17 + $0x378] sm:$0xff] %v2710_v19  ;;  %4474 = vst [vmem:[%s8805_s17 + $0x330] sm:$0xff] %v2701_v55  ;;  %4645 = vmatpush3.msra.mxu0 (%p2150_p1), %v2900_v33  ;;  %4727 = vmatpush3.msra.mxu1 (%p2150_p1), %v2931_v57  ;;  %v2926_v5 = vld [vmem:[#allocation8 + $0x130] sm:$0xff] (%p2150_p1)  ;;  %v2893_v38 = vld [vmem:[#allocation8 + $0x28] sm:$0xff] (%p2150_p1) }
 0x454   : >> { %4482 = vst [vmem:[%s8805_s17 + $0x370] sm:$0xff] %v2709_v14  ;;  %4646 = vmatprep.subr.mxu0 (%p2150_p1), %v2915_v35  ;;  %4728 = vmatprep.subr.mxu1 (%p2150_p1), %v2946_v6  ;;  %v2908_v54 = vld [vmem:[#allocation8 + $0xa0] sm:$0xff] (%p2150_p1)  ;;  %v2925_v47 = vld [vmem:[#allocation8 + $0x128] sm:$0xff] (%p2150_p1)  ;;  %v2891_v15 = vld [vmem:[#allocation8 + $0x18] sm:$0xff] (%p2150_p1)  ;;  %s5861_s17 = scalar_lea.vmem (%p2150_p1), %s9472_s28, 2048 }
 0x455   : > { %4647 = vmatpush3.msra.mxu0 %v2899_v45  ;;  %4729 = vmatpush3.msra.mxu1 %v2930_v18  ;;  %v2892_v43 = vld [vmem:[#allocation8 + $0x20] sm:$0xff]  ;;  %v2939_v0 = vld [vmem:[#allocation8 + $0x198] sm:$0xff]  ;;  %v2906_v58 = vld [vmem:[#allocation8 + $0x90] sm:$0xff]  ;;  %p5862_p13 = scmp.ne.s32.totalorder %s9472_s28, %s5861_s17 }
 0x456   : > { %4648 = vmatprep.subr.mxu0 %v2914_v56  ;;  %4730 = vmatprep.subr.mxu1 %v2945_v49  ;;  %v2940_v2 = vld [vmem:[#allocation8 + $0x1a0] sm:$0xff]  ;;  %v2923_v10 = vld [vmem:[#allocation8 + $0x118] sm:$0xff]  ;;  %v2890_v41 = vld [vmem:[#allocation8 + $0x10] sm:$0xff] }
 0x457   : > { %4649 = vmatpush3.msra.mxu0 %v2898_v4  ;;  %4731 = vmatpush3.msra.mxu1 %v2929_v9  ;;  %v2924_v59 = vld [vmem:[#allocation8 + $0x120] sm:$0xff]  ;;  %v2938_v8 = vld [vmem:[#allocation8 + $0x190] sm:$0xff]  ;;  %v2905_v21 = vld [vmem:[#allocation8 + $0x88] sm:$0xff]  ;;  %p5863_p11 = pnand %p5862_p13, %p10177_p0 }
 0x458   : > { %4650 = vmatprep.subr.mxu0 %v2913_v17  ;;  %4732 = vmatprep.subr.mxu1 %v2944_v13  ;;  %v2922_v26 = vld [vmem:[#allocation8 + $0x110] sm:$0xff]  ;;  %v2889_v32 = vld [vmem:[#allocation8 + $0x8] sm:$0xff]  ;;  %v2904_v19 = vld [vmem:[#allocation8 + $0x80] sm:$0xff] }
 0x459   : > { %4651 = vmatpush3.msra.mxu0 %v2897_v25  ;;  %4733 = vmatpush3.msra.mxu1 %v2928_v40  ;;  %v2937_v20 = vld [vmem:[#allocation8 + $0x188] sm:$0xff]  ;;  %v2888_v48 = vld [vmem:[#allocation8] sm:$0xff]  ;;  %v2983_v29 = vld [vmem:[#allocation8 + $0x2f8] sm:$0xff]  ;;  %p5864_p5 = pneg %p5863_p11 }
 0x45a   : > { %4652 = vmatprep.subr.mxu0 %v2912_v62  ;;  %4734 = vmatprep.subr.mxu1 %v2943_v61  ;;  %v2921_v55 = vld [vmem:[#allocation8 + $0x108] sm:$0xff]  ;;  %v2920_v7 = vld [vmem:[#allocation8 + $0x100] sm:$0xff]  ;;  %v2967_v22 = vld [vmem:[#allocation8 + $0x278] sm:$0xff] }
 0x45b   : > { %4653 = vmatpush3.msra.mxu0 %v2896_v42  ;;  %4735 = vmatpush3.msra.mxu1 %v2927_v30  ;;  %v2746_v31 = vld [vmem:[#allocation2 + $0x100] sm:$0xff]  ;;  %v2747_v63 = vld [vmem:[#allocation2 + $0x108] sm:$0xff]  ;;  %v2982_v50 = vld [vmem:[#allocation8 + $0x2f0] sm:$0xff] }
 0x45c   : > { %4654 = vmatprep.subr.mxu0 %v2911_v53  ;;  %4736 = vmatprep.subr.mxu1 %v2942_v52  ;;  %v2728_v14 = vld [vmem:[#allocation2] sm:$0xff]  ;;  %v2729_v11 = vld [vmem:[#allocation2 + $0x8] sm:$0xff]  ;;  %v2966_v12 = vld [vmem:[#allocation8 + $0x270] sm:$0xff] }
 0x45d   : > { %4655 = vmatpush3.msra.mxu0 %v2895_v16  ;;  %4737 = vmatpush3.msra.mxu1 %v2926_v5  ;;  %v2782_v51 = vld [vmem:[#allocation2 + $0x200] sm:$0xff]  ;;  %v2783_v44 = vld [vmem:[#allocation2 + $0x208] sm:$0xff]  ;;  %v8945_v60 = vld [vmem:[#allocation2 + $0x110] sm:$0xff] }
 0x45e   : > { %4656 = vmatprep.subr.mxu0 %v2910_v28  ;;  %4738 = vmatprep.subr.mxu1 %v2941_v23  ;;  %v2764_v36 = vld [vmem:[#allocation2 + $0x1] sm:$0xff]  ;;  %v2765_v33 = vld [vmem:[#allocation2 + $0x9] sm:$0xff]  ;;  %v8950_v45 = vld [vmem:[#allocation2 + $0x118] sm:$0xff] }
 0x45f   : > { %4657 = vmatpush3.msra.mxu0 %v2894_v27  ;;  %4739 = vmatpush3.msra.mxu1 %v2925_v47  ;;  %v2981_v37 = vld [vmem:[#allocation8 + $0x2e8] sm:$0xff]  ;;  %v8947_v35 = vld [vmem:[#allocation2 + $0x10] sm:$0xff]  ;;  %v2980_v46 = vld [vmem:[#allocation8 + $0x2e0] sm:$0xff] }
 0x460   : > { %4658 = vmatprep.subr.mxu0 %v2909_v24  ;;  %4740 = vmatprep.subr.mxu1 %v2940_v2  ;;  %v2965_v34 = vld [vmem:[#allocation8 + $0x268] sm:$0xff]  ;;  %v2784_v39 = vld [vmem:[#allocation2 + $0x210] sm:$0xff]  ;;  %v2964_v56 = vld [vmem:[#allocation8 + $0x260] sm:$0xff] }
 0x461   : > { %4659 = vmatpush3.msra.mxu0 %v2893_v38  ;;  %4741 = vmatpush3.msra.mxu1 %v2924_v59  ;;  %v3015_v57 = vld [vmem:[#allocation8 + $0x3f8] sm:$0xff]  ;;  %v8958_v25 = vld [vmem:[#allocation2 + $0x120] sm:$0xff]  ;;  %v2978_v62 = vld [vmem:[#allocation8 + $0x2d0] sm:$0xff] }
 0x462   : > { %4660 = vmatprep.subr.mxu0 %v2908_v54  ;;  %4742 = vmatprep.subr.mxu1 %v2939_v0  ;;  %v8953_v4 = vld [vmem:[#allocation2 + $0x11] sm:$0xff]  ;;  %v8962_v42 = vld [vmem:[#allocation2 + $0x19] sm:$0xff]  ;;  %v8967_v16 = vld [vmem:[#allocation2 + $0x128] sm:$0xff] }
 0x463   : > { %4661 = vmatpush3.msra.mxu0 %v2892_v43  ;;  %4743 = vmatpush3.msra.mxu1 %v2923_v10  ;;  %v2979_v6 = vld [vmem:[#allocation8 + $0x2d8] sm:$0xff]  ;;  %v2962_v13 = vld [vmem:[#allocation8 + $0x250] sm:$0xff]  ;;  %v8965_v53 = vld [vmem:[#allocation2 + $0x20] sm:$0xff] }
 0x464   : > { %4662 = vmatprep.subr.mxu0 %v2907_v3  ;;  %4744 = vmatprep.subr.mxu1 %v2938_v8  ;;  %v8956_v17 = vld [vmem:[#allocation2 + $0x18] sm:$0xff]  ;;  %v2786_v40 = vld [vmem:[#allocation2 + $0x220] sm:$0xff]  ;;  %v2977_v61 = vld [vmem:[#allocation8 + $0x2c8] sm:$0xff] }
 0x465   : > { %4663 = vmatpush3.msra.mxu0 %v2891_v15  ;;  %4745 = vmatpush3.msra.mxu1 %v2922_v26  ;;  %v2785_v18 = vld [vmem:[#allocation2 + $0x218] sm:$0xff]  ;;  %v2961_v28 = vld [vmem:[#allocation8 + $0x248] sm:$0xff]  ;;  %v3014_v30 = vld [vmem:[#allocation8 + $0x3f0] sm:$0xff] }
 0x466   : > { %4664 = vmatprep.subr.mxu0 %v2906_v58  ;;  %4746 = vmatprep.subr.mxu1 %v2937_v20  ;;  %v2963_v49 = vld [vmem:[#allocation8 + $0x258] sm:$0xff]  ;;  %v8971_v27 = vld [vmem:[#allocation2 + $0x21] sm:$0xff]  ;;  %v8976_v38 = vld [vmem:[#allocation2 + $0x130] sm:$0xff] }
 0x467   : > { %4665 = vmatpush3.msra.mxu0 %v2890_v41  ;;  %3103 = vmatprep.mubr.f32.mxu0 %v2746_v31  ;;  %v2999_v9 = vld [vmem:[#allocation8 + $0x378] sm:$0xff]  ;;  %v2976_v52 = vld [vmem:[#allocation8 + $0x2c0] sm:$0xff]  ;;  %v8974_v24 = vld [vmem:[#allocation2 + $0x28] sm:$0xff] }
 0x468   : > { %4666 = vmatprep.subr.mxu0 %v2905_v21  ;;  %4747 = vmatpush3.msra.mxu1 %v2921_v55  ;;  %v2787_v5 = vld [vmem:[#allocation2 + $0x228] sm:$0xff]  ;;  %v2960_v23 = vld [vmem:[#allocation8 + $0x240] sm:$0xff]  ;;  %v2975_v54 = vld [vmem:[#allocation8 + $0x2b8] sm:$0xff] }
 0x469   : > { %4667 = vmatpush3.msra.mxu0 %v2889_v32  ;;  %4748 = vmatprep.subr.mxu1 %v2936_v1  ;;  %v2998_v47 = vld [vmem:[#allocation8 + $0x370] sm:$0xff]  ;;  %v2959_v2 = vld [vmem:[#allocation8 + $0x238] sm:$0xff]  ;;  %v3013_v10 = vld [vmem:[#allocation8 + $0x3e8] sm:$0xff] }
 0x46a   : > { %4668 = vmatprep.subr.mxu0 %v2904_v19  ;;  %4749 = vmatpush3.msra.mxu1 %v2920_v7  ;;  %v8980_v43 = vld [vmem:[#allocation2 + $0x29] sm:$0xff]  ;;  %v8985_v15 = vld [vmem:[#allocation2 + $0x138] sm:$0xff]  ;;  %v8994_v32 = vld [vmem:[#allocation2 + $0x140] sm:$0xff] }
 0x46b   : > { %4669 = vmatpush3.msra.mxu0 %v2888_v48  ;;  %3248 = vmatprep.mubr.f32.mxu1 %v2782_v51  ;;  %v8983_v3 = vld [vmem:[#allocation2 + $0x30] sm:$0xff]  ;;  %v2973_v8 = vld [vmem:[#allocation8 + $0x2a8] sm:$0xff]  ;;  %v8992_v21 = vld [vmem:[#allocation2 + $0x38] sm:$0xff] }
 0x46c   : > { %3104 = vmatmul.mubr.f32.vlgmr.msra.gmra.mxu0 %v2728_v14  ;;  %4798 = vmatprep.subr.mxu0 %v2983_v29  ;;  %v2788_v59 = vld [vmem:[#allocation2 + $0x230] sm:$0xff]  ;;  %v2789_v26 = vld [vmem:[#allocation2 + $0x238] sm:$0xff]  ;;  %v2997_v20 = vld [vmem:[#allocation8 + $0x368] sm:$0xff] }
 0x46d   : > { %4799 = vmatpush3.msra.mxu0 %v2967_v22  ;;  %3249 = vmatmul.mubr.f32.vlgmr.msra.gmra.mxu1 %v2764_v36  ;;  %v2974_v0 = vld [vmem:[#allocation8 + $0x2b0] sm:$0xff]  ;;  %v3012_v19 = vld [vmem:[#allocation8 + $0x3e0] sm:$0xff]  ;;  %v2957_v31 = vld [vmem:[#allocation8 + $0x228] sm:$0xff] }
 0x46e   : > { %3108 = vmatprep.mubr.f32.mxu0 %v2747_v63  ;;  %4800 = vmatprep.subr.mxu0 %v2982_v50  ;;  %v2958_v58 = vld [vmem:[#allocation8 + $0x230] sm:$0xff]  ;;  %v8998_v48 = vld [vmem:[#allocation2 + $0x39] sm:$0xff]  ;;  %v9003_v29 = vld [vmem:[#allocation2 + $0x148] sm:$0xff] }
 0x46f   : > { %3253 = vmatprep.mubr.f32.mxu1 %v2783_v44  ;;  %4801 = vmatpush3.msra.mxu0 %v2966_v12  ;;  %v8989_v41 = vld [vmem:[#allocation2 + $0x31] sm:$0xff]  ;;  %v2972_v55 = vld [vmem:[#allocation8 + $0x2a0] sm:$0xff]  ;;  %v2791_v50 = vld [vmem:[#allocation2 + $0x248] sm:$0xff] }
 0x470   : > { %3109 = vmatmul.mubr.f32.gmra.mxu0 %v2729_v11  ;;  %4802 = vmatprep.subr.mxu0 %v2981_v37  ;;  %v9001_v14 = vld [vmem:[#allocation2 + $0x40] sm:$0xff]  ;;  %v3011_v51 = vld [vmem:[#allocation8 + $0x3d8] sm:$0xff]  ;;  %v9010_v11 = vld [vmem:[#allocation2 + $0x48] sm:$0xff] }
 0x471   : > { %3113 = vmatprep.mubr.f32.mxu0 %v8945_v60  ;;  %3254 = vmatmul.mubr.f32.gmra.mxu1 %v2765_v33  ;;  %v2790_v1 = vld [vmem:[#allocation2 + $0x240] sm:$0xff]  ;;  %v2971_v63 = vld [vmem:[#allocation8 + $0x298] sm:$0xff]  ;;  %v9012_v44 = vld [vmem:[#allocation2 + $0x150] sm:$0xff] }
 0x472   : > { %4803 = vmatpush3.msra.mxu0 %v2965_v34  ;;  %3258 = vmatprep.mubr.f32.mxu1 %v2784_v39  ;;  %v2996_v7 = vld [vmem:[#allocation8 + $0x360] sm:$0xff]  ;;  %v2995_v12 = vld [vmem:[#allocation8 + $0x358] sm:$0xff]  ;;  %v3010_v37 = vld [vmem:[#allocation8 + $0x3d0] sm:$0xff] }
 0x473   : > { %4804 = vmatprep.subr.mxu0 %v2980_v46  ;;  %4878 = vmatprep.subr.mxu1 %v3015_v57  ;;  %v2956_v22 = vld [vmem:[#allocation8 + $0x220] sm:$0xff]  ;;  %v2955_v33 = vld [vmem:[#allocation8 + $0x218] sm:$0xff]  ;;  %v9016_v34 = vld [vmem:[#allocation2 + $0x49] sm:$0xff] }
 0x474   : > { %3114 = vmatmul.mubr.f32.gmra.mxu0 %v8947_v35  ;;  %4879 = vmatpush3.msra.mxu1 %v2999_v9  ;;  %v9007_v36 = vld [vmem:[#allocation2 + $0x41] sm:$0xff]  ;;  %v2970_v39 = vld [vmem:[#allocation8 + $0x290] sm:$0xff]  ;;  %v9021_v57 = vld [vmem:[#allocation2 + $0x158] sm:$0xff] }
 0x475   : > { %3118 = vmatprep.mubr.f32.mxu0 %v8950_v45  ;;  %4805 = vmatpush3.msra.mxu0 %v2964_v56  ;;  %v9019_v46 = vld [vmem:[#allocation2 + $0x50] sm:$0xff]  ;;  %v2969_v9 = vld [vmem:[#allocation8 + $0x288] sm:$0xff] }
 0x476   : > { %3259 = vmatmul.mubr.f32.gmra.mxu1 %v8953_v4  ;;  %4806 = vmatprep.subr.mxu0 %v2979_v6  ;;  %v2792_v56 = vld [vmem:[#allocation2 + $0x250] sm:$0xff] }
 0x477   : > { %3263 = vmatprep.mubr.f32.mxu1 %v2785_v18  ;;  %4807 = vmatpush3.msra.mxu0 %v2963_v49  ;;  %v2994_v6 = vld [vmem:[#allocation8 + $0x350] sm:$0xff]  ;;  %v3009_v18 = vld [vmem:[#allocation8 + $0x3c8] sm:$0xff] }
 0x478   : > { %3119 = vmatmul.mubr.f32.gmra.mxu0 %v8956_v17  ;;  %4808 = vmatprep.subr.mxu0 %v2978_v62  ;;  %v2954_v49 = vld [vmem:[#allocation8 + $0x210] sm:$0xff] }
 0x479   : > { %3123 = vmatprep.mubr.f32.mxu0 %v8958_v25  ;;  %4809 = vmatpush3.msra.mxu0 %v2962_v13  ;;  %v9025_v62 = vld [vmem:[#allocation2 + $0x51] sm:$0xff] }
 0x47a   : > { %3264 = vmatmul.mubr.f32.gmra.mxu1 %v8962_v42  ;;  %4810 = vmatprep.subr.mxu0 %v2977_v61  ;;  %v9028_v13 = vld [vmem:[#allocation2 + $0x58] sm:$0xff]  ;;  %v9030_v61 = vld [vmem:[#allocation2 + $0x160] sm:$0xff] }
 0x47b   : > { %3268 = vmatprep.mubr.f32.mxu1 %v2786_v40  ;;  %4811 = vmatpush3.msra.mxu0 %v2961_v28  ;;  %v2793_v40 = vld [vmem:[#allocation2 + $0x258] sm:$0xff]  ;;  %v2993_v28 = vld [vmem:[#allocation8 + $0x348] sm:$0xff] }
 0x47c   : > { %3124 = vmatmul.mubr.f32.gmra.mxu0 %v8965_v53  ;;  %4880 = vmatprep.subr.mxu1 %v3014_v30  ;;  %v3008_v30 = vld [vmem:[#allocation8 + $0x3c0] sm:$0xff] }
 0x47d   : > { %3128 = vmatprep.mubr.f32.mxu0 %v8967_v16  ;;  %4812 = vmatprep.subr.mxu0 %v2976_v52  ;;  %v2953_v52 = vld [vmem:[#allocation8 + $0x208] sm:$0xff] }
 0x47e   : > { %3269 = vmatmul.mubr.f32.gmra.mxu1 %v8971_v27  ;;  %4813 = vmatpush3.msra.mxu0 %v2960_v23  ;;  %v2968_v23 = vld [vmem:[#allocation8 + $0x280] sm:$0xff] }
 0x47f   : > { %3273 = vmatprep.mubr.f32.mxu1 %v2787_v5  ;;  %4814 = vmatprep.subr.mxu0 %v2975_v54  ;;  %v9034_v5 = vld [vmem:[#allocation2 + $0x59] sm:$0xff] }
 0x480   : > { %3129 = vmatmul.mubr.f32.gmra.mxu0 %v8974_v24  ;;  %4881 = vmatpush3.msra.mxu1 %v2998_v47  ;;  %v9037_v54 = vld [vmem:[#allocation2 + $0x60] sm:$0xff] }
 0x481   : > { %3133 = vmatprep.mubr.f32.mxu0 %v8976_v38  ;;  %4815 = vmatpush3.msra.mxu0 %v2959_v2  ;;  %v2794_v47 = vld [vmem:[#allocation2 + $0x260] sm:$0xff] }
 0x482   : > { %3274 = vmatmul.mubr.f32.gmra.mxu1 %v8980_v43  ;;  %4816 = vmatprep.subr.mxu0 %v2974_v0  ;;  %v2992_v2 = vld [vmem:[#allocation8 + $0x340] sm:$0xff]  ;;  %v3007_v0 = vld [vmem:[#allocation8 + $0x3b8] sm:$0xff] }
 0x483   : > { %3278 = vmatprep.mubr.f32.mxu1 %v2788_v59  ;;  %4817 = vmatpush3.msra.mxu0 %v2958_v58  ;;  %v9039_v59 = vld [vmem:[#allocation2 + $0x168] sm:$0xff]  ;;  %v2952_v58 = vld [vmem:[#allocation8 + $0x200] sm:$0xff] }
 0x484   : > { %3134 = vmatmul.mubr.f32.gmra.mxu0 %v8983_v3  ;;  %4882 = vmatprep.subr.mxu1 %v3013_v10  ;;  %v9043_v10 = vld [vmem:[#allocation2 + $0x61] sm:$0xff] }
 0x485   : > { %3138 = vmatprep.mubr.f32.mxu0 %v8985_v15  ;;  %4818 = vmatprep.subr.mxu0 %v2973_v8  ;;  %v9045_v8 = vld [vmem:[#allocation8 + $0x478] sm:$0xff] }
 0x486   : > { %3279 = vmatmul.mubr.f32.gmra.mxu1 %v8989_v41  ;;  %4819 = vmatpush3.msra.mxu0 %v2957_v31  ;;  %v2795_v31 = vld [vmem:[#allocation2 + $0x268] sm:$0xff] }
 0x487   : > { %3283 = vmatprep.mubr.f32.mxu1 %v2789_v26  ;;  %4883 = vmatpush3.msra.mxu1 %v2997_v20  ;;  %v2991_v26 = vld [vmem:[#allocation8 + $0x338] sm:$0xff]  ;;  %v9048_v20 = vld [vmem:[#allocation2 + $0x68] sm:$0xff] }
 0x488   : > { %3139 = vmatmul.mubr.f32.gmra.mxu0 %v8992_v21  ;;  %4884 = vmatprep.subr.mxu1 %v3012_v19  ;;  %v3006_v19 = vld [vmem:[#allocation8 + $0x3b0] sm:$0xff] }
 0x489   : > { %3143 = vmatprep.mubr.f32.mxu0 %v8994_v32  ;;  %4820 = vmatprep.subr.mxu0 %v2972_v55  ;;  %v2990_v55 = vld [vmem:[#allocation8 + $0x330] sm:$0xff] }
 0x48a   : > { %3284 = vmatmul.mubr.f32.gmra.mxu1 %v8998_v48  ;;  %4821 = vmatpush3.msra.mxu0 %v2956_v22  ;;  %v2989_v22 = vld [vmem:[#allocation8 + $0x328] sm:$0xff] }
 0x48b   : > { %3288 = vmatprep.mubr.f32.mxu1 %v2790_v1  ;;  %4885 = vmatpush3.msra.mxu1 %v2996_v7  ;;  %v9051_v1 = vld [vmem:[#allocation2 + $0x170] sm:$0xff] }
 0x48c   : > { %3144 = vmatmul.mubr.f32.gmra.mxu0 %v9001_v14  ;;  %4886 = vmatprep.subr.mxu1 %v3011_v51  ;;  %v9055_v7 = vld [vmem:[#allocation2 + $0x69] sm:$0xff] }
 0x48d   : > { %3148 = vmatprep.mubr.f32.mxu0 %v9003_v29  ;;  %4822 = vmatprep.subr.mxu0 %v2971_v63  ;;  %v3005_v51 = vld [vmem:[#allocation8 + $0x3a8] sm:$0xff]  ;;  %v9057_v63 = vld [vmem:[#allocation2 + $0x70] sm:$0xff] }
 0x48e   : > { %3289 = vmatmul.mubr.f32.gmra.mxu1 %v9007_v36  ;;  %4823 = vmatpush3.msra.mxu0 %v2955_v33  ;;  %v9061_v33 = vld [vmem:[#allocation2 + $0x178] sm:$0xff] }
 0x48f   : > { %3293 = vmatprep.mubr.f32.mxu1 %v2791_v50  ;;  %4887 = vmatpush3.msra.mxu1 %v2995_v12  ;;  %v3004_v50 = vld [vmem:[#allocation8 + $0x3a0] sm:$0xff]  ;;  %v2796_v12 = vld [vmem:[#allocation2 + $0x270] sm:$0xff] }
 0x490   : > { %3149 = vmatmul.mubr.f32.gmra.mxu0 %v9010_v11  ;;  %4888 = vmatprep.subr.mxu1 %v3010_v37  ;;  %v2988_v37 = vld [vmem:[#allocation8 + $0x320] sm:$0xff] }
 0x491   : > { %3153 = vmatprep.mubr.f32.mxu0 %v9012_v44  ;;  %4824 = vmatprep.subr.mxu0 %v2970_v39  ;;  %v9064_v39 = vld [vmem:[#allocation2 + $0x71] sm:$0xff] }
 0x492   : > { %3294 = vmatmul.mubr.f32.gmra.mxu1 %v9016_v34  ;;  %4825 = vmatpush3.msra.mxu0 %v2954_v49  ;;  %v3002_v49 = vld [vmem:[#allocation8 + $0x390] sm:$0xff] }
 0x493   : > { %3298 = vmatprep.mubr.f32.mxu1 %v2792_v56  ;;  %4889 = vmatpush3.msra.mxu1 %v2994_v6  ;;  %v3003_v56 = vld [vmem:[#allocation8 + $0x398] sm:$0xff] }
 0x494   : > { %3154 = vmatmul.mubr.f32.gmra.mxu0 %v9019_v46  ;;  %4890 = vmatprep.subr.mxu1 %v3009_v18  ;;  %v2987_v6 = vld [vmem:[#allocation8 + $0x318] sm:$0xff] }
 0x495   : > { %3158 = vmatprep.mubr.f32.mxu0 %v9021_v57  ;;  %4826 = vmatprep.subr.mxu0 %v2969_v9  ;;  %v9066_v18 = vld [vmem:[#allocation2 + $0x78] sm:$0xff] }
 0x496   : > { %3299 = vmatmul.mubr.f32.gmra.mxu1 %v9025_v62  ;;  %4827 = vmatpush3.msra.mxu0 %v2953_v52  ;;  %v2797_v9 = vld [vmem:[#allocation2 + $0x278] sm:$0xff]  ;;  %v3001_v52 = vld [vmem:[#allocation8 + $0x388] sm:$0xff] }
 0x497   : > { %3303 = vmatprep.mubr.f32.mxu1 %v2793_v40  ;;  %4891 = vmatpush3.msra.mxu1 %v2993_v28  ;;  %v2986_v40 = vld [vmem:[#allocation8 + $0x310] sm:$0xff]  ;;  %v2818_v28 = vld [vmem:[#allocation2 + $0x201] sm:$0xff] }
 0x498   : > { %3159 = vmatmul.mubr.f32.gmra.mxu0 %v9028_v13  ;;  %4892 = vmatprep.subr.mxu1 %v3008_v30  ;;  %v9071_v30 = vld [vmem:[#allocation2 + $0x79] sm:$0xff] }
 0x499   : > { %3163 = vmatprep.mubr.f32.mxu0 %v9030_v61  ;;  %4828 = vmatprep.subr.mxu0 %v2968_v23  ;;  %v2985_v23 = vld [vmem:[#allocation8 + $0x308] sm:$0xff] }
 0x49a   : > { %3304 = vmatmul.mubr.f32.gmra.mxu1 %v9034_v5  ;;  %4829 = vmatpush3.msra.mxu0 %v2952_v58  ;;  %v2819_v58 = vld [vmem:[#allocation2 + $0x209] sm:$0xff] }
 0x49b   : > { %3308 = vmatprep.mubr.f32.mxu1 %v2794_v47  ;;  %4893 = vmatpush3.msra.mxu1 %v2992_v2  ;;  %v2800_v47 = vld [vmem:[#allocation2 + $0x300] sm:$0xff] }
 0x49c   : > { %3164 = vmatmul.mubr.f32.gmra.mxu0 %v9037_v54  ;;  %4894 = vmatprep.subr.mxu1 %v3007_v0  ;;  %v3000_v2 = vld [vmem:[#allocation8 + $0x380] sm:$0xff] }
 0x49d   : > { %3168 = vmatprep.mubr.f32.mxu0 %v9039_v59  ;;  %5278 = vmatprep.subr.mxu0 %v9045_v8  ;;  %v2984_v0 = vld [vmem:[#allocation8 + $0x300] sm:$0xff] }
 0x49e   : > { %3309 = vmatmul.mubr.f32.gmra.mxu1 %v9043_v10 }
 0x49f   : > { %4895 = vmatpush3.msra.mxu1 %v2991_v26  ;;  %3313 = vmatprep.mubr.f32.mxu1 %v2795_v31  ;;  %v2801_v26 = vld [vmem:[#allocation2 + $0x308] sm:$0xff]  ;;  %v2820_v31 = vld [vmem:[#allocation2 + $0x211] sm:$0xff] }
 0x4a0   : > { %3169 = vmatmul.mubr.f32.gmra.mxu0 %v9048_v20  ;;  %4896 = vmatprep.subr.mxu1 %v3006_v19  ;;  %v3030_v19 = vld [vmem:[#allocation8 + $0x470] sm:$0xff] }
 0x4a1   : > { %4897 = vmatpush3.msra.mxu1 %v2990_v55  ;;  %3173 = vmatprep.mubr.f32.mxu0 %v9051_v1  ;;  %v3029_v55 = vld [vmem:[#allocation8 + $0x468] sm:$0xff] }
 0x4a2   : > { %3314 = vmatmul.mubr.f32.gmra.mxu1 %v9055_v7  ;;  %4898 = vmatprep.subr.mxu1 %v3005_v51  ;;  %v2802_v51 = vld [vmem:[#allocation2 + $0x310] sm:$0xff] }
 0x4a3   : > { %4899 = vmatpush3.msra.mxu1 %v2989_v22  ;;  %3318 = vmatprep.mubr.f32.mxu1 %v2796_v12  ;;  %v2821_v22 = vld [vmem:[#allocation2 + $0x219] sm:$0xff] }
 0x4a4   : > { %3174 = vmatmul.mubr.f32.gmra.mxu0 %v9057_v63  ;;  %4900 = vmatprep.subr.mxu1 %v3004_v50  ;;  %v2822_v50 = vld [vmem:[#allocation2 + $0x221] sm:$0xff] }
 0x4a5   : > { %4901 = vmatpush3.msra.mxu1 %v2988_v37  ;;  %3178 = vmatprep.mubr.f32.mxu0 %v9061_v33  ;;  %v2804_v12 = vld [vmem:[#allocation2 + $0x320] sm:$0xff]  ;;  %v3025_v37 = vld [vmem:[#allocation8 + $0x448] sm:$0xff] }
 0x4a6   : > { %3319 = vmatmul.mubr.f32.gmra.mxu1 %v9064_v39  ;;  %4902 = vmatprep.subr.mxu1 %v3003_v56  ;;  %v2824_v56 = vld [vmem:[#allocation2 + $0x231] sm:$0xff] }
 0x4a7   : > { %4903 = vmatpush3.msra.mxu1 %v2987_v6  ;;  %3323 = vmatprep.mubr.f32.mxu1 %v2797_v9  ;;  %v2806_v6 = vld [vmem:[#allocation2 + $0x330] sm:$0xff]  ;;  %v2826_v9 = vld [vmem:[#allocation2 + $0x241] sm:$0xff] }
 0x4a8   : > { %3179 = vmatmul.mubr.f32.gmra.mxu0 %v9066_v18  ;;  %4904 = vmatprep.subr.mxu1 %v3002_v49  ;;  %v3022_v49 = vld [vmem:[#allocation8 + $0x430] sm:$0xff] }
 0x4a9   : > { %4905 = vmatpush3.msra.mxu1 %v2986_v40  ;;  %3393 = vmatprep.mubr.f32.mxu0 %v2818_v28  ;;  %v2808_v40 = vld [vmem:[#allocation2 + $0x340] sm:$0xff]  ;;  %v3019_v28 = vld [vmem:[#allocation8 + $0x418] sm:$0xff] }
 0x4aa   : > { %3324 = vmatmul.mubr.f32.gmra.mxu1 %v9071_v30  ;;  %4906 = vmatprep.subr.mxu1 %v3001_v52  ;;  %v2828_v52 = vld [vmem:[#allocation2 + $0x251] sm:$0xff] }
 0x4ab   : > { %4907 = vmatpush3.msra.mxu1 %v2985_v23  ;;  %3538 = vmatprep.mubr.f32.mxu1 %v8945_v60  ;;  %v3028_v60 = vld [vmem:[#allocation8 + $0x460] sm:$0xff]  ;;  %v2810_v23 = vld [vmem:[#allocation2 + $0x350] sm:$0xff] }
 0x4ac   : > { %3394 = vmatmul.mubr.f32.vlgmr.msra.gmra.mxu0 %v2800_v47  ;;  %4908 = vmatprep.subr.mxu1 %v3000_v2  ;;  %v3016_v47 = vld [vmem:[#allocation8 + $0x400] sm:$0xff]  ;;  %v2831_v2 = vld [vmem:[#allocation2 + $0x269] sm:$0xff] }
 0x4ad   : > { %4909 = vmatpush3.msra.mxu1 %v2984_v0  ;;  %5279 = vmatpush3.msra.mxu0 %v9045_v8  ;;  %v2803_v8 = vld [vmem:[#allocation2 + $0x318] sm:$0xff]  ;;  %v2868_v0 = vld [vmem:[#allocation2 + $0x180] sm:$0xff] }
 0x4ae   : > { %3539 = vmatmul.mubr.f32.vlgmr.msra.gmra.mxu1 %v8947_v35  ;;  %3398 = vmatprep.mubr.f32.mxu0 %v2819_v58  ;;  %v3027_v35 = vld [vmem:[#allocation8 + $0x458] sm:$0xff] }
 0x4af   : > { %5280 = vmatprep.subr.mxu0 %v3030_v19  ;;  %3543 = vmatprep.mubr.f32.mxu1 %v8950_v45  ;;  %v3026_v45 = vld [vmem:[#allocation8 + $0x450] sm:$0xff]  ;;  %v2815_v58 = vld [vmem:[#allocation2 + $0x378] sm:$0xff] }
 0x4b0   : > { %3399 = vmatmul.mubr.f32.gmra.mxu0 %v2801_v26  ;;  %v2851_v26 = vld [vmem:[#allocation2 + $0x88] sm:$0xff] }
 0x4b1   : > { %5281 = vmatpush3.msra.mxu0 %v3030_v19  ;;  %3403 = vmatprep.mubr.f32.mxu0 %v2820_v31  ;;  %v3785_v19 = vld [vmem:[#allocation9 + $0x28] sm:$0xff]  ;;  %v9137_v31 = vld [vmem:[#allocation11 + $0x50] sm:$0xff] }
 0x4b2   : > { %5282 = vmatprep.subr.mxu0 %v3029_v55  ;;  %3544 = vmatmul.mubr.f32.gmra.mxu1 %v8956_v17  ;;  %v2823_v17 = vld [vmem:[#allocation2 + $0x229] sm:$0xff]  ;;  %10102 = vst [vmem:[#allocation20_spill] sm:$0xff] %v9137_v31 }
 0x4b3   : > { %5283 = vmatpush3.msra.mxu0 %v3029_v55  ;;  %3548 = vmatprep.mubr.f32.mxu1 %v8958_v25  ;;  %v3024_v25 = vld [vmem:[#allocation8 + $0x440] sm:$0xff]  ;;  %v9141_v55 = vld [vmem:[#allocation11 + $0x48] sm:$0xff] }
 0x4b4   : > { %3404 = vmatmul.mubr.f32.gmra.mxu0 %v2802_v51  ;;  %5284 = vmatprep.subr.mxu0 %v3028_v60  ;;  %10103 = vst [vmem:[#allocation21_spill] sm:$0xff] %v9141_v55  ;;  %v3784_v51 = vld [vmem:[#allocation9 + $0x20] sm:$0xff] }
 0x4b5   : > { %3408 = vmatprep.mubr.f32.mxu0 %v2821_v22  ;;  %5285 = vmatpush3.msra.mxu0 %v3028_v60  ;;  %v9145_v22 = vld [vmem:[#allocation11 + $0x40] sm:$0xff]  ;;  %v9149_v60 = vld [vmem:[#allocation11 + $0x38] sm:$0xff] }
 0x4b6   : > { %3549 = vmatmul.mubr.f32.gmra.mxu1 %v8965_v53  ;;  %5286 = vmatprep.subr.mxu0 %v3027_v35  ;;  %v2805_v53 = vld [vmem:[#allocation2 + $0x328] sm:$0xff]  ;;  %10104 = vst [vmem:[#allocation22_spill] sm:$0xff] %v9145_v22  ;;  %10105 = vst [vmem:[#allocation23_spill] sm:$0xff] %v9149_v60 }
 0x4b7   : > { %3553 = vmatprep.mubr.f32.mxu1 %v8967_v16  ;;  %5287 = vmatpush3.msra.mxu0 %v3027_v35  ;;  %v3023_v16 = vld [vmem:[#allocation8 + $0x438] sm:$0xff] }
 0x4b8   : > { %3409 = vmatmul.mubr.f32.gmra.mxu0 %v2803_v8  ;;  %5288 = vmatprep.subr.mxu0 %v3026_v45  ;;  %v3783_v35 = vld [vmem:[#allocation9 + $0x18] sm:$0xff]  ;;  %v9153_v8 = vld [vmem:[#allocation11 + $0x30] sm:$0xff] }
 0x4b9   : > { %3413 = vmatprep.mubr.f32.mxu0 %v2822_v50  ;;  %5289 = vmatpush3.msra.mxu0 %v3026_v45  ;;  %10106 = vst [vmem:[#allocation24_spill] sm:$0xff] %v9153_v8  ;;  %v9157_v50 = vld [vmem:[#allocation11 + $0x28] sm:$0xff]  ;;  %v3782_v45 = vld [vmem:[#allocation9 + $0x10] sm:$0xff] }
 0x4ba   : > { %3554 = vmatmul.mubr.f32.gmra.mxu1 %v8974_v24  ;;  %5290 = vmatprep.subr.mxu0 %v3025_v37  ;;  %v2825_v24 = vld [vmem:[#allocation2 + $0x239] sm:$0xff]  ;;  %10107 = vst [vmem:[#allocation25_spill] sm:$0xff] %v9157_v50 }
 0x4bb   : > { %3558 = vmatprep.mubr.f32.mxu1 %v8976_v38  ;;  %5291 = vmatpush3.msra.mxu0 %v3025_v37  ;;  %v3021_v38 = vld [vmem:[#allocation8 + $0x428] sm:$0xff]  ;;  %v9165_v37 = vld [vmem:[#allocation11 + $0x18] sm:$0xff] }
 0x4bc   : > { %3414 = vmatmul.mubr.f32.gmra.mxu0 %v2804_v12  ;;  %5292 = vmatprep.subr.mxu0 %v3024_v25  ;;  %v9161_v12 = vld [vmem:[#allocation11 + $0x20] sm:$0xff]  ;;  %10109 = vst [vmem:[#allocation27_spill] sm:$0xff] %v9165_v37 }
 0x4bd   : > { %3418 = vmatprep.mubr.f32.mxu0 %v2823_v17  ;;  %5293 = vmatpush3.msra.mxu0 %v3024_v25  ;;  %10108 = vst [vmem:[#allocation26_spill] sm:$0xff] %v9161_v12  ;;  %v9171_v25 = vld [vmem:[%s9521_s4] ss:$0 sm:$0xff] }
 0x4be   : > { %3559 = vmatmul.mubr.f32.gmra.mxu1 %v8983_v3  ;;  %5294 = vmatprep.subr.mxu0 %v3023_v16  ;;  %v2807_v3 = vld [vmem:[#allocation2 + $0x338] sm:$0xff]  ;;  %10110 = vst [vmem:[#allocation28_spill] sm:$0xff] %v9171_v25 }
 0x4bf   : > { %3563 = vmatprep.mubr.f32.mxu1 %v8985_v15  ;;  %5295 = vmatpush3.msra.mxu0 %v3023_v16  ;;  %v3020_v15 = vld [vmem:[#allocation8 + $0x420] sm:$0xff] }
 0x4c0   : > { %3419 = vmatmul.mubr.f32.gmra.mxu0 %v2805_v53  ;;  %5296 = vmatprep.subr.mxu0 %v3022_v49 }
 0x4c1   : > { %3423 = vmatprep.mubr.f32.mxu0 %v2824_v56  ;;  %5297 = vmatpush3.msra.mxu0 %v3022_v49  ;;  %v9174_v56 = vld [vmem:[#allocation11 + $0x10] sm:$0xff] }
 0x4c2   : > { %3564 = vmatmul.mubr.f32.gmra.mxu1 %v8992_v21  ;;  %5298 = vmatprep.subr.mxu0 %v3021_v38  ;;  %v2827_v21 = vld [vmem:[#allocation2 + $0x249] sm:$0xff]  ;;  %10111 = vst [vmem:[#allocation29_spill] sm:$0xff] %v9174_v56 }
 0x4c3   : > { %3568 = vmatprep.mubr.f32.mxu1 %v8994_v32  ;;  %5299 = vmatpush3.msra.mxu0 %v3021_v38  ;;  %v3018_v32 = vld [vmem:[#allocation8 + $0x410] sm:$0xff]  ;;  %v9178_v38 = vld [vmem:[#allocation11 + $0x8] sm:$0xff] }
 0x4c4   : > { %3424 = vmatmul.mubr.f32.gmra.mxu0 %v2806_v6  ;;  %5300 = vmatprep.subr.mxu0 %v3020_v15  ;;  %10112 = vst [vmem:[#allocation30_spill] sm:$0xff] %v9178_v38 }
 0x4c5   : > { %3428 = vmatprep.mubr.f32.mxu0 %v2825_v24  ;;  %5301 = vmatpush3.msra.mxu0 %v3020_v15  ;;  %v3781_v24 = vld [vmem:[#allocation9 + $0x8] sm:$0xff] }
 0x4c6   : > { %3569 = vmatmul.mubr.f32.gmra.mxu1 %v9001_v14  ;;  %v2809_v14 = vld [vmem:[#allocation2 + $0x348] sm:$0xff]  ;;  %5302 = vmatprep.subr.mxu0 %v3019_v28 }
 0x4c7   : > { %3573 = vmatprep.mubr.f32.mxu1 %v9003_v29  ;;  %5303 = vmatpush3.msra.mxu0 %v3019_v28  ;;  %v3017_v29 = vld [vmem:[#allocation8 + $0x408] sm:$0xff]  ;;  %v9183_v28 = vld [vmem:[#allocation11] sm:$0xff] }
 0x4c8   : > { %3429 = vmatmul.mubr.f32.gmra.mxu0 %v2807_v3  ;;  %5304 = vmatprep.subr.mxu0 %v3018_v32  ;;  %10113 = vst [vmem:[#allocation31_spill] sm:$0xff] %v9183_v28 }
 0x4c9   : > { %3433 = vmatprep.mubr.f32.mxu0 %v2826_v9  ;;  %5305 = vmatpush3.msra.mxu0 %v3018_v32 }
 0x4ca   : > { %3574 = vmatmul.mubr.f32.gmra.mxu1 %v9010_v11  ;;  %v2829_v11 = vld [vmem:[#allocation2 + $0x259] sm:$0xff]  ;;  %5306 = vmatprep.subr.mxu0 %v3017_v29 }
 0x4cb   : > { %3578 = vmatprep.mubr.f32.mxu1 %v9012_v44  ;;  %5307 = vmatpush3.msra.mxu0 %v3017_v29  ;;  %v2811_v44 = vld [vmem:[#allocation2 + $0x358] sm:$0xff] }
 0x4cc   : > { %3434 = vmatmul.mubr.f32.gmra.mxu0 %v2808_v40  ;;  %5308 = vmatprep.subr.mxu0 %v3016_v47 }
 0x4cd   : > { %3438 = vmatprep.mubr.f32.mxu0 %v2827_v21  ;;  %5309 = vmatpush3.msra.mxu0 %v3016_v47  ;;  %v3780_v21 = vld [vmem:[#allocation9] sm:$0xff] }
 0x4ce   : > { %3579 = vmatmul.mubr.f32.gmra.mxu1 %v9019_v46  ;;  %v2830_v46 = vld [vmem:[#allocation2 + $0x261] sm:$0xff] }
 0x4cf   : > { %3583 = vmatprep.mubr.f32.mxu1 %v9021_v57  ;;  %v2812_v57 = vld [vmem:[#allocation2 + $0x360] sm:$0xff] }
 0x4d0   : > { %3439 = vmatmul.mubr.f32.gmra.mxu0 %v2809_v14 }
 0x4d1   : > { %3443 = vmatprep.mubr.f32.mxu0 %v2828_v52  ;;  %v4486_v52 = vld [vmem:[%s6189_s24 + $0x300] sm:$0xff] }
 0x4d2   : > { %3584 = vmatmul.mubr.f32.gmra.mxu1 %v9028_v13  ;;  %v2813_v13 = vld [vmem:[#allocation2 + $0x368] sm:$0xff] }
 0x4d3   : > { %3588 = vmatprep.mubr.f32.mxu1 %v9030_v61  ;;  %v2832_v61 = vld [vmem:[#allocation2 + $0x271] sm:$0xff] }
 0x4d4   : > { %3444 = vmatmul.mubr.f32.gmra.mxu0 %v2810_v23 }
 0x4d5   : > { %3448 = vmatprep.mubr.f32.mxu0 %v2829_v11  ;;  %v4487_v11 = vld [vmem:[%s6189_s24 + $0x308] sm:$0xff] }
 0x4d6   : > { %3589 = vmatmul.mubr.f32.gmra.mxu1 %v9037_v54  ;;  %v2814_v54 = vld [vmem:[#allocation2 + $0x370] sm:$0xff] }
 0x4d7   : > { %3593 = vmatprep.mubr.f32.mxu1 %v9039_v59  ;;  %v2833_v59 = vld [vmem:[#allocation2 + $0x279] sm:$0xff] }
 0x4d8   : > { %3449 = vmatmul.mubr.f32.gmra.mxu0 %v2811_v44 }
 0x4d9   : > { %3453 = vmatprep.mubr.f32.mxu0 %v2830_v46 }
 0x4da   : > { %3594 = vmatmul.mubr.f32.gmra.mxu1 %v9048_v20  ;;  %v2850_v20 = vld [vmem:[#allocation2 + $0x80] sm:$0xff] }
 0x4db   : > { %3598 = vmatprep.mubr.f32.mxu1 %v9051_v1  ;;  %v2869_v1 = vld [vmem:[#allocation2 + $0x188] sm:$0xff] }
 0x4dc   : > { %3454 = vmatmul.mubr.f32.gmra.mxu0 %v2812_v57 }
 0x4dd   : > { %3458 = vmatprep.mubr.f32.mxu0 %v2831_v2 }
 0x4de   : > { %3599 = vmatmul.mubr.f32.gmra.mxu1 %v9057_v63  ;;  %v3795_v63 = vld [vmem:[#allocation9 + $0x78] sm:$0xff] }
 0x4df   : > { %3603 = vmatprep.mubr.f32.mxu1 %v9061_v33  ;;  %5334 = vmatprep.subr.mxu1 %v3795_v63  ;;  %v9125_v33 = vld [vmem:[#allocation11 + $0x68] sm:$0xff] }
 0x4e0   : > { %3459 = vmatmul.mubr.f32.gmra.mxu0 %v2813_v13  ;;  %5335 = vmatpush3.msra.mxu1 %v3795_v63  ;;  %10099 = vst [vmem:[#allocation17_spill] sm:$0xff] %v9125_v33 }
 0x4e1   : > { %3463 = vmatprep.mubr.f32.mxu0 %v2832_v61  ;;  %v4488_v61 = vld [vmem:[%s6189_s24 + $0x310] sm:$0xff] }
 0x4e2   : > { %3604 = vmatmul.mubr.f32.gmra.mxu1 %v9066_v18  ;;  %v9129_v18 = vld [vmem:[#allocation11 + $0x60] sm:$0xff] }
 0x4e3   : > { %3608 = vmatprep.mubr.f32.mxu1 %v2868_v0  ;;  %10100 = vst [vmem:[#allocation18_spill] sm:$0xff] %v9129_v18 }
 0x4e4   : > { %3464 = vmatmul.mubr.f32.gmra.mxu0 %v2814_v54 }
 0x4e5   : > { %3468 = vmatprep.mubr.f32.mxu0 %v2833_v59  ;;  %v4489_v59 = vld [vmem:[%s6189_s24 + $0x318] sm:$0xff] }
 0x4e6   : > { %3609 = vmatmul.mubr.f32.gmra.mxu1 %v2850_v20 }
 0x4e7   : > { %3613 = vmatprep.mubr.f32.mxu1 %v2869_v1 }
 0x4e8   : > { %3469 = vmatmul.mubr.f32.gmra.mxu0 %v2815_v58 }
 0x4e9   : > { %5310 = vmatprep.mubr.f32.mxu0 %v8953_v4  ;;  %v3794_v4 = vld [vmem:[#allocation9 + $0x70] sm:$0xff] }
 0x4ea   : > { %3614 = vmatmul.mubr.f32.gmra.mxu1 %v2851_v26  ;;  %5336 = vmatprep.subr.mxu1 %v3794_v4 }
 0x4eb   : > { %5337 = vmatpush3.msra.mxu1 %v3794_v4 }
 0x4ec   : > { %5311 = vmatmul.mubr.f32.vlgmr.msra.gmra.mxu0 %v8962_v42  ;;  %v3793_v42 = vld [vmem:[#allocation9 + $0x68] sm:$0xff] }
 0x4ed   : > { %5313 = vmatprep.mubr.f32.mxu0 %v8971_v27  ;;  %5338 = vmatprep.subr.mxu1 %v3793_v42  ;;  %v2886_v27 = vld [vmem:[#allocation2 + $0x81] sm:$0xff] }
 0x4ee   : > { %5339 = vmatpush3.msra.mxu1 %v3793_v42  ;;  %v4490_v42 = vld [vmem:[%s6189_s24 + $0x320] sm:$0xff] }
 0x4f0   : > { %5314 = vmatmul.mubr.f32.gmra.mxu0 %v8980_v43  ;;  %v3792_v43 = vld [vmem:[#allocation9 + $0x60] sm:$0xff] }
 0x4f1   : > { %5316 = vmatprep.mubr.f32.mxu0 %v8989_v41  ;;  %5340 = vmatprep.subr.mxu1 %v3792_v43  ;;  %v2887_v41 = vld [vmem:[#allocation2 + $0x89] sm:$0xff] }
 0x4f2   : > { %5341 = vmatpush3.msra.mxu1 %v3792_v43 }
 0x4f4   : > { %5317 = vmatmul.mubr.f32.gmra.mxu0 %v8998_v48  ;;  %v3791_v48 = vld [vmem:[#allocation9 + $0x58] sm:$0xff] }
 0x4f5   : > { %5319 = vmatprep.mubr.f32.mxu0 %v9007_v36  ;;  %5342 = vmatprep.subr.mxu1 %v3791_v48  ;;  %v3790_v36 = vld [vmem:[#allocation9 + $0x50] sm:$0xff] }
 0x4f6   : > { %5343 = vmatpush3.msra.mxu1 %v3791_v48 }
 0x4f7   : > { %5344 = vmatprep.subr.mxu1 %v3790_v36 }
 0x4f8   : > { %5320 = vmatmul.mubr.f32.gmra.mxu0 %v9016_v34  ;;  %5345 = vmatpush3.msra.mxu1 %v3790_v36  ;;  %v3789_v34 = vld [vmem:[#allocation9 + $0x48] sm:$0xff] }
 0x4f9   : > { %5322 = vmatprep.mubr.f32.mxu0 %v9025_v62  ;;  %5346 = vmatprep.subr.mxu1 %v3789_v34  ;;  %v3788_v62 = vld [vmem:[#allocation9 + $0x40] sm:$0xff] }
 0x4fa   : > { %5347 = vmatpush3.msra.mxu1 %v3789_v34 }
 0x4fb   : > { %5348 = vmatprep.subr.mxu1 %v3788_v62 }
 0x4fc   : > { %5323 = vmatmul.mubr.f32.gmra.mxu0 %v9034_v5  ;;  %5349 = vmatpush3.msra.mxu1 %v3788_v62  ;;  %v9117_v5 = vld [vmem:[#allocation11 + $0x78] sm:$0xff] }
 0x4fd   : > { %5325 = vmatprep.mubr.f32.mxu0 %v9043_v10  ;;  %5390 = vmatprep.subr.mxu0 %v9117_v5  ;;  %v3787_v10 = vld [vmem:[#allocation9 + $0x38] sm:$0xff] }
 0x4fe   : > { %5391 = vmatpush3.msra.mxu0 %v9117_v5  ;;  %5350 = vmatprep.subr.mxu1 %v3787_v10 }
 0x4ff   : > { %5351 = vmatpush3.msra.mxu1 %v3787_v10 }
 0x500   : > { %5326 = vmatmul.mubr.f32.gmra.mxu0 %v9055_v7  ;;  %v9121_v7 = vld [vmem:[#allocation11 + $0x70] sm:$0xff] }
 0x501   : > { %5328 = vmatprep.mubr.f32.mxu0 %v9064_v39  ;;  %5392 = vmatprep.subr.mxu0 %v9121_v7  ;;  %v3786_v39 = vld [vmem:[#allocation9 + $0x30] sm:$0xff] }
 0x502   : > { %5393 = vmatpush3.msra.mxu0 %v9121_v7  ;;  %5352 = vmatprep.subr.mxu1 %v3786_v39 }
 0x503   : > { %5394 = vmatprep.subr.mxu0 %v9125_v33  ;;  %5353 = vmatpush3.msra.mxu1 %v3786_v39 }
 0x504   : > { %5329 = vmatmul.mubr.f32.gmra.mxu0 %v9071_v30  ;;  %v9133_v30 = vld [vmem:[#allocation11 + $0x58] sm:$0xff]  ;;  %5354 = vmatprep.subr.mxu1 %v3785_v19 }
 0x505   : > { %5331 = vmatprep.mubr.f32.mxu0 %v2886_v27  ;;  %5395 = vmatpush3.msra.mxu0 %v9125_v33  ;;  %10101 = vst [vmem:[#allocation19_spill] sm:$0xff] %v9133_v30 }
 0x506   : > { %5396 = vmatprep.subr.mxu0 %v9129_v18  ;;  %5355 = vmatpush3.msra.mxu1 %v3785_v19  ;;  %v4492_v19 = vld [vmem:[%s6189_s24 + $0x330] sm:$0xff] }
 0x507   : > { %5397 = vmatpush3.msra.mxu0 %v9129_v18  ;;  %5356 = vmatprep.subr.mxu1 %v3784_v51 }
 0x508   : > { %5332 = vmatmul.mubr.f32.gmra.mxu0 %v2887_v41  ;;  %5398 = vmatprep.subr.mxu0 %v9133_v30  ;;  %v4491_v41 = vld [vmem:[%s6189_s24 + $0x328] sm:$0xff] }
 0x509   : > { %5399 = vmatpush3.msra.mxu0 %v9133_v30  ;;  %5357 = vmatpush3.msra.mxu1 %v3784_v51 }
 0x50a   : > { %5400 = vmatprep.subr.mxu0 %v9137_v31  ;;  %5358 = vmatprep.subr.mxu1 %v3783_v35 }
 0x50b   : > { %5401 = vmatpush3.msra.mxu0 %v9137_v31  ;;  %5359 = vmatpush3.msra.mxu1 %v3783_v35 }
 0x50c   : > { %5402 = vmatprep.subr.mxu0 %v9141_v55  ;;  %5360 = vmatprep.subr.mxu1 %v3782_v45 }
 0x50d   : > { %5403 = vmatpush3.msra.mxu0 %v9141_v55  ;;  %5361 = vmatpush3.msra.mxu1 %v3782_v45  ;;  %v4493_v45 = vld [vmem:[%s6189_s24 + $0x338] sm:$0xff] }
 0x50e   : > { %5404 = vmatprep.subr.mxu0 %v9145_v22  ;;  %5362 = vmatprep.subr.mxu1 %v3781_v24 }
 0x50f   : > { %5405 = vmatpush3.msra.mxu0 %v9145_v22  ;;  %5363 = vmatpush3.msra.mxu1 %v3781_v24 }
 0x510   : > { %5406 = vmatprep.subr.mxu0 %v9149_v60  ;;  %5364 = vmatprep.subr.mxu1 %v3780_v21 }
 0x511   : > { %5407 = vmatpush3.msra.mxu0 %v9149_v60  ;;  %5365 = vmatpush3.msra.mxu1 %v3780_v21 }
 0x512   : > { %5408 = vmatprep.subr.mxu0 %v9153_v8  ;;  %5422 = vmatprep.mubr.f32.mxu0 %v4486_v52 }
 0x513   : > { %5409 = vmatpush3.msra.mxu0 %v9153_v8  ;;  %5574 = vmatprep.subr.mxu1 %v9117_v5 }
 0x514   : > { %5410 = vmatprep.subr.mxu0 %v9157_v50 }
 0x515   : > { %5411 = vmatpush3.msra.mxu0 %v9157_v50 }
 0x516   : > { %5412 = vmatprep.subr.mxu0 %v9161_v12 }
 0x517   : > { %5413 = vmatpush3.msra.mxu0 %v9161_v12 }
 0x518   : > { %5414 = vmatprep.subr.mxu0 %v9165_v37 }
 0x519   : > { %5415 = vmatpush3.msra.mxu0 %v9165_v37 }
 0x51a   : > { %5416 = vmatprep.subr.mxu0 %v9174_v56 }
 0x51b   : > { %5417 = vmatpush3.msra.mxu0 %v9174_v56 }
 0x51c   : > { %5418 = vmatprep.subr.mxu0 %v9178_v38 }
 0x51d   : > { %5419 = vmatpush3.msra.mxu0 %v9178_v38 }
 0x51e   : > { %5420 = vmatprep.subr.mxu0 %v9183_v28 }
 0x51f   : > { %5421 = vmatpush3.msra.mxu0 %v9183_v28 }
 0x520   : > { %5423 = vmatmul.mubr.f32.vlgmr.msra.gmra.mxu0 %v4487_v11 }
 0x521   : > { %5425 = vmatprep.mubr.f32.mxu0 %v4488_v61 }
 0x524   : > { %5426 = vmatmul.mubr.f32.gmra.mxu0 %v4489_v59 }
 0x525   : > { %5428 = vmatprep.mubr.f32.mxu0 %v4490_v42 }
 0x528   : > { %5429 = vmatmul.mubr.f32.gmra.mxu0 %v4491_v41 }
 0x529   : > { %5431 = vmatprep.mubr.f32.mxu0 %v4492_v19 }
 0x52c   : > { %v4670_v17 = vpop.f32.mrf.mxu0  ;;  %5432 = vmatmul.mubr.f32.gmra.mxu0 %v4493_v45 }
 0x52d   : > { %v4750_v6 = vpop.f32.mrf.mxu1 }
 0x52e   : > { %v4671_v53 = vpop.f32.mrf.mxu0 }
 0x52f   : > { %v4672_v16 = vadd.f32 %v4671_v53, %v4670_v17  ;;  %v4751_v9 = vpop.f32.mrf.mxu1 }
 0x530   : > { %v4673_v49 = vpop.f32.mrf.mxu0  ;;  %v4752_v15 = vadd.f32 %v4751_v9, %v4750_v6 }
 0x531   : > { %v3106_v3 = vadd.f32 %v4672_v16, %v9171_v25  ;;  %v4753_v14 = vpop.f32.mrf.mxu1 }
 0x532   : > { %v4674_v40 = vpop.f32.mrf.mxu0 }
 0x533   : > { %v4675_v32 = vadd.f32 %v4674_v40, %v4673_v49  ;;  %v9187_v29 = vadd.f32 %v4752_v15, %v3106_v3  ;;  %v4754_v44 = vpop.f32.mrf.mxu1 }
 0x534   : > { %v4676_v23 = vpop.f32.mrf.mxu0  ;;  %v4755_v46 = vadd.f32 %v4754_v44, %v4753_v14 }
 0x535   : > { %v3111_v47 = vadd.f32 %v4675_v32, %v9171_v25 }
 0x536   : > { %v4677_v57 = vpop.f32.mrf.mxu0  ;;  %v4756_v13 = vpop.f32.mrf.mxu1 }
 0x537   : > { %v4678_v2 = vadd.f32 %v4677_v57, %v4676_v23  ;;  %v9194_v54 = vadd.f32 %v4755_v46, %v3111_v47 }
 0x538   : > { %v4679_v0 = vpop.f32.mrf.mxu0  ;;  %v4757_v58 = vpop.f32.mrf.mxu1 }
 0x539   : > { %v3116_v20 = vadd.f32 %v4678_v2, %v9171_v25  ;;  %v4758_v1 = vadd.f32 %v4757_v58, %v4756_v13 }
 0x53a   : > { %v4680_v26 = vpop.f32.mrf.mxu0  ;;  %v4759_v4 = vpop.f32.mrf.mxu1 }
 0x53b   : > { %v4681_v63 = vadd.f32 %v4680_v26, %v4679_v0  ;;  %v9199_v27 = vadd.f32 %v4758_v1, %v3116_v20 }
 0x53c   : > { %v4682_v43 = vpop.f32.mrf.mxu0  ;;  %v4760_v36 = vpop.f32.mrf.mxu1 }
 0x53d   : > { %v3121_v48 = vadd.f32 %v4681_v63, %v9171_v25  ;;  %v4761_v34 = vadd.f32 %v4760_v36, %v4759_v4 }
 0x53e   : > { %v4683_v62 = vpop.f32.mrf.mxu0  ;;  %v4762_v39 = vpop.f32.mrf.mxu1 }
 0x53f   : > { %v4684_v10 = vadd.f32 %v4683_v62, %v4682_v43  ;;  %v9204_v51 = vadd.f32 %v4761_v34, %v3121_v48 }
 0x540   : > { %v4685_v35 = vpop.f32.mrf.mxu0  ;;  %v4763_v53 = vpop.f32.mrf.mxu1 }
 0x541   : > { %v3126_v17 = vadd.f32 %v4684_v10, %v9171_v25  ;;  %v4764_v16 = vadd.f32 %v4763_v53, %v4762_v39 }
 0x542   : > { %v4686_v6 = vpop.f32.mrf.mxu0  ;;  %v4765_v49 = vpop.f32.mrf.mxu1 }
 0x543   : > { %v4687_v24 = vadd.f32 %v4686_v6, %v4685_v35  ;;  %v9208_v3 = vadd.f32 %v4764_v16, %v3126_v17 }
 0x544   : > { %v4688_v9 = vpop.f32.mrf.mxu0  ;;  %v4766_v40 = vpop.f32.mrf.mxu1 }
 0x545   : > { %v3131_v15 = vadd.f32 %v4687_v24, %v9171_v25  ;;  %v4767_v21 = vadd.f32 %v4766_v40, %v4765_v49 }
 0x546   : > { %v4689_v32 = vpop.f32.mrf.mxu0  ;;  %v4768_v52 = vpop.f32.mrf.mxu1 }
 0x547   : > { %v4690_v14 = vadd.f32 %v4689_v32, %v4688_v9  ;;  %v9211_v23 = vadd.f32 %v4767_v21, %v3131_v15 }
 0x548   : > { %v4691_v11 = vpop.f32.mrf.mxu0  ;;  %v4769_v44 = vpop.f32.mrf.mxu1 }
 0x549   : > { %v3136_v47 = vadd.f32 %v4690_v14, %v9171_v25  ;;  %v4770_v46 = vadd.f32 %v4769_v44, %v4768_v52 }
 0x54a   : > { %v4692_v57 = vpop.f32.mrf.mxu0  ;;  %v4771_v13 = vpop.f32.mrf.mxu1 }
 0x54b   : > { %v4693_v2 = vadd.f32 %v4692_v57, %v4691_v11  ;;  %v9214_v61 = vadd.f32 %v4770_v46, %v3136_v47 }
 0x54c   : > { %v4694_v0 = vpop.f32.mrf.mxu0  ;;  %v4772_v20 = vpop.f32.mrf.mxu1 }
 0x54d   : > { %v3141_v59 = vadd.f32 %v4693_v2, %v9171_v25  ;;  %v4773_v58 = vadd.f32 %v4772_v20, %v4771_v13 }
 0x54e   : > { %v4695_v1 = vpop.f32.mrf.mxu0  ;;  %v4774_v63 = vpop.f32.mrf.mxu1 }
 0x54f   : > { %v4696_v26 = vadd.f32 %v4695_v1, %v4694_v0  ;;  %v9217_v4 = vadd.f32 %v4773_v58, %v3141_v59 }
 0x550   : > { %v4697_v42 = vpop.f32.mrf.mxu0  ;;  %v4775_v41 = vpop.f32.mrf.mxu1 }
 0x551   : > { %v3146_v43 = vadd.f32 %v4696_v26, %v9171_v25  ;;  %v4776_v48 = vadd.f32 %v4775_v41, %v4774_v63 }
 0x552   : > { %v4698_v36 = vpop.f32.mrf.mxu0  ;;  %v4777_v62 = vpop.f32.mrf.mxu1 }
 0x553   : > { %v4699_v34 = vadd.f32 %v4698_v36, %v4697_v42  ;;  %v9220_v10 = vadd.f32 %v4776_v48, %v3146_v43 }
 0x554   : > { %v4700_v39 = vpop.f32.mrf.mxu0  ;;  %v4778_v35 = vpop.f32.mrf.mxu1 }
 0x555   : > { %10114 = vst [vmem:[#allocation32_spill] sm:$0xff] %v9220_v10  ;;  %v3151_v19 = vadd.f32 %v4699_v34, %v9171_v25  ;;  %v4779_v45 = vadd.f32 %v4778_v35, %v4777_v62 }
 0x556   : > { %v4701_v17 = vpop.f32.mrf.mxu0  ;;  %v4780_v16 = vpop.f32.mrf.mxu1 }
 0x557   : > { %v4702_v53 = vadd.f32 %v4701_v17, %v4700_v39  ;;  %v9223_v6 = vadd.f32 %v4779_v45, %v3151_v19 }
 0x558   : > { %v4703_v24 = vpop.f32.mrf.mxu0  ;;  %v4781_v9 = vpop.f32.mrf.mxu1 }
 0x559   : > { %10115 = vst [vmem:[#allocation33_spill] sm:$0xff] %v9223_v6  ;;  %v3156_v49 = vadd.f32 %v4702_v53, %v9171_v25  ;;  %v4782_v15 = vadd.f32 %v4781_v9, %v4780_v16 }
 0x55a   : > { %v4704_v40 = vpop.f32.mrf.mxu0  ;;  %v4783_v32 = vpop.f32.mrf.mxu1 }
 0x55b   : > { %v4705_v21 = vadd.f32 %v4704_v40, %v4703_v24  ;;  %v9226_v14 = vadd.f32 %v4782_v15, %v3156_v49 }
 0x55c   : > { %v4706_v52 = vpop.f32.mrf.mxu0  ;;  %v4784_v47 = vpop.f32.mrf.mxu1 }
 0x55d   : > { %10116 = vst [vmem:[#allocation34_spill] sm:$0xff] %v9226_v14  ;;  %v3161_v11 = vadd.f32 %v4705_v21, %v9171_v25  ;;  %v4785_v44 = vadd.f32 %v4784_v47, %v4783_v32 }
 0x55e   : > { %v4707_v46 = vpop.f32.mrf.mxu0  ;;  %v4786_v2 = vpop.f32.mrf.mxu1 }
 0x55f   : > { %v4708_v57 = vadd.f32 %v4707_v46, %v4706_v52  ;;  %v9229_v13 = vadd.f32 %v4785_v44, %v3161_v11 }
 0x560   : > { %v4709_v0 = vpop.f32.mrf.mxu0  ;;  %v4787_v20 = vpop.f32.mrf.mxu1 }
 0x561   : > { %10117 = vst [vmem:[#allocation35_spill] sm:$0xff] %v9229_v13  ;;  %v3166_v59 = vadd.f32 %v4708_v57, %v9171_v25  ;;  %v4788_v58 = vadd.f32 %v4787_v20, %v4786_v2 }
 0x562   : > { %v4710_v1 = vpop.f32.mrf.mxu0  ;;  %v4789_v63 = vpop.f32.mrf.mxu1 }
 0x563   : > { %v4711_v26 = vadd.f32 %v4710_v1, %v4709_v0  ;;  %v9232_v42 = vadd.f32 %v4788_v58, %v3166_v59 }
 0x564   : > { %v4712_v43 = vpop.f32.mrf.mxu0  ;;  %v4790_v48 = vpop.f32.mrf.mxu1 }
 0x565   : > { %10118 = vst [vmem:[#allocation36_spill] sm:$0xff] %v9232_v42  ;;  %v3171_v41 = vadd.f32 %v4711_v26, %v9171_v25  ;;  %v4791_v36 = vadd.f32 %v4790_v48, %v4789_v63 }
 0x566   : > { %v4713_v34 = vpop.f32.mrf.mxu0  ;;  %v4792_v39 = vpop.f32.mrf.mxu1 }
 0x567   : > { %v4714_v62 = vadd.f32 %v4713_v34, %v4712_v43  ;;  %v9235_v19 = vadd.f32 %v4791_v36, %v3171_v41 }
 0x568   : > { %v4715_v35 = vpop.f32.mrf.mxu0  ;;  %v4793_v17 = vpop.f32.mrf.mxu1 }
 0x569   : > { %10119 = vst [vmem:[#allocation37_spill] sm:$0xff] %v9235_v19  ;;  %v3176_v45 = vadd.f32 %v4714_v62, %v9171_v25  ;;  %v4794_v53 = vadd.f32 %v4793_v17, %v4792_v39 }
 0x56a   : > { %v4716_v16 = vpop.f32.mrf.mxu0  ;;  %v9240_v49 = vpop.f32.mrf.mxu1 }
 0x56b   : > { %v9238_v24 = vadd.f32 %v4716_v16, %v4715_v35  ;;  %10121 = vst [vmem:[#allocation39_spill] sm:$0xff] %v9240_v49  ;;  %v9242_v9 = vadd.f32 %v4794_v53, %v3176_v45 }
 0x56c   : > { %v4830_v15 = vpop.f32.mrf.mxu0  ;;  %v9244_v40 = vpop.f32.mrf.mxu1 }
 0x56d   : > { %10120 = vst [vmem:[#allocation38_spill] sm:$0xff] %v9238_v24  ;;  %10122 = vst [vmem:[#allocation40_spill] sm:$0xff] %v9242_v9 }
 0x56e   : > { %10123 = vst [vmem:[#allocation41_spill] sm:$0xff] %v9244_v40  ;;  %v4831_v21 = vpop.f32.mrf.mxu0  ;;  %v4910_v32 = vpop.f32.mrf.mxu1 }
 0x56f   : > { %v4832_v10 = vadd.f32 %v4831_v21, %v4830_v15 }
 0x570   : > { %v4833_v52 = vpop.f32.mrf.mxu0  ;;  %v4911_v11 = vpop.f32.mrf.mxu1 }
 0x572   : > { %v4834_v47 = vpop.f32.mrf.mxu0  ;;  %v4913_v44 = vpop.f32.mrf.mxu1 }
 0x574   : > { %v4836_v46 = vpop.f32.mrf.mxu0  ;;  %v4914_v57 = vpop.f32.mrf.mxu1 }
 0x576   : > { %v4837_v2 = vpop.f32.mrf.mxu0  ;;  %v9246_v0 = vpop.f32.mrf.mxu1 }
 0x578   : > { %v4839_v59 = vpop.f32.mrf.mxu0  ;;  %v4917_v20 = vpop.f32.mrf.mxu1 }
 0x57a   : > { %v4840_v58 = vpop.f32.mrf.mxu0  ;;  %v4919_v1 = vpop.f32.mrf.mxu1 }
 0x57c   : > { %v4842_v26 = vpop.f32.mrf.mxu0  ;;  %v4920_v63 = vpop.f32.mrf.mxu1 }
 0x57d   : > { %v4921_v21 = vadd.f32 %v4920_v63, %v4919_v1 }
 0x57e   : > { %v4843_v43 = vpop.f32.mrf.mxu0  ;;  %v4922_v41 = vpop.f32.mrf.mxu1 }
 0x580   : > { %v4845_v48 = vpop.f32.mrf.mxu0  ;;  %v4923_v36 = vpop.f32.mrf.mxu1 }
 0x582   : > { %v4846_v34 = vpop.f32.mrf.mxu0  ;;  %v4925_v62 = vpop.f32.mrf.mxu1 }
 0x584   : > { %v9248_v39 = vpop.f32.mrf.mxu0  ;;  %v4926_v35 = vpop.f32.mrf.mxu1 }
 0x586   : > { %v4849_v45 = vpop.f32.mrf.mxu0  ;;  %v9250_v17 = vpop.f32.mrf.mxu1 }
 0x588   : > { %v4851_v53 = vpop.f32.mrf.mxu0  ;;  %v9252_v16 = vpop.f32.mrf.mxu1 }
 0x58a   : > { %v4852_v28 = vpop.f32.mrf.mxu0  ;;  %v9254_v38 = vpop.f32.mrf.mxu1 }
 0x58c   : > { %v9256_v56 = vpop.f32.mrf.mxu0  ;;  %v9258_v37 = vpop.f32.mrf.mxu1 }
 0x58e   : > { %v9260_v12 = vpop.f32.mrf.mxu0  ;;  %v9262_v50 = vpop.f32.mrf.mxu1 }
 0x58f   : > { %10124 = vst [vmem:[#allocation42_spill] sm:$0xff] %v9262_v50  ;;  %v4835_v50 = vadd.f32 %v4834_v47, %v4833_v52  ;;  %v4844_v47 = vadd.f32 %v4843_v43, %v4842_v26  ;;  %v4930_v26 = vadd.f32 %v9252_v16, %v9250_v17  ;;  %v4856_v63 = vadd.f32 %v9260_v12, %v9256_v56  ;;  %v10138_v12 = vld [vmem:[#allocation33_spill] sm:$0xff] }
 0x590   : > { %v9264_v8 = vpop.f32.mrf.mxu0  ;;  %v9266_v9 = vpop.f32.mrf.mxu1 }
 0x591   : > { %10125 = vst [vmem:[#allocation43_spill] sm:$0xff] %v9266_v9 }
 0x592   : > { %v4858_v60 = vpop.f32.mrf.mxu0  ;;  %v9268_v22 = vpop.f32.mrf.mxu1 }
 0x593   : > { %10126 = vst [vmem:[#allocation44_spill] sm:$0xff] %v9268_v22 }
 0x594   : > { %v9270_v42 = vpop.f32.mrf.mxu0  ;;  %v9272_v55 = vpop.f32.mrf.mxu1 }
 0x595   : > { %10127 = vst [vmem:[#allocation45_spill] sm:$0xff] %v9272_v55  ;;  %v4915_v55 = vadd.f32 %v4914_v57, %v4913_v44 }
 0x596   : > { %v9274_v19 = vpop.f32.mrf.mxu0  ;;  %v9276_v31 = vpop.f32.mrf.mxu1 }
 0x597   : > { %10128 = vst [vmem:[#allocation46_spill] sm:$0xff] %v9276_v31 }
 0x598   : > { %v9278_v40 = vpop.f32.mrf.mxu0  ;;  %v9280_v49 = vpop.f32.mrf.mxu1 }
 0x599   : > { %10129 = vst [vmem:[#allocation47_spill] sm:$0xff] %v9280_v49 }
 0x59a   : > { %v9282_v24 = vpop.f32.mrf.mxu0  ;;  %v9286_v30 = vpop.f32.mrf.mxu1 }
 0x59b   : > { %10131 = vst [vmem:[#allocation49_spill] sm:$0xff] %v9286_v30  ;;  %v4841_v30 = vadd.f32 %v4840_v58, %v4839_v59 }
 0x59c   : > { %v9284_v25 = vpop.f32.mrf.mxu0  ;;  %v9292_v14 = vpop.f32.mrf.mxu1 }
 0x59d   : > { %10130 = vst [vmem:[#allocation48_spill] sm:$0xff] %v9284_v25  ;;  %10134 = vst [vmem:[#allocation52_spill] sm:$0xff] %v9292_v14  ;;  %v3401_v25 = vadd.f32 %v4835_v50, %v9194_v54  ;;  %v4838_v14 = vadd.f32 %v4837_v2, %v4836_v46  ;;  %v3411_v15 = vadd.f32 %v4841_v30, %v9204_v51 }
 0x59e   : > { %v9288_v13 = vpop.f32.mrf.mxu0  ;;  %v9298_v33 = vpop.f32.mrf.mxu1  ;;  %v4918_v54 = vadd.f32 %v4917_v20, %v9246_v0  ;;  %v4924_v46 = vadd.f32 %v4923_v36, %v4922_v41  ;;  %v4927_v30 = vadd.f32 %v4926_v35, %v4925_v62  ;;  %v4853_v51 = vadd.f32 %v4852_v28, %v4851_v53  ;;  %v10140_v36 = vld [vmem:[#allocation45_spill] sm:$0xff]  ;;  %v10143_v35 = vld [vmem:[#allocation42_spill] sm:$0xff] }
 0x59f   : > { %10132 = vst [vmem:[#allocation50_spill] sm:$0xff] %v9288_v13  ;;  %10136 = vst [vmem:[#allocation54_spill] sm:$0xff] %v9298_v33  ;;  %v3396_v13 = vadd.f32 %v4832_v10, %v9187_v29  ;;  %v3406_v50 = vadd.f32 %v4838_v14, %v9199_v27  ;;  %v3556_v59 = vadd.f32 %v4921_v21, %v3411_v15  ;;  %v10145_v53 = vld [vmem:[#allocation34_spill] sm:$0xff] }
 0x5a0   : > { %v9290_v18 = vpop.f32.mrf.mxu0  ;;  %v9306_v6 = vpop.f32.mrf.mxu1  ;;  %v4859_v28 = vadd.f32 %v4858_v60, %v9264_v8  ;;  %v10147_v15 = vld [vmem:[#allocation47_spill] sm:$0xff] }
 0x5a1   : > { %10133 = vst [vmem:[#allocation51_spill] sm:$0xff] %v9290_v18  ;;  %v4912_v18 = vadd.f32 %v4911_v11, %v4910_v32  ;;  %v3416_v11 = vadd.f32 %v4844_v47, %v9208_v3  ;;  %v3551_v0 = vadd.f32 %v4918_v54, %v3406_v50  ;;  %v10146_v47 = vld [vmem:[#allocation46_spill] sm:$0xff] }
 0x5a2   : > { %v9294_v9 = vpop.f32.mrf.mxu0  ;;  %v9313_v44 = vpop.f32.mrf.mxu1  ;;  %v3441_v56 = vadd.f32 %v4859_v28, %v10138_v12  ;;  %v4942_v21 = vadd.f32 %v10147_v15, %v10146_v47  ;;  %v10168_v47 = vld [vmem:[#allocation23_spill] sm:$0xff]  ;;  %v10169_v15 = vld [vmem:[#allocation40_spill] sm:$0xff] }
 0x5a3   : > { %v3541_v29 = vadd.f32 %v4912_v18, %v3396_v13  ;;  %v3561_v3 = vadd.f32 %v4924_v46, %v3416_v11  ;;  %v10150_v46 = vld [vmem:[#allocation49_spill] sm:$0xff] }
 0x5a4   : > { %v9296_v31 = vpop.f32.mrf.mxu0  ;;  %v9318_v27 = vpop.f32.mrf.mxu1 }
 0x5a5   : > { %10135 = vst [vmem:[#allocation53_spill] sm:$0xff] %v9296_v31  ;;  %v4847_v31 = vadd.f32 %v4846_v34, %v4845_v48  ;;  %v10139_v48 = vld [vmem:[#allocation44_spill] sm:$0xff] }
 0x5a6   : > { %v9300_v49 = vpop.f32.mrf.mxu0  ;;  %v9329_v43 = vpop.f32.mrf.mxu1 }
 0x5a7   : > { %10137 = vst [vmem:[#allocation55_spill] sm:$0xff] %v9300_v49  ;;  %v3546_v49 = vadd.f32 %v4915_v55, %v3401_v25  ;;  %v3421_v2 = vadd.f32 %v4847_v31, %v9211_v23  ;;  %v4850_v25 = vadd.f32 %v4849_v45, %v9248_v39  ;;  %v4933_v31 = vadd.f32 %v9258_v37, %v9254_v38  ;;  %v10144_v45 = vld [vmem:[#allocation43_spill] sm:$0xff] }
 0x5a8   : > { %v9303_v22 = vpop.f32.mrf.mxu0  ;;  %v4862_v37 = vadd.f32 %v9274_v19, %v9270_v42  ;;  %v10141_v42 = vld [vmem:[#allocation17_spill] sm:$0xff]  ;;  %v10142_v19 = vld [vmem:[#allocation32_spill] sm:$0xff]  ;;  %v4936_v17 = vadd.f32 %v10144_v45, %v10143_v35 }
 0x5a9   : > { %v3566_v23 = vadd.f32 %v4927_v30, %v3421_v2  ;;  %v3426_v1 = vadd.f32 %v4850_v25, %v9214_v61  ;;  %v4865_v61 = vadd.f32 %v9282_v24, %v9278_v40  ;;  %v3436_v39 = vadd.f32 %v4856_v63, %v10142_v19  ;;  %v9345_v24 = vpop.f32.mrf.mxu1 }
 0x5aa   : > { %v9308_v52 = vpop.f32.mrf.mxu0  ;;  %v3446_v16 = vadd.f32 %v4862_v37, %v10145_v53 }
 0x5ab   : > { %v4877_v12 = vadd.f32 %v9308_v52, %v9303_v22  ;;  %v10167_v52 = vld [vmem:[#allocation22_spill] sm:$0xff] }
 0x5ac   : > { %v5312_v33 = vpop.f32.mrf.mxu0 }
 0x5ad   : > { %v3691_v10 = vadd.f32 %v5312_v33, %v3546_v49  ;;  %v3431_v49 = vadd.f32 %v4853_v51, %v9217_v4  ;;  %v10152_v51 = vld [vmem:[#allocation51_spill] sm:$0xff] }
 0x5ae   : > { %v3685_v32 = vpop.f32.mrf.mxu0  ;;  %v10166_v19 = vld [vmem:[#allocation55_spill] sm:$0xff] }
 0x5af   : > { %v3686_v57 = vadd.f32 %v3685_v32, %v3541_v29  ;;  %v3765_v20 = vmax.f32 %v3691_v10, 0.0  ;;  %v3576_v34 = vadd.f32 %v4933_v31, %v3431_v49  ;;  %v10148_v10 = vld [vmem:[#allocation18_spill] sm:$0xff]  ;;  %v10149_v32 = vld [vmem:[#allocation35_spill] sm:$0xff]  ;;  %v10156_v49 = vld [vmem:[#allocation28_spill] sm:$0xff] }
 0x5b0   : > { %v5315_v55 = vpop.f32.mrf.mxu0  ;;  %v3451_v11 = vadd.f32 %v4865_v61, %v10149_v32  ;;  %v10157_v31 = vld [vmem:[#allocation38_spill] sm:$0xff] }
 0x5b1   : > { %v3764_v14 = vmax.f32 %v3686_v57, 0.0  ;;  %v3701_v18 = vadd.f32 %v5315_v55, %v3556_v59  ;;  %v10151_v57 = vld [vmem:[#allocation52_spill] sm:$0xff]  ;;  %v4871_v59 = vadd.f32 %v9294_v9, %v10152_v51  ;;  %v3181_v28 = vadd.f32 %v10157_v31, %v10156_v49  ;;  %v10171_v51 = vld [vmem:[#allocation25_spill] sm:$0xff]  ;;  %v10175_v49 = vld [vmem:[#allocation30_spill] sm:$0xff] }
 0x5b2   : > { %v3695_v33 = vpop.f32.mrf.mxu0  ;;  %v4945_v2 = vadd.f32 %v10151_v57, %v10150_v46  ;;  %v10170_v46 = vld [vmem:[#allocation24_spill] sm:$0xff]  ;;  %v4495_v31 = vld [vmem:[%s6189_s24 + $0x348] sm:$0xff] }
 0x5b3   : > { %v3696_v13 = vadd.f32 %v3695_v33, %v3551_v0  ;;  %5366 = vmatprep.mubr.f32.mxu1 %v3764_v14  ;;  %v3767_v60 = vmax.f32 %v3701_v18, 0.0  ;;  %v10153_v14 = vld [vmem:[#allocation19_spill] sm:$0xff]  ;;  %v10154_v0 = vld [vmem:[#allocation48_spill] sm:$0xff]  ;;  %v4955_v33 = vpop.f32.mrf.mxu1 }
 0x5b4   : > { %v5318_v58 = vpop.f32.mrf.mxu0  ;;  %5367 = vmatmul.mubr.f32.vlgmr.msra.gmra.mxu1 %v3765_v20  ;;  %v10155_v20 = vld [vmem:[#allocation50_spill] sm:$0xff] }
 0x5b5   : > { %v3766_v41 = vmax.f32 %v3696_v13, 0.0  ;;  %5590 = vmatpush3.msra.mxu1 %v9117_v5  ;;  %v3711_v8 = vadd.f32 %v5318_v58, %v3566_v23  ;;  %v4939_v5 = vadd.f32 %v10140_v36, %v10139_v48  ;;  %v4868_v18 = vadd.f32 %v10155_v20, %v10154_v0  ;;  %v10158_v23 = vld [vmem:[#allocation39_spill] sm:$0xff]  ;;  %v10159_v58 = vld [vmem:[#allocation41_spill] sm:$0xff]  ;;  %v10163_v36 = vld [vmem:[#allocation36_spill] sm:$0xff]  ;;  %v4956_v35 = vpop.f32.mrf.mxu1 }
 0x5b6   : > { %v3705_v38 = vpop.f32.mrf.mxu0  ;;  %5575 = vmatprep.subr.mxu1 %v9121_v7  ;;  %v10162_v48 = vld [vmem:[#allocation21_spill] sm:$0xff]  ;;  %v4957_v53 = vadd.f32 %v4956_v35, %v4955_v33  ;;  %v10173_v20 = vld [vmem:[#allocation27_spill] sm:$0xff] }
 0x5b7   : > { %v3706_v4 = vadd.f32 %v3705_v38, %v3561_v3  ;;  %5369 = vmatprep.mubr.f32.mxu1 %v3766_v41  ;;  %5591 = vmatpush3.msra.mxu1 %v9121_v7  ;;  %v3571_v7 = vadd.f32 %v4930_v26, %v3426_v1  ;;  %v3769_v50 = vmax.f32 %v3711_v8, 0.0  ;;  %v3586_v55 = vadd.f32 %v4939_v5, %v3441_v56  ;;  %v10160_v41 = vld [vmem:[#allocation20_spill] sm:$0xff]  ;;  %v10161_v38 = vld [vmem:[#allocation37_spill] sm:$0xff] }
 0x5b8   : > { %v5321_v62 = vpop.f32.mrf.mxu0  ;;  %5370 = vmatmul.mubr.f32.gmra.mxu1 %v3767_v60  ;;  %5576 = vmatprep.subr.mxu1 %v10141_v42  ;;  %v3581_v3 = vadd.f32 %v4936_v17, %v3436_v39  ;;  %v4797_v1 = vadd.f32 %v10159_v58, %v10158_v23  ;;  %v3596_v60 = vadd.f32 %v4945_v2, %v3451_v11  ;;  %v4496_v23 = vld [vmem:[%s6189_s24 + $0x350] sm:$0xff]  ;;  %v4497_v58 = vld [vmem:[%s6189_s24 + $0x358] sm:$0xff] }
 0x5b9   : > { %v3768_v40 = vmax.f32 %v3706_v4, 0.0  ;;  %5592 = vmatpush3.msra.mxu1 %v10141_v42  ;;  %v3721_v54 = vadd.f32 %v5321_v62, %v3576_v34  ;;  %v3591_v8 = vadd.f32 %v4942_v21, %v3446_v16  ;;  %v3461_v61 = vadd.f32 %v4871_v59, %v10161_v38  ;;  %v10164_v34 = vld [vmem:[#allocation54_spill] sm:$0xff]  ;;  %v10165_v42 = vld [vmem:[#allocation53_spill] sm:$0xff] }
 0x5ba   : > { %v3715_v29 = vpop.f32.mrf.mxu0  ;;  %5577 = vmatprep.subr.mxu1 %v10148_v10  ;;  %v4951_v4 = vadd.f32 %v9318_v27, %v9313_v44  ;;  %v3456_v5 = vadd.f32 %v4868_v18, %v10163_v36  ;;  %v4948_v62 = vadd.f32 %v9306_v6, %v10164_v34  ;;  %v4874_v39 = vadd.f32 %v10166_v19, %v10165_v42  ;;  %v9412_v38 = vld [vmem:[%s9525_s8] ss:$0 sm:$0xff] }
 0x5bb   : > { %v3716_v30 = vadd.f32 %v3715_v29, %v3571_v7  ;;  %5372 = vmatprep.mubr.f32.mxu1 %v3768_v40  ;;  %5593 = vmatpush3.msra.mxu1 %v10148_v10  ;;  %v3771_v9 = vmax.f32 %v3721_v54, 0.0  ;;  %v3326_v44 = vadd.f32 %v4797_v1, %v3181_v28  ;;  %v10176_v28 = vld [vmem:[#allocation31_spill] sm:$0xff]  ;;  %v4498_v1 = vld [vmem:[%s6189_s24 + $0x360] sm:$0xff] }
 0x5bc   : > { %v5324_v25 = vpop.f32.mrf.mxu0  ;;  %5373 = vmatmul.mubr.f32.gmra.mxu1 %v3769_v50  ;;  %5578 = vmatprep.subr.mxu1 %v10153_v14  ;;  %v3606_v6 = vadd.f32 %v4951_v4, %v3461_v61  ;;  %v3466_v21 = vadd.f32 %v4874_v39, %v10169_v15  ;;  %v4954_v50 = vadd.f32 %v9345_v24, %v9329_v43  ;;  %v9417_v61 = vld [vmem:[%s9523_s6] ss:$0 sm:$0xff] }
 0x5bd   : > { %v3770_v13 = vmax.f32 %v3716_v30, 0.0  ;;  %5594 = vmatpush3.msra.mxu1 %v10153_v14  ;;  %v3731_v26 = vadd.f32 %v5324_v25, %v3586_v55  ;;  %v3471_v7 = vadd.f32 %v4877_v12, %v3326_v44  ;;  %v3601_v29 = vadd.f32 %v4948_v62, %v3456_v5  ;;  %v10172_v14 = vld [vmem:[#allocation26_spill] sm:$0xff] }
 0x5be   : > { %v3725_v63 = vpop.f32.mrf.mxu0  ;;  %5579 = vmatprep.subr.mxu1 %v10160_v41  ;;  %v3611_v43 = vadd.f32 %v4954_v50, %v3466_v21 }
 0x5bf   : > { %v3726_v37 = vadd.f32 %v3725_v63, %v3581_v3  ;;  %5375 = vmatprep.mubr.f32.mxu1 %v3770_v13  ;;  %5595 = vmatpush3.msra.mxu1 %v10160_v41  ;;  %v3773_v27 = vmax.f32 %v3731_v26, 0.0  ;;  %v3616_v2 = vadd.f32 %v4957_v53, %v3471_v7  ;;  %v10174_v13 = vld [vmem:[#allocation29_spill] sm:$0xff]  ;;  %v4500_v26 = vld [vmem:[%s6189_s24 + $0x370] sm:$0xff]  ;;  %v4501_v63 = vld [vmem:[%s6189_s24 + $0x378] sm:$0xff] }
 0x5c0   : > { %v5327_v56 = vpop.f32.mrf.mxu0  ;;  %5376 = vmatmul.mubr.f32.gmra.mxu1 %v3771_v9  ;;  %5580 = vmatprep.subr.mxu1 %v10162_v48  ;;  %v4494_v3 = vld [vmem:[%s6189_s24 + $0x340] sm:$0xff]  ;;  %v4499_v9 = vld [vmem:[%s6189_s24 + $0x368] sm:$0xff]  ;;  %s4509_s24 = sshll.u32 %s6048_s13, 11  ;;  %s5974_s13 = smov [#allocation12]  }
 0x5c1   : > { %v3772_v45 = vmax.f32 %v3726_v37, 0.0  ;;  %5596 = vmatpush3.msra.mxu1 %v10162_v48  ;;  %v3741_v17 = vadd.f32 %v5327_v56, %v3596_v60  ;;  %s9470_s5 = scalar_lea.hbm %s9526_s9, %s4509_s24  ;;  %s5865_s27 = sshll.u32 %s5974_s13, 4  ;;  %s5866_s27 = int_to_ptr.vmem [resolvable:$false] %s5865_s27 }
 0x5c2   : > { %v3735_v22 = vpop.f32.mrf.mxu0  ;;  %5581 = vmatprep.subr.mxu1 %v10167_v52  ;;  %s5867_s15 = scalar_lea.vmem %s5866_s27, 4096  ;;  %p5868_p6 = scmp.lt.s32.totalorder %s9472_s28, %s5866_s27 }
 0x5c3   : > { %v3736_v40 = vadd.f32 %v3735_v22, %v3591_v8  ;;  %5378 = vmatprep.mubr.f32.mxu1 %v3772_v45  ;;  %5597 = vmatpush3.msra.mxu1 %v10167_v52  ;;  %v3775_v10 = vmax.f32 %v3741_v17, 0.0  ;;  %p5869_p4 = scmp.lt.s32.totalorder %s5867_s15, %s5861_s17 }
 0x5c4   : > { %v5330_v16 = vpop.f32.mrf.mxu0  ;;  %5379 = vmatmul.mubr.f32.gmra.mxu1 %v3773_v27  ;;  %5582 = vmatprep.subr.mxu1 %v10168_v47 }
 0x5c5   : > { %v3774_v54 = vmax.f32 %v3736_v40, 0.0  ;;  %5598 = vmatpush3.msra.mxu1 %v10168_v47  ;;  %v3751_v32 = vadd.f32 %v5330_v16, %v3606_v6  ;;  %p5870_p8 = por %p5869_p4, %p5868_p6 }
 0x5c6   : > { %v3745_v11 = vpop.f32.mrf.mxu0  ;;  %5583 = vmatprep.subr.mxu1 %v10170_v46 }
 0x5c7   : > { %v3746_v57 = vadd.f32 %v3745_v11, %v3601_v29  ;;  %5381 = vmatprep.mubr.f32.mxu1 %v3774_v54  ;;  %5599 = vmatpush3.msra.mxu1 %v10170_v46  ;;  %v3777_v24 = vmax.f32 %v3751_v32, 0.0  ;;  %p5871_p9 = pnand %p5870_p8, %p5864_p5 }
 0x5c8   : > { %v5333_v30 = vpop.f32.mrf.mxu0  ;;  %5382 = vmatmul.mubr.f32.gmra.mxu1 %v3775_v10  ;;  %5584 = vmatprep.subr.mxu1 %v10171_v51 }
 0x5c9   : > { %v3776_v59 = vmax.f32 %v3746_v57, 0.0  ;;  %5600 = vmatpush3.msra.mxu1 %v10171_v51  ;;  %v3761_v55 = vadd.f32 %v5333_v30, %v3616_v2 }
 0x5ca   : > { %v3755_v25 = vpop.f32.mrf.mxu0  ;;  %5585 = vmatprep.subr.mxu1 %v10172_v14 }
 0x5cb   : > { %v3756_v0 = vadd.f32 %v3755_v25, %v3611_v43  ;;  %5384 = vmatprep.mubr.f32.mxu1 %v3776_v59  ;;  %5601 = vmatpush3.msra.mxu1 %v10172_v14  ;;  %v3779_v33 = vmax.f32 %v3761_v55, 0.0 }
 0x5cc   : > { %5385 = vmatmul.mubr.f32.gmra.mxu1 %v3777_v24  ;;  %5586 = vmatprep.subr.mxu1 %v10173_v20 }
 0x5cd   : > { %v3778_v18 = vmax.f32 %v3756_v0, 0.0  ;;  %5602 = vmatpush3.msra.mxu1 %v10173_v20 }
 0x5ce   : > { %5587 = vmatprep.subr.mxu1 %v10174_v13 }
 0x5cf   : > { %5387 = vmatprep.mubr.f32.mxu1 %v3778_v18  ;;  %5603 = vmatpush3.msra.mxu1 %v10174_v13 }
 0x5d0   : > { %5388 = vmatmul.mubr.f32.gmra.mxu1 %v3779_v33  ;;  %5588 = vmatprep.subr.mxu1 %v10175_v49 }
 0x5d1   : > { %5604 = vmatpush3.msra.mxu1 %v10175_v49  ;;  %5434 = vmatprep.mubr.f32.mxu1 %v4494_v3 }
 0x5d2   : > { %5589 = vmatprep.subr.mxu1 %v10176_v28 }
 0x5d3   : > { %5605 = vmatpush3.msra.mxu1 %v10176_v28 }
 0x5d4   : > { %5435 = vmatmul.mubr.f32.vlgmr.msra.gmra.mxu1 %v4495_v31 }
 0x5d5   : > { %5437 = vmatprep.mubr.f32.mxu1 %v4496_v23 }
 0x5d8   : > { %5438 = vmatmul.mubr.f32.gmra.mxu1 %v4497_v58 }
 0x5d9   : > { %5440 = vmatprep.mubr.f32.mxu1 %v4498_v1 }
 0x5dc   : > { %5441 = vmatmul.mubr.f32.gmra.mxu1 %v4499_v9 }
 0x5dd   : > { %5443 = vmatprep.mubr.f32.mxu1 %v4500_v26 }
 0x5e0   : > { %5444 = vmatmul.mubr.f32.gmra.mxu1 %v4501_v63  ;;  %v5424_v41 = vpop.f32.mrf.mxu0 }
 0x5e1   : > { %v4060_v12 = vadd.f32 %v5424_v41, %v9412_v38 }
 0x5e2   : > { %v4054_v37 = vpop.f32.mrf.mxu0 }
 0x5e3   : > { %v4055_v36 = vadd.f32 %v9412_v38, %v4054_v37 }
 0x5e4   : > { %v5427_v60 = vpop.f32.mrf.mxu0 }
 0x5e5   : > { %v4070_v19 = vadd.f32 %v5427_v60, %v9412_v38 }
 0x5e6   : > { %v4064_v8 = vpop.f32.mrf.mxu0 }
 0x5e7   : > { %v4065_v27 = vadd.f32 %v9412_v38, %v4064_v8 }
 0x5e8   : > { %v5430_v4 = vpop.f32.mrf.mxu0 }
 0x5e9   : > { %v4080_v53 = vadd.f32 %v5430_v4, %v9412_v38 }
 0x5ea   : > { %v4074_v34 = vpop.f32.mrf.mxu0 }
 0x5eb   : > { %v4075_v21 = vadd.f32 %v9412_v38, %v4074_v34 }
 0x5ec   : > { %v5433_v22 = vpop.f32.mrf.mxu0 }
 0x5ed   : > { %v4090_v11 = vadd.f32 %v5433_v22, %v9412_v38 }
 0x5ee   : > { %v4084_v54 = vpop.f32.mrf.mxu0 }
 0x5ef   : > { %v4085_v51 = vadd.f32 %v9412_v38, %v4084_v54 }
 0x674   : > { %v5368_v56 = vpop.f32.mrf.mxu1 }
 0x675   : > { %v3875_v48 = vadd.f32 %v5368_v56, %v9417_v61 }
 0x676   : > { %v3869_v5 = vpop.f32.mrf.mxu1 }
 0x677   : > { %v4134_v62 = vadd.f32 %v4060_v12, %v3875_v48  ;;  %v3870_v42 = vadd.f32 %v9417_v61, %v3869_v5 }
 0x678   : > { %v5371_v39 = vpop.f32.mrf.mxu1 }
 0x679   : > { %v4150_v35 = vmax.f32 %v4134_v62, 0.0  ;;  %v4133_v45 = vadd.f32 %v4055_v36, %v3870_v42  ;;  %v3885_v44 = vadd.f32 %v5371_v39, %v9417_v61 }
 0x67a   : > { %v3879_v17 = vpop.f32.mrf.mxu1 }
 0x67b   : > { %4166 = vst [vmem:[%s6204_s26 + $0x8] sm:$0xff] %v4150_v35  ;;  %v4149_v52 = vmax.f32 %v4133_v45, 0.0  ;;  %v4136_v40 = vadd.f32 %v4070_v19, %v3885_v44  ;;  %v3880_v7 = vadd.f32 %v9417_v61, %v3879_v17 }
 0x67c   : > { %v5374_v6 = vpop.f32.mrf.mxu1 }
 0x67d   : > { %4165 = vst [vmem:[%s6204_s26] sm:$0xff] %v4149_v52  ;;  %v4152_v16 = vmax.f32 %v4136_v40, 0.0  ;;  %v4135_v47 = vadd.f32 %v4065_v27, %v3880_v7  ;;  %v3895_v15 = vadd.f32 %v5374_v6, %v9417_v61 }
 0x67e   : > { %v3889_v50 = vpop.f32.mrf.mxu1 }
 0x67f   : > { %4168 = vst [vmem:[%s6204_s26 + $0x18] sm:$0xff] %v4152_v16  ;;  %v4151_v29 = vmax.f32 %v4135_v47, 0.0  ;;  %v4138_v10 = vadd.f32 %v4080_v53, %v3895_v15  ;;  %v3890_v32 = vadd.f32 %v9417_v61, %v3889_v50 }
 0x680   : > { %v5377_v46 = vpop.f32.mrf.mxu1 }
 0x681   : > { %4167 = vst [vmem:[%s6204_s26 + $0x10] sm:$0xff] %v4151_v29  ;;  %v4154_v57 = vmax.f32 %v4138_v10, 0.0  ;;  %v4137_v2 = vadd.f32 %v4075_v21, %v3890_v32  ;;  %v3905_v30 = vadd.f32 %v5377_v46, %v9417_v61 }
 0x682   : > { %v3899_v59 = vpop.f32.mrf.mxu1 }
 0x683   : > { %4170 = vst [vmem:[%s6204_s26 + $0x28] sm:$0xff] %v4154_v57  ;;  %v4153_v43 = vmax.f32 %v4137_v2, 0.0  ;;  %v4140_v24 = vadd.f32 %v4090_v11, %v3905_v30  ;;  %v3900_v55 = vadd.f32 %v9417_v61, %v3899_v59 }
 0x684   : > { %v5380_v25 = vpop.f32.mrf.mxu1 }
 0x685   : > { %4169 = vst [vmem:[%s6204_s26 + $0x20] sm:$0xff] %v4153_v43  ;;  %v4156_v14 = vmax.f32 %v4140_v24, 0.0  ;;  %v4139_v0 = vadd.f32 %v4085_v51, %v3900_v55  ;;  %v3915_v58 = vadd.f32 %v5380_v25, %v9417_v61 }
 0x686   : > { %v3909_v20 = vpop.f32.mrf.mxu1 }
 0x687   : > { %4172 = vst [vmem:[%s6204_s26 + $0x38] sm:$0xff] %v4156_v14  ;;  %v4155_v18 = vmax.f32 %v4139_v0, 0.0  ;;  %v3910_v26 = vadd.f32 %v9417_v61, %v3909_v20 }
 0x688   : > { %v5383_v33 = vpop.f32.mrf.mxu1 }
 0x689   : > { %4171 = vst [vmem:[%s6204_s26 + $0x30] sm:$0xff] %v4155_v18  ;;  %v3925_v60 = vadd.f32 %v5383_v33, %v9417_v61 }
 0x68a   : > { %v3919_v13 = vpop.f32.mrf.mxu1 }
 0x68b   : > { %v3920_v48 = vadd.f32 %v9417_v61, %v3919_v13 }
 0x68c   : > { %v5386_v3 = vpop.f32.mrf.mxu1 }
 0x68d   : > { %v3935_v42 = vadd.f32 %v5386_v3, %v9417_v61 }
 0x68e   : > { %v3929_v49 = vpop.f32.mrf.mxu1 }
 0x68f   : > { %v3930_v44 = vadd.f32 %v9417_v61, %v3929_v49 }
 0x690   : > { %v5389_v31 = vpop.f32.mrf.mxu1 }
 0x691   : > { %v3945_v40 = vadd.f32 %v5389_v31, %v9417_v61 }
 0x692   : > { %v3939_v28 = vpop.f32.mrf.mxu1 }
 0x693   : > { %v3940_v47 = vadd.f32 %v9417_v61, %v3939_v28 }
 0x694   : > { %v5436_v23 = vpop.f32.mrf.mxu1 }
 0x695   : > { %v4100_v1 = vadd.f32 %v5436_v23, %v9412_v38 }
 0x696   : > { %v4094_v9 = vpop.f32.mrf.mxu1 }
 0x697   : > { %v4142_v63 = vadd.f32 %v4100_v1, %v3915_v58  ;;  %v4095_v41 = vadd.f32 %v9412_v38, %v4094_v9 }
 0x698   : > { %v5439_v37 = vpop.f32.mrf.mxu1 }
 0x699   : > { %v4158_v8 = vmax.f32 %v4142_v63, 0.0  ;;  %v4141_v4 = vadd.f32 %v4095_v41, %v3910_v26  ;;  %v4110_v12 = vadd.f32 %v5439_v37, %v9412_v38 }
 0x69a   : > { %v4104_v56 = vpop.f32.mrf.mxu1 }
 0x69b   : > { %4174 = vst [vmem:[%s6204_s26 + $0x48] sm:$0xff] %v4158_v8  ;;  %v4157_v36 = vmax.f32 %v4141_v4, 0.0  ;;  %v4144_v5 = vadd.f32 %v4110_v12, %v3925_v60  ;;  %v4105_v34 = vadd.f32 %v9412_v38, %v4104_v56 }
 0x69c   : > { %v5442_v62 = vpop.f32.mrf.mxu1 }
 0x69d   : > { %4173 = vst [vmem:[%s6204_s26 + $0x40] sm:$0xff] %v4157_v36  ;;  %v4160_v19 = vmax.f32 %v4144_v5, 0.0  ;;  %v4143_v39 = vadd.f32 %v4105_v34, %v3920_v48  ;;  %v4120_v35 = vadd.f32 %v5442_v62, %v9412_v38 }
 0x69e   : > { %v4114_v45 = vpop.f32.mrf.mxu1 }
 0x69f   : > { %4176 = vst [vmem:[%s6204_s26 + $0x58] sm:$0xff] %v4160_v19  ;;  %v4159_v27 = vmax.f32 %v4143_v39, 0.0  ;;  %v4146_v17 = vadd.f32 %v4120_v35, %v3935_v42  ;;  %v4115_v22 = vadd.f32 %v9412_v38, %v4114_v45 }
 0x6a0   : > { %v5445_v52 = vpop.f32.mrf.mxu1 }
 0x6a1   : > { %4175 = vst [vmem:[%s6204_s26 + $0x50] sm:$0xff] %v4159_v27  ;;  %v4162_v7 = vmax.f32 %v4146_v17, 0.0  ;;  %v4145_v53 = vadd.f32 %v4115_v22, %v3930_v44  ;;  %v4130_v6 = vadd.f32 %v5445_v52, %v9412_v38 }
 0x6a2   : > { %v4124_v16 = vpop.f32.mrf.mxu1 }
 0x6a3   : > { %4178 = vst [vmem:[%s6204_s26 + $0x68] sm:$0xff] %v4162_v7  ;;  %v4161_v15 = vmax.f32 %v4145_v53, 0.0  ;;  %v4148_v21 = vadd.f32 %v4130_v6, %v3945_v40  ;;  %v4125_v50 = vadd.f32 %v9412_v38, %v4124_v16 }
 0x6a5   : > { %4177 = vst [vmem:[%s6204_s26 + $0x60] sm:$0xff] %v4161_v15  ;;  %v4164_v54 = vmax.f32 %v4148_v21, 0.0  ;;  %v4147_v29 = vadd.f32 %v4125_v50, %v3940_v47 }
 0x6a7   : > { %4180 = vst [vmem:[%s6204_s26 + $0x78] sm:$0xff] %v4164_v54  ;;  %v4163_v61 = vmax.f32 %v4147_v29, 0.0 }
 0x6a9   : > { %4179 = vst [vmem:[%s6204_s26 + $0x70] sm:$0xff] %v4163_v61 }
 0x6aa   : > { %5874 = shalt.err (!%p5871_p9)
}
 0x6ab   : > { %s5875_s26 = scalar_lea.hbm %s9470_s5, 2048  ;;  %s5879_s21 = scalar_lea.hbm %s9526_s9, 4096 }
 0x6ac   : > { %p5876_p2 = scmp.ne.s32.totalorder %s9470_s5, %s5875_s26  ;;  %p5880_p12 = scmp.lt.s32.totalorder %s9470_s5, %s9526_s9 }
 0x6ad   : > { %p5881_p7 = scmp.lt.s32.totalorder %s5879_s21, %s5875_s26 }
 0x6ae   : > { %p5877_p3 = pnand %p5876_p2, %p10177_p0 }
 0x6af   : > { %p5882_p1 = por %p5881_p7, %p5880_p12 }
 0x6b0   : > { %p5878_p10 = pneg %p5877_p3 }
 0x6b2   : > { %p5883_p13 = pnand %p5882_p1, %p5878_p10 }
 0x6b4   : > { %5886 = shalt.err (!%p5883_p13)
}
 0x6b5   : > { %s5975_s1 = smov 128   ;;  %s5976_s29 = smov 8  }
 0x6b6   : > { %5624 = dma.vmem_to_hbm [thread:$0]  (%p10177_p0), %s9472_s28, 2048, %s9470_s5, %s4182_s22, %s5975_s1, %s5975_s1, %s5976_s29  }
 0x6b7 PF: > { %s4210_s17 = sand.u32 1, %s5937_s30   ;;  %p10178_p11 = scmp.ne.s32.totalorder %s9571_s16, 0 }
 0x6b8   : > { %p10179_p5 = scmp.ge.s32.totalorder %s5949_s12, 2  ;;  %s4211_s13 = scalar_lea.sflag [#allocation5], %s4210_s17 }
 0x6ba   : > { %p5644_p6 = pnand %p10179_p5, %p10178_p11 }
 0x6bc   : > { %p5645_p4 = pneg %p5644_p6 }
 0x6be   : > { %5932 = dma.done.wait (%p5645_p4), %s4211_s13, 2048  }
 0x6bf   : > { %5934 = vsyncadd (%p5645_p4), %s4211_s13, 4294965248  ;;  %p24_p8 = scmp.ge.s32.totalorder %s6127_s18, 4   ;;  %s10180_s30 = smov %s5941_s10 }
 0x6c0   : > { %s10181_s10 = smov %s5945_s11  ;;  %s10182_s11 = smov %s6143_s23 }
 0x6c1   : > { %s10183_s12 = smov %s6127_s18  ;;  %26 = sbr.rel (!%p24_p8) target bundleno = 11 (0xb), region = 206 }
 0x6c6   :  { %4216 = vsyncpa [#allocation4], 1 }
 0x6c7   :  { %4218 = vsyncpa [#allocation4 + $0x1], 1 }
 0x6c8   :  { %4219 = vsyncpa [#allocation7], 1 }
 0x6c9   :  { %4220 = vsyncpa [#allocation10], 1 }
 0x6ca   :  { %4221 = vsyncpa [#allocation5], 1 }
 0x6cb   :  { %4223 = vsyncpa [#allocation5 + $0x1], 1 }

</bundles_post_ra>
